<compile_context>
chip_gen: v5e
topology: v5e:2x2
jax: 0.10.0
libtpu: 0.0.40
codegen_flags: <defaults>
</compile_context>

<pallas_src>
import jax
import jax.numpy as jnp
from jax import lax
from jax.experimental import pallas as pl
from jax.experimental.pallas import tpu as pltpu

LN_EPS = 1e-5  # PyTorch nn.LayerNorm default


def _round_up(x, m):
    return ((x + m - 1) // m) * m


def _layernorm(x, gamma, beta):
    mu = jnp.mean(x, axis=-1, keepdims=True)
    diff = x - mu
    var = jnp.mean(diff * diff, axis=-1, keepdims=True)
    return diff * lax.rsqrt(var + LN_EPS) * gamma + beta


def light_dnn_kernel(
    ids_ref,                               # [TB, L] int32 token ids (batch tile)
    tab_ref,                               # [V, E]  bf16 embedding table (VMEM resident)
    w1a_ref, w1b_ref,                      # block1 weight split: [E, H] (mean), [E, H] (max)
    b1_ref, g1_ref, be1_ref,               # block1 bias / LN gamma / LN beta: [1, H]
    w2_ref, b2_ref, g2_ref, be2_ref,       # block2: [H, 128], [1, 128], [1, 128], [1, 128]
    w3_ref, b3_ref,                        # output: [1, 128] row, [1, 1]
    out_ref,                               # [TB, 1] f32
):
    ids = ids_ref[...]                     # [TB, L] int32
    tab = tab_ref[...]                     # [V, E]  bf16
    TB, L = ids.shape
    V, E = tab.shape

    # Loop-invariant column iota, hoisted (JAX does not CSE broadcast_in_dim).
    col = lax.broadcasted_iota(jnp.int32, (TB, V), 1)          # [TB, V]

    # Fused embedding gather + sequence pooling.  For each position l:
    # one-hot(ids[:, l]) @ table (exact gather on the MXU), then accumulate the
    # running sum (-> mean) and running max on the VPU.
    sum_pool = jnp.zeros((TB, E), jnp.float32)
    max_pool = jnp.full((TB, E), -jnp.inf, jnp.float32)
    for l in range(L):                     # L is small & static -> unrolled
        ids_l = ids[:, l:l + 1]                                          # [TB, 1]
        onehot = jnp.where(ids_l == col, 1.0, 0.0).astype(tab.dtype)     # [TB, V] bf16
        emb_l = jnp.dot(onehot, tab, preferred_element_type=jnp.float32)  # [TB, E] f32
        sum_pool = sum_pool + emb_l
        max_pool = jnp.maximum(max_pool, emb_l)

    mean_pool = sum_pool * (1.0 / L)

    # block1: Linear -> LayerNorm -> ReLU -> Dropout(identity)
    # pooled = cat([mean, max]) @ w1  ==  mean @ w1[:E] + max @ w1[E:]
    # (split weight avoids the lane-axis concatenate copy entirely).
    h1 = (jnp.dot(mean_pool, w1a_ref[...], preferred_element_type=jnp.float32)
          + jnp.dot(max_pool, w1b_ref[...], preferred_element_type=jnp.float32)
          + b1_ref[...])
    h1 = jnp.maximum(_layernorm(h1, g1_ref[...], be1_ref[...]), 0.0)

    # block2: Linear -> LayerNorm -> ReLU -> Dropout(identity)
    h2 = jnp.dot(h1, w2_ref[...], preferred_element_type=jnp.float32) + b2_ref[...]
    h2 = jnp.maximum(_layernorm(h2, g2_ref[...], be2_ref[...]), 0.0)

    # output: Linear(128, 1) as VPU multiply + lane reduce.
    out = jnp.sum(h2 * w3_ref[...], axis=-1, keepdims=True) + b3_ref[...]
    out_ref[...] = out.astype(out_ref.dtype)


def light_dnn_forward(x_ids, emb_table, params, *, tb=None):
    """x_ids: int [B, L] token ids.  Returns f32 [B]."""
    x_ids = x_ids.astype(jnp.int32)
    B, L = x_ids.shape
    V, E = emb_table.shape
    H = params["w1"].shape[1]

    # bf16 table halves the dominant resident/streamed bytes; math stays f32.
    tab = emb_table.astype(jnp.bfloat16)

    # Split block1 weight into the mean-half and max-half once, outside the grid.
    w1a = params["w1"][:E, :]
    w1b = params["w1"][E:, :]

    # Batch tile: multiple of 8 sublanes; 128 rows default (MXU-friendly M dim,
    # amortizes the ~0.35us/step pipeline overhead).  Everything fits well under
    # the 32 MiB scoped-VMEM budget (valid on v5e/v6e/v7x).
    if tb is None:
        tb = min(128, _round_up(B, 8))
    tb = max(8, (tb // 8) * 8)
    B_pad = _round_up(B, tb)
    if B_pad != B:
        # Pad with token 0 (valid id); padded output rows are sliced off below.
        x_ids = jnp.pad(x_ids, ((0, B_pad - B), (0, 0)))

    grid = (B_pad // tb,)

    def batch_map(i):
        return (i, 0)

    def const2(i):
        return (0, 0)

    in_specs = [
        pl.BlockSpec((tb, L), batch_map),      # token ids (streamed per tile)
        pl.BlockSpec((V, E), const2),          # embedding table (DMA'd once)
        pl.BlockSpec((E, H), const2),          # w1 mean-half
        pl.BlockSpec((E, H), const2),          # w1 max-half
        pl.BlockSpec((1, H), const2),          # b1
        pl.BlockSpec((1, H), const2),          # gamma1
        pl.BlockSpec((1, H), const2),          # beta1
        pl.BlockSpec((H, 128), const2),        # w2
        pl.BlockSpec((1, 128), const2),        # b2
        pl.BlockSpec((1, 128), const2),        # gamma2
        pl.BlockSpec((1, 128), const2),        # beta2
        pl.BlockSpec((1, 128), const2),        # w3 (row vector)
        pl.BlockSpec((1, 1), const2),          # b3
    ]
    out_specs = pl.BlockSpec((tb, 1), batch_map)

    out = pl.pallas_call(
        light_dnn_kernel,
        grid=grid,
        in_specs=in_specs,
        out_specs=out_specs,
        out_shape=jax.ShapeDtypeStruct((B_pad, 1), jnp.float32),
        compiler_params=pltpu.CompilerParams(
            dimension_semantics=("parallel",),      # batch axis: megacore-shardable
            vmem_limit_bytes=32 * 1024 * 1024,
        ),
    )(
        x_ids, tab,
        w1a, w1b, params["b1"], params["g1"], params["be1"],
        params["w2"], params["b2"], params["g2"], params["be2"],
        params["w3"], params["b3"],
    )
    return out[:B, 0]   # drop batch padding, .squeeze(1)


def init_params(key, embedding_dim, hidden_dim):
    ks = jax.random.split(key, 6)
    two_e = 2 * embedding_dim

    def lin(kw, kb, fan_in, fan_out):
        bound = 1.0 / (fan_in ** 0.5)
        w = jax.random.uniform(kw, (fan_in, fan_out), jnp.float32, -bound, bound)
        b = jax.random.uniform(kb, (1, fan_out), jnp.float32, -bound, bound)
        return w, b

    w1, b1 = lin(ks[0], ks[1], two_e, hidden_dim)
    w2, b2 = lin(ks[2], ks[3], hidden_dim, 128)
    w3, b3 = lin(ks[4], ks[5], 128, 1)
    return {
        "w1": w1, "b1": b1,
        "g1": jnp.ones((1, hidden_dim), jnp.float32),
        "be1": jnp.zeros((1, hidden_dim), jnp.float32),
        "w2": w2, "b2": b2,
        "g2": jnp.ones((1, 128), jnp.float32),
        "be2": jnp.zeros((1, 128), jnp.float32),
        "w3": w3.T,          # stored as [1, 128] row for the VPU lane-reduce output
        "b3": b3,            # [1, 1]
    }


def reference_forward(x_ids, emb_table, params):
    """Pure-JAX reference of the PyTorch forward (same bf16 table storage)."""
    emb = jnp.take(emb_table.astype(jnp.bfloat16), x_ids, axis=0).astype(jnp.float32)
    pooled = jnp.concatenate([emb.mean(1), emb.max(1)], axis=1)

    def ln(x, g, b):
        mu = x.mean(-1, keepdims=True)
        var = ((x - mu) ** 2).mean(-1, keepdims=True)
        return (x - mu) / jnp.sqrt(var + LN_EPS) * g + b

    hp = jax.lax.Precision.HIGHEST
    h = jnp.maximum(ln(jnp.dot(pooled, params["w1"], precision=hp) + params["b1"],
                       params["g1"], params["be1"]), 0.0)
    h = jnp.maximum(ln(jnp.dot(h, params["w2"], precision=hp) + params["b2"],
                       params["g2"], params["be2"]), 0.0)
    return jnp.sum(h * params["w3"], axis=-1) + params["b3"][0, 0]


if __name__ == "__main__":
    # Small, deterministic, lane/MXU-aligned example shapes.
    B, L = 256, 16           # batch, sequence length  (TB=128 -> 2 pipelined grid steps)
    VOCAB, E = 128, 64       # embedding table; 2E = 128 (lane-dense pooled width)
    HIDDEN = 128             # hidden_dim

    key = jax.random.PRNGKey(0)
    k_emb, k_ids, k_par = jax.random.split(key, 3)

    emb_table = jax.random.normal(k_emb, (VOCAB, E), jnp.float32)
    x_ids = jax.random.randint(k_ids, (B, L), 0, VOCAB, jnp.int32)
    params = init_params(k_par, E, HIDDEN)

    out = jax.block_until_ready(light_dnn_forward(x_ids, emb_table, params))
    ref = reference_forward(x_ids, emb_table, params)

    assert out.shape == (B,), out.shape
    assert jnp.allclose(out, ref, atol=2e-3, rtol=2e-3), (out, ref)

    print("KERNEL_OK")
</pallas_src>

<mosaic_0001>
module attributes {stable_mosaic.version = 11 : i64} {
  func.func @light_dnn_kernel(%arg0: i32, %arg1: memref<128x16xi32, #tpu.memory_space<vmem>>, %arg2: memref<128x64xbf16, #tpu.memory_space<vmem>>, %arg3: memref<64x128xf32, #tpu.memory_space<vmem>>, %arg4: memref<64x128xf32, #tpu.memory_space<vmem>>, %arg5: memref<1x128xf32, #tpu.memory_space<vmem>>, %arg6: memref<1x128xf32, #tpu.memory_space<vmem>>, %arg7: memref<1x128xf32, #tpu.memory_space<vmem>>, %arg8: memref<128x128xf32, #tpu.memory_space<vmem>>, %arg9: memref<1x128xf32, #tpu.memory_space<vmem>>, %arg10: memref<1x128xf32, #tpu.memory_space<vmem>>, %arg11: memref<1x128xf32, #tpu.memory_space<vmem>>, %arg12: memref<1x128xf32, #tpu.memory_space<vmem>>, %arg13: memref<1x1xf32, #tpu.memory_space<vmem>>, %arg14: memref<128x1xf32, #tpu.memory_space<vmem>>) attributes {dimension_semantics = [#tpu.dimension_semantics<parallel>], iteration_bounds = array<i64: 2>, scalar_prefetch = 0 : i64, scratch_operands = 0 : i64, tpu.core_type = #tpu.core_type<tc>, window_params = [{transform_indices = @transform_0, window_bounds = array<i64: 128, 16>}, {pipeline_mode = #tpu.pipeline_mode<synchronous>, transform_indices = @transform_1, window_bounds = array<i64: 128, 64>}, {pipeline_mode = #tpu.pipeline_mode<synchronous>, transform_indices = @transform_2, window_bounds = array<i64: 64, 128>}, {pipeline_mode = #tpu.pipeline_mode<synchronous>, transform_indices = @transform_3, window_bounds = array<i64: 64, 128>}, {pipeline_mode = #tpu.pipeline_mode<synchronous>, transform_indices = @transform_4, window_bounds = array<i64: 1, 128>}, {pipeline_mode = #tpu.pipeline_mode<synchronous>, transform_indices = @transform_5, window_bounds = array<i64: 1, 128>}, {pipeline_mode = #tpu.pipeline_mode<synchronous>, transform_indices = @transform_6, window_bounds = array<i64: 1, 128>}, {pipeline_mode = #tpu.pipeline_mode<synchronous>, transform_indices = @transform_7, window_bounds = array<i64: 128, 128>}, {pipeline_mode = #tpu.pipeline_mode<synchronous>, transform_indices = @transform_8, window_bounds = array<i64: 1, 128>}, {pipeline_mode = #tpu.pipeline_mode<synchronous>, transform_indices = @transform_9, window_bounds = array<i64: 1, 128>}, {pipeline_mode = #tpu.pipeline_mode<synchronous>, transform_indices = @transform_10, window_bounds = array<i64: 1, 128>}, {pipeline_mode = #tpu.pipeline_mode<synchronous>, transform_indices = @transform_11, window_bounds = array<i64: 1, 128>}, {pipeline_mode = #tpu.pipeline_mode<synchronous>, transform_indices = @transform_12, window_bounds = array<i64: 1, 1>}, {transform_indices = @transform_13, window_bounds = array<i64: 128, 1>}]} {
    %c0 = arith.constant 0 : index
    %c0_0 = arith.constant 0 : index
    %0 = vector.load %arg1[%c0, %c0_0] : memref<128x16xi32, #tpu.memory_space<vmem>>, vector<128x16xi32>
    %c0_1 = arith.constant 0 : index
    %c0_2 = arith.constant 0 : index
    %1 = vector.load %arg2[%c0_1, %c0_2] : memref<128x64xbf16, #tpu.memory_space<vmem>>, vector<128x64xbf16>
    %2 = tpu.iota {dimensions = array<i32: 1>} : vector<128x128xi32>
    %cst = arith.constant 0.000000e+00 : f32
    %3 = vector.broadcast %cst : f32 to vector<128x64xf32>
    %cst_3 = arith.constant 0xFF800000 : f32
    %4 = vector.broadcast %cst_3 : f32 to vector<128x64xf32>
    %5 = vector.extract_strided_slice %0 {offsets = [0, 0], sizes = [128, 1], strides = [1, 1]} : vector<128x16xi32> to vector<128x1xi32>
    %6 = vector.broadcast %5 : vector<128x1xi32> to vector<128x128xi32>
    %7 = arith.cmpi eq, %6, %2 : vector<128x128xi32>
    %cst_4 = arith.constant 1.000000e+00 : f32
    %cst_5 = arith.constant 0.000000e+00 : f32
    %8 = vector.broadcast %cst_4 : f32 to vector<128x128xf32>
    %9 = vector.broadcast %cst_5 : f32 to vector<128x128xf32>
    %10 = arith.select %7, %8, %9 : vector<128x128xi1>, vector<128x128xf32>
    %11 = arith.truncf %10 : vector<128x128xf32> to vector<128x128xbf16>
    %cst_6 = arith.constant dense<0.000000e+00> : vector<128x64xf32>
    %12 = tpu.matmul %11, %1, %cst_6 {dimension_numbers = #tpu.dot_dimension_numbers<[1], [0], [0], [1], [0, 0, 1, 1], [], []>} : vector<128x128xbf16>, vector<128x64xbf16>, vector<128x64xf32> -> vector<128x64xf32>
    %13 = arith.addf %3, %12 : vector<128x64xf32>
    %14 = arith.maximumf %4, %12 : vector<128x64xf32>
    %15 = vector.extract_strided_slice %0 {offsets = [0, 1], sizes = [128, 1], strides = [1, 1]} : vector<128x16xi32> to vector<128x1xi32>
    %16 = vector.broadcast %15 : vector<128x1xi32> to vector<128x128xi32>
    %17 = arith.cmpi eq, %16, %2 : vector<128x128xi32>
    %cst_7 = arith.constant 1.000000e+00 : f32
    %cst_8 = arith.constant 0.000000e+00 : f32
    %18 = vector.broadcast %cst_7 : f32 to vector<128x128xf32>
    %19 = vector.broadcast %cst_8 : f32 to vector<128x128xf32>
    %20 = arith.select %17, %18, %19 : vector<128x128xi1>, vector<128x128xf32>
    %21 = arith.truncf %20 : vector<128x128xf32> to vector<128x128xbf16>
    %cst_9 = arith.constant dense<0.000000e+00> : vector<128x64xf32>
    %22 = tpu.matmul %21, %1, %cst_9 {dimension_numbers = #tpu.dot_dimension_numbers<[1], [0], [0], [1], [0, 0, 1, 1], [], []>} : vector<128x128xbf16>, vector<128x64xbf16>, vector<128x64xf32> -> vector<128x64xf32>
    %23 = arith.addf %13, %22 : vector<128x64xf32>
    %24 = arith.maximumf %14, %22 : vector<128x64xf32>
    %25 = vector.extract_strided_slice %0 {offsets = [0, 2], sizes = [128, 1], strides = [1, 1]} : vector<128x16xi32> to vector<128x1xi32>
    %26 = vector.broadcast %25 : vector<128x1xi32> to vector<128x128xi32>
    %27 = arith.cmpi eq, %26, %2 : vector<128x128xi32>
    %cst_10 = arith.constant 1.000000e+00 : f32
    %cst_11 = arith.constant 0.000000e+00 : f32
    %28 = vector.broadcast %cst_10 : f32 to vector<128x128xf32>
    %29 = vector.broadcast %cst_11 : f32 to vector<128x128xf32>
    %30 = arith.select %27, %28, %29 : vector<128x128xi1>, vector<128x128xf32>
    %31 = arith.truncf %30 : vector<128x128xf32> to vector<128x128xbf16>
    %cst_12 = arith.constant dense<0.000000e+00> : vector<128x64xf32>
    %32 = tpu.matmul %31, %1, %cst_12 {dimension_numbers = #tpu.dot_dimension_numbers<[1], [0], [0], [1], [0, 0, 1, 1], [], []>} : vector<128x128xbf16>, vector<128x64xbf16>, vector<128x64xf32> -> vector<128x64xf32>
    %33 = arith.addf %23, %32 : vector<128x64xf32>
    %34 = arith.maximumf %24, %32 : vector<128x64xf32>
    %35 = vector.extract_strided_slice %0 {offsets = [0, 3], sizes = [128, 1], strides = [1, 1]} : vector<128x16xi32> to vector<128x1xi32>
    %36 = vector.broadcast %35 : vector<128x1xi32> to vector<128x128xi32>
    %37 = arith.cmpi eq, %36, %2 : vector<128x128xi32>
    %cst_13 = arith.constant 1.000000e+00 : f32
    %cst_14 = arith.constant 0.000000e+00 : f32
    %38 = vector.broadcast %cst_13 : f32 to vector<128x128xf32>
    %39 = vector.broadcast %cst_14 : f32 to vector<128x128xf32>
    %40 = arith.select %37, %38, %39 : vector<128x128xi1>, vector<128x128xf32>
    %41 = arith.truncf %40 : vector<128x128xf32> to vector<128x128xbf16>
    %cst_15 = arith.constant dense<0.000000e+00> : vector<128x64xf32>
    %42 = tpu.matmul %41, %1, %cst_15 {dimension_numbers = #tpu.dot_dimension_numbers<[1], [0], [0], [1], [0, 0, 1, 1], [], []>} : vector<128x128xbf16>, vector<128x64xbf16>, vector<128x64xf32> -> vector<128x64xf32>
    %43 = arith.addf %33, %42 : vector<128x64xf32>
    %44 = arith.maximumf %34, %42 : vector<128x64xf32>
    %45 = vector.extract_strided_slice %0 {offsets = [0, 4], sizes = [128, 1], strides = [1, 1]} : vector<128x16xi32> to vector<128x1xi32>
    %46 = vector.broadcast %45 : vector<128x1xi32> to vector<128x128xi32>
    %47 = arith.cmpi eq, %46, %2 : vector<128x128xi32>
    %cst_16 = arith.constant 1.000000e+00 : f32
    %cst_17 = arith.constant 0.000000e+00 : f32
    %48 = vector.broadcast %cst_16 : f32 to vector<128x128xf32>
    %49 = vector.broadcast %cst_17 : f32 to vector<128x128xf32>
    %50 = arith.select %47, %48, %49 : vector<128x128xi1>, vector<128x128xf32>
    %51 = arith.truncf %50 : vector<128x128xf32> to vector<128x128xbf16>
    %cst_18 = arith.constant dense<0.000000e+00> : vector<128x64xf32>
    %52 = tpu.matmul %51, %1, %cst_18 {dimension_numbers = #tpu.dot_dimension_numbers<[1], [0], [0], [1], [0, 0, 1, 1], [], []>} : vector<128x128xbf16>, vector<128x64xbf16>, vector<128x64xf32> -> vector<128x64xf32>
    %53 = arith.addf %43, %52 : vector<128x64xf32>
    %54 = arith.maximumf %44, %52 : vector<128x64xf32>
    %55 = vector.extract_strided_slice %0 {offsets = [0, 5], sizes = [128, 1], strides = [1, 1]} : vector<128x16xi32> to vector<128x1xi32>
    %56 = vector.broadcast %55 : vector<128x1xi32> to vector<128x128xi32>
    %57 = arith.cmpi eq, %56, %2 : vector<128x128xi32>
    %cst_19 = arith.constant 1.000000e+00 : f32
    %cst_20 = arith.constant 0.000000e+00 : f32
    %58 = vector.broadcast %cst_19 : f32 to vector<128x128xf32>
    %59 = vector.broadcast %cst_20 : f32 to vector<128x128xf32>
    %60 = arith.select %57, %58, %59 : vector<128x128xi1>, vector<128x128xf32>
    %61 = arith.truncf %60 : vector<128x128xf32> to vector<128x128xbf16>
    %cst_21 = arith.constant dense<0.000000e+00> : vector<128x64xf32>
    %62 = tpu.matmul %61, %1, %cst_21 {dimension_numbers = #tpu.dot_dimension_numbers<[1], [0], [0], [1], [0, 0, 1, 1], [], []>} : vector<128x128xbf16>, vector<128x64xbf16>, vector<128x64xf32> -> vector<128x64xf32>
    %63 = arith.addf %53, %62 : vector<128x64xf32>
    %64 = arith.maximumf %54, %62 : vector<128x64xf32>
    %65 = vector.extract_strided_slice %0 {offsets = [0, 6], sizes = [128, 1], strides = [1, 1]} : vector<128x16xi32> to vector<128x1xi32>
    %66 = vector.broadcast %65 : vector<128x1xi32> to vector<128x128xi32>
    %67 = arith.cmpi eq, %66, %2 : vector<128x128xi32>
    %cst_22 = arith.constant 1.000000e+00 : f32
    %cst_23 = arith.constant 0.000000e+00 : f32
    %68 = vector.broadcast %cst_22 : f32 to vector<128x128xf32>
    %69 = vector.broadcast %cst_23 : f32 to vector<128x128xf32>
    %70 = arith.select %67, %68, %69 : vector<128x128xi1>, vector<128x128xf32>
    %71 = arith.truncf %70 : vector<128x128xf32> to vector<128x128xbf16>
    %cst_24 = arith.constant dense<0.000000e+00> : vector<128x64xf32>
    %72 = tpu.matmul %71, %1, %cst_24 {dimension_numbers = #tpu.dot_dimension_numbers<[1], [0], [0], [1], [0, 0, 1, 1], [], []>} : vector<128x128xbf16>, vector<128x64xbf16>, vector<128x64xf32> -> vector<128x64xf32>
    %73 = arith.addf %63, %72 : vector<128x64xf32>
    %74 = arith.maximumf %64, %72 : vector<128x64xf32>
    %75 = vector.extract_strided_slice %0 {offsets = [0, 7], sizes = [128, 1], strides = [1, 1]} : vector<128x16xi32> to vector<128x1xi32>
    %76 = vector.broadcast %75 : vector<128x1xi32> to vector<128x128xi32>
    %77 = arith.cmpi eq, %76, %2 : vector<128x128xi32>
    %cst_25 = arith.constant 1.000000e+00 : f32
    %cst_26 = arith.constant 0.000000e+00 : f32
    %78 = vector.broadcast %cst_25 : f32 to vector<128x128xf32>
    %79 = vector.broadcast %cst_26 : f32 to vector<128x128xf32>
    %80 = arith.select %77, %78, %79 : vector<128x128xi1>, vector<128x128xf32>
    %81 = arith.truncf %80 : vector<128x128xf32> to vector<128x128xbf16>
    %cst_27 = arith.constant dense<0.000000e+00> : vector<128x64xf32>
    %82 = tpu.matmul %81, %1, %cst_27 {dimension_numbers = #tpu.dot_dimension_numbers<[1], [0], [0], [1], [0, 0, 1, 1], [], []>} : vector<128x128xbf16>, vector<128x64xbf16>, vector<128x64xf32> -> vector<128x64xf32>
    %83 = arith.addf %73, %82 : vector<128x64xf32>
    %84 = arith.maximumf %74, %82 : vector<128x64xf32>
    %85 = vector.extract_strided_slice %0 {offsets = [0, 8], sizes = [128, 1], strides = [1, 1]} : vector<128x16xi32> to vector<128x1xi32>
    %86 = vector.broadcast %85 : vector<128x1xi32> to vector<128x128xi32>
    %87 = arith.cmpi eq, %86, %2 : vector<128x128xi32>
    %cst_28 = arith.constant 1.000000e+00 : f32
    %cst_29 = arith.constant 0.000000e+00 : f32
    %88 = vector.broadcast %cst_28 : f32 to vector<128x128xf32>
    %89 = vector.broadcast %cst_29 : f32 to vector<128x128xf32>
    %90 = arith.select %87, %88, %89 : vector<128x128xi1>, vector<128x128xf32>
    %91 = arith.truncf %90 : vector<128x128xf32> to vector<128x128xbf16>
    %cst_30 = arith.constant dense<0.000000e+00> : vector<128x64xf32>
    %92 = tpu.matmul %91, %1, %cst_30 {dimension_numbers = #tpu.dot_dimension_numbers<[1], [0], [0], [1], [0, 0, 1, 1], [], []>} : vector<128x128xbf16>, vector<128x64xbf16>, vector<128x64xf32> -> vector<128x64xf32>
    %93 = arith.addf %83, %92 : vector<128x64xf32>
    %94 = arith.maximumf %84, %92 : vector<128x64xf32>
    %95 = vector.extract_strided_slice %0 {offsets = [0, 9], sizes = [128, 1], strides = [1, 1]} : vector<128x16xi32> to vector<128x1xi32>
    %96 = vector.broadcast %95 : vector<128x1xi32> to vector<128x128xi32>
    %97 = arith.cmpi eq, %96, %2 : vector<128x128xi32>
    %cst_31 = arith.constant 1.000000e+00 : f32
    %cst_32 = arith.constant 0.000000e+00 : f32
    %98 = vector.broadcast %cst_31 : f32 to vector<128x128xf32>
    %99 = vector.broadcast %cst_32 : f32 to vector<128x128xf32>
    %100 = arith.select %97, %98, %99 : vector<128x128xi1>, vector<128x128xf32>
    %101 = arith.truncf %100 : vector<128x128xf32> to vector<128x128xbf16>
    %cst_33 = arith.constant dense<0.000000e+00> : vector<128x64xf32>
    %102 = tpu.matmul %101, %1, %cst_33 {dimension_numbers = #tpu.dot_dimension_numbers<[1], [0], [0], [1], [0, 0, 1, 1], [], []>} : vector<128x128xbf16>, vector<128x64xbf16>, vector<128x64xf32> -> vector<128x64xf32>
    %103 = arith.addf %93, %102 : vector<128x64xf32>
    %104 = arith.maximumf %94, %102 : vector<128x64xf32>
    %105 = vector.extract_strided_slice %0 {offsets = [0, 10], sizes = [128, 1], strides = [1, 1]} : vector<128x16xi32> to vector<128x1xi32>
    %106 = vector.broadcast %105 : vector<128x1xi32> to vector<128x128xi32>
    %107 = arith.cmpi eq, %106, %2 : vector<128x128xi32>
    %cst_34 = arith.constant 1.000000e+00 : f32
    %cst_35 = arith.constant 0.000000e+00 : f32
    %108 = vector.broadcast %cst_34 : f32 to vector<128x128xf32>
    %109 = vector.broadcast %cst_35 : f32 to vector<128x128xf32>
    %110 = arith.select %107, %108, %109 : vector<128x128xi1>, vector<128x128xf32>
    %111 = arith.truncf %110 : vector<128x128xf32> to vector<128x128xbf16>
    %cst_36 = arith.constant dense<0.000000e+00> : vector<128x64xf32>
    %112 = tpu.matmul %111, %1, %cst_36 {dimension_numbers = #tpu.dot_dimension_numbers<[1], [0], [0], [1], [0, 0, 1, 1], [], []>} : vector<128x128xbf16>, vector<128x64xbf16>, vector<128x64xf32> -> vector<128x64xf32>
    %113 = arith.addf %103, %112 : vector<128x64xf32>
    %114 = arith.maximumf %104, %112 : vector<128x64xf32>
    %115 = vector.extract_strided_slice %0 {offsets = [0, 11], sizes = [128, 1], strides = [1, 1]} : vector<128x16xi32> to vector<128x1xi32>
    %116 = vector.broadcast %115 : vector<128x1xi32> to vector<128x128xi32>
    %117 = arith.cmpi eq, %116, %2 : vector<128x128xi32>
    %cst_37 = arith.constant 1.000000e+00 : f32
    %cst_38 = arith.constant 0.000000e+00 : f32
    %118 = vector.broadcast %cst_37 : f32 to vector<128x128xf32>
    %119 = vector.broadcast %cst_38 : f32 to vector<128x128xf32>
    %120 = arith.select %117, %118, %119 : vector<128x128xi1>, vector<128x128xf32>
    %121 = arith.truncf %120 : vector<128x128xf32> to vector<128x128xbf16>
    %cst_39 = arith.constant dense<0.000000e+00> : vector<128x64xf32>
    %122 = tpu.matmul %121, %1, %cst_39 {dimension_numbers = #tpu.dot_dimension_numbers<[1], [0], [0], [1], [0, 0, 1, 1], [], []>} : vector<128x128xbf16>, vector<128x64xbf16>, vector<128x64xf32> -> vector<128x64xf32>
    %123 = arith.addf %113, %122 : vector<128x64xf32>
    %124 = arith.maximumf %114, %122 : vector<128x64xf32>
    %125 = vector.extract_strided_slice %0 {offsets = [0, 12], sizes = [128, 1], strides = [1, 1]} : vector<128x16xi32> to vector<128x1xi32>
    %126 = vector.broadcast %125 : vector<128x1xi32> to vector<128x128xi32>
    %127 = arith.cmpi eq, %126, %2 : vector<128x128xi32>
    %cst_40 = arith.constant 1.000000e+00 : f32
    %cst_41 = arith.constant 0.000000e+00 : f32
    %128 = vector.broadcast %cst_40 : f32 to vector<128x128xf32>
    %129 = vector.broadcast %cst_41 : f32 to vector<128x128xf32>
    %130 = arith.select %127, %128, %129 : vector<128x128xi1>, vector<128x128xf32>
    %131 = arith.truncf %130 : vector<128x128xf32> to vector<128x128xbf16>
    %cst_42 = arith.constant dense<0.000000e+00> : vector<128x64xf32>
    %132 = tpu.matmul %131, %1, %cst_42 {dimension_numbers = #tpu.dot_dimension_numbers<[1], [0], [0], [1], [0, 0, 1, 1], [], []>} : vector<128x128xbf16>, vector<128x64xbf16>, vector<128x64xf32> -> vector<128x64xf32>
    %133 = arith.addf %123, %132 : vector<128x64xf32>
    %134 = arith.maximumf %124, %132 : vector<128x64xf32>
    %135 = vector.extract_strided_slice %0 {offsets = [0, 13], sizes = [128, 1], strides = [1, 1]} : vector<128x16xi32> to vector<128x1xi32>
    %136 = vector.broadcast %135 : vector<128x1xi32> to vector<128x128xi32>
    %137 = arith.cmpi eq, %136, %2 : vector<128x128xi32>
    %cst_43 = arith.constant 1.000000e+00 : f32
    %cst_44 = arith.constant 0.000000e+00 : f32
    %138 = vector.broadcast %cst_43 : f32 to vector<128x128xf32>
    %139 = vector.broadcast %cst_44 : f32 to vector<128x128xf32>
    %140 = arith.select %137, %138, %139 : vector<128x128xi1>, vector<128x128xf32>
    %141 = arith.truncf %140 : vector<128x128xf32> to vector<128x128xbf16>
    %cst_45 = arith.constant dense<0.000000e+00> : vector<128x64xf32>
    %142 = tpu.matmul %141, %1, %cst_45 {dimension_numbers = #tpu.dot_dimension_numbers<[1], [0], [0], [1], [0, 0, 1, 1], [], []>} : vector<128x128xbf16>, vector<128x64xbf16>, vector<128x64xf32> -> vector<128x64xf32>
    %143 = arith.addf %133, %142 : vector<128x64xf32>
    %144 = arith.maximumf %134, %142 : vector<128x64xf32>
    %145 = vector.extract_strided_slice %0 {offsets = [0, 14], sizes = [128, 1], strides = [1, 1]} : vector<128x16xi32> to vector<128x1xi32>
    %146 = vector.broadcast %145 : vector<128x1xi32> to vector<128x128xi32>
    %147 = arith.cmpi eq, %146, %2 : vector<128x128xi32>
    %cst_46 = arith.constant 1.000000e+00 : f32
    %cst_47 = arith.constant 0.000000e+00 : f32
    %148 = vector.broadcast %cst_46 : f32 to vector<128x128xf32>
    %149 = vector.broadcast %cst_47 : f32 to vector<128x128xf32>
    %150 = arith.select %147, %148, %149 : vector<128x128xi1>, vector<128x128xf32>
    %151 = arith.truncf %150 : vector<128x128xf32> to vector<128x128xbf16>
    %cst_48 = arith.constant dense<0.000000e+00> : vector<128x64xf32>
    %152 = tpu.matmul %151, %1, %cst_48 {dimension_numbers = #tpu.dot_dimension_numbers<[1], [0], [0], [1], [0, 0, 1, 1], [], []>} : vector<128x128xbf16>, vector<128x64xbf16>, vector<128x64xf32> -> vector<128x64xf32>
    %153 = arith.addf %143, %152 : vector<128x64xf32>
    %154 = arith.maximumf %144, %152 : vector<128x64xf32>
    %155 = vector.extract_strided_slice %0 {offsets = [0, 15], sizes = [128, 1], strides = [1, 1]} : vector<128x16xi32> to vector<128x1xi32>
    %156 = vector.broadcast %155 : vector<128x1xi32> to vector<128x128xi32>
    %157 = arith.cmpi eq, %156, %2 : vector<128x128xi32>
    %cst_49 = arith.constant 1.000000e+00 : f32
    %cst_50 = arith.constant 0.000000e+00 : f32
    %158 = vector.broadcast %cst_49 : f32 to vector<128x128xf32>
    %159 = vector.broadcast %cst_50 : f32 to vector<128x128xf32>
    %160 = arith.select %157, %158, %159 : vector<128x128xi1>, vector<128x128xf32>
    %161 = arith.truncf %160 : vector<128x128xf32> to vector<128x128xbf16>
    %cst_51 = arith.constant dense<0.000000e+00> : vector<128x64xf32>
    %162 = tpu.matmul %161, %1, %cst_51 {dimension_numbers = #tpu.dot_dimension_numbers<[1], [0], [0], [1], [0, 0, 1, 1], [], []>} : vector<128x128xbf16>, vector<128x64xbf16>, vector<128x64xf32> -> vector<128x64xf32>
    %163 = arith.addf %153, %162 : vector<128x64xf32>
    %164 = arith.maximumf %154, %162 : vector<128x64xf32>
    %cst_52 = arith.constant 6.250000e-02 : f32
    %165 = vector.broadcast %cst_52 : f32 to vector<128x64xf32>
    %166 = arith.mulf %163, %165 : vector<128x64xf32>
    %c0_53 = arith.constant 0 : index
    %c0_54 = arith.constant 0 : index
    %167 = vector.load %arg3[%c0_53, %c0_54] : memref<64x128xf32, #tpu.memory_space<vmem>>, vector<64x128xf32>
    %cst_55 = arith.constant dense<0.000000e+00> : vector<128x128xf32>
    %168 = tpu.matmul %166, %167, %cst_55 {dimension_numbers = #tpu.dot_dimension_numbers<[1], [0], [0], [1], [0, 0, 1, 1], [], []>} : vector<128x64xf32>, vector<64x128xf32>, vector<128x128xf32> -> vector<128x128xf32>
    %c0_56 = arith.constant 0 : index
    %c0_57 = arith.constant 0 : index
    %169 = vector.load %arg4[%c0_56, %c0_57] : memref<64x128xf32, #tpu.memory_space<vmem>>, vector<64x128xf32>
    %cst_58 = arith.constant dense<0.000000e+00> : vector<128x128xf32>
    %170 = tpu.matmul %164, %169, %cst_58 {dimension_numbers = #tpu.dot_dimension_numbers<[1], [0], [0], [1], [0, 0, 1, 1], [], []>} : vector<128x64xf32>, vector<64x128xf32>, vector<128x128xf32> -> vector<128x128xf32>
    %171 = arith.addf %168, %170 : vector<128x128xf32>
    %c0_59 = arith.constant 0 : index
    %c0_60 = arith.constant 0 : index
    %172 = vector.load %arg5[%c0_59, %c0_60] : memref<1x128xf32, #tpu.memory_space<vmem>>, vector<1x128xf32>
    %173 = vector.broadcast %172 : vector<1x128xf32> to vector<128x128xf32>
    %174 = arith.addf %171, %173 : vector<128x128xf32>
    %c0_61 = arith.constant 0 : index
    %c0_62 = arith.constant 0 : index
    %175 = vector.load %arg6[%c0_61, %c0_62] : memref<1x128xf32, #tpu.memory_space<vmem>>, vector<1x128xf32>
    %c0_63 = arith.constant 0 : index
    %c0_64 = arith.constant 0 : index
    %176 = vector.load %arg7[%c0_63, %c0_64] : memref<1x128xf32, #tpu.memory_space<vmem>>, vector<1x128xf32>
    %cst_65 = arith.constant dense<0.000000e+00> : vector<128xf32>
    %177 = vector.multi_reduction <add>, %174, %cst_65 [1] : vector<128x128xf32> to vector<128xf32>
    %178 = vector.shape_cast %177 : vector<128xf32> to vector<128x1xf32>
    %cst_66 = arith.constant 1.280000e+02 : f32
    %179 = vector.broadcast %cst_66 : f32 to vector<128x1xf32>
    %180 = arith.divf %178, %179 : vector<128x1xf32>
    %181 = vector.broadcast %180 : vector<128x1xf32> to vector<128x128xf32>
    %182 = arith.subf %174, %181 : vector<128x128xf32>
    %183 = arith.mulf %182, %182 : vector<128x128xf32>
    %cst_67 = arith.constant dense<0.000000e+00> : vector<128xf32>
    %184 = vector.multi_reduction <add>, %183, %cst_67 [1] : vector<128x128xf32> to vector<128xf32>
    %185 = vector.shape_cast %184 : vector<128xf32> to vector<128x1xf32>
    %cst_68 = arith.constant 1.280000e+02 : f32
    %186 = vector.broadcast %cst_68 : f32 to vector<128x1xf32>
    %187 = arith.divf %185, %186 : vector<128x1xf32>
    %cst_69 = arith.constant 9.99999974E-6 : f32
    %188 = vector.broadcast %cst_69 : f32 to vector<128x1xf32>
    %189 = arith.addf %187, %188 : vector<128x1xf32>
    %190 = math.rsqrt %189 : vector<128x1xf32>
    %191 = vector.broadcast %190 : vector<128x1xf32> to vector<128x128xf32>
    %192 = arith.mulf %182, %191 : vector<128x128xf32>
    %193 = vector.broadcast %175 : vector<1x128xf32> to vector<128x128xf32>
    %194 = arith.mulf %192, %193 : vector<128x128xf32>
    %195 = vector.broadcast %176 : vector<1x128xf32> to vector<128x128xf32>
    %196 = arith.addf %194, %195 : vector<128x128xf32>
    %cst_70 = arith.constant 0.000000e+00 : f32
    %197 = vector.broadcast %cst_70 : f32 to vector<128x128xf32>
    %198 = arith.maximumf %196, %197 : vector<128x128xf32>
    %c0_71 = arith.constant 0 : index
    %c0_72 = arith.constant 0 : index
    %199 = vector.load %arg8[%c0_71, %c0_72] : memref<128x128xf32, #tpu.memory_space<vmem>>, vector<128x128xf32>
    %cst_73 = arith.constant dense<0.000000e+00> : vector<128x128xf32>
    %200 = tpu.matmul %198, %199, %cst_73 {dimension_numbers = #tpu.dot_dimension_numbers<[1], [0], [0], [1], [0, 0, 1, 1], [], []>} : vector<128x128xf32>, vector<128x128xf32>, vector<128x128xf32> -> vector<128x128xf32>
    %c0_74 = arith.constant 0 : index
    %c0_75 = arith.constant 0 : index
    %201 = vector.load %arg9[%c0_74, %c0_75] : memref<1x128xf32, #tpu.memory_space<vmem>>, vector<1x128xf32>
    %202 = vector.broadcast %201 : vector<1x128xf32> to vector<128x128xf32>
    %203 = arith.addf %200, %202 : vector<128x128xf32>
    %c0_76 = arith.constant 0 : index
    %c0_77 = arith.constant 0 : index
    %204 = vector.load %arg10[%c0_76, %c0_77] : memref<1x128xf32, #tpu.memory_space<vmem>>, vector<1x128xf32>
    %c0_78 = arith.constant 0 : index
    %c0_79 = arith.constant 0 : index
    %205 = vector.load %arg11[%c0_78, %c0_79] : memref<1x128xf32, #tpu.memory_space<vmem>>, vector<1x128xf32>
    %cst_80 = arith.constant dense<0.000000e+00> : vector<128xf32>
    %206 = vector.multi_reduction <add>, %203, %cst_80 [1] : vector<128x128xf32> to vector<128xf32>
    %207 = vector.shape_cast %206 : vector<128xf32> to vector<128x1xf32>
    %cst_81 = arith.constant 1.280000e+02 : f32
    %208 = vector.broadcast %cst_81 : f32 to vector<128x1xf32>
    %209 = arith.divf %207, %208 : vector<128x1xf32>
    %210 = vector.broadcast %209 : vector<128x1xf32> to vector<128x128xf32>
    %211 = arith.subf %203, %210 : vector<128x128xf32>
    %212 = arith.mulf %211, %211 : vector<128x128xf32>
    %cst_82 = arith.constant dense<0.000000e+00> : vector<128xf32>
    %213 = vector.multi_reduction <add>, %212, %cst_82 [1] : vector<128x128xf32> to vector<128xf32>
    %214 = vector.shape_cast %213 : vector<128xf32> to vector<128x1xf32>
    %cst_83 = arith.constant 1.280000e+02 : f32
    %215 = vector.broadcast %cst_83 : f32 to vector<128x1xf32>
    %216 = arith.divf %214, %215 : vector<128x1xf32>
    %cst_84 = arith.constant 9.99999974E-6 : f32
    %217 = vector.broadcast %cst_84 : f32 to vector<128x1xf32>
    %218 = arith.addf %216, %217 : vector<128x1xf32>
    %219 = math.rsqrt %218 : vector<128x1xf32>
    %220 = vector.broadcast %219 : vector<128x1xf32> to vector<128x128xf32>
    %221 = arith.mulf %211, %220 : vector<128x128xf32>
    %222 = vector.broadcast %204 : vector<1x128xf32> to vector<128x128xf32>
    %223 = arith.mulf %221, %222 : vector<128x128xf32>
    %224 = vector.broadcast %205 : vector<1x128xf32> to vector<128x128xf32>
    %225 = arith.addf %223, %224 : vector<128x128xf32>
    %cst_85 = arith.constant 0.000000e+00 : f32
    %226 = vector.broadcast %cst_85 : f32 to vector<128x128xf32>
    %227 = arith.maximumf %225, %226 : vector<128x128xf32>
    %c0_86 = arith.constant 0 : index
    %c0_87 = arith.constant 0 : index
    %228 = vector.load %arg12[%c0_86, %c0_87] : memref<1x128xf32, #tpu.memory_space<vmem>>, vector<1x128xf32>
    %229 = vector.broadcast %228 : vector<1x128xf32> to vector<128x128xf32>
    %230 = arith.mulf %227, %229 : vector<128x128xf32>
    %cst_88 = arith.constant dense<0.000000e+00> : vector<128xf32>
    %231 = vector.multi_reduction <add>, %230, %cst_88 [1] : vector<128x128xf32> to vector<128xf32>
    %232 = vector.shape_cast %231 : vector<128xf32> to vector<128x1xf32>
    %c0_89 = arith.constant 0 : index
    %c0_90 = arith.constant 0 : index
    %233 = vector.load %arg13[%c0_89, %c0_90] : memref<1x1xf32, #tpu.memory_space<vmem>>, vector<1x1xf32>
    %234 = vector.broadcast %233 : vector<1x1xf32> to vector<128x1xf32>
    %235 = arith.addf %232, %234 : vector<128x1xf32>
    %c0_91 = arith.constant 0 : index
    %c0_92 = arith.constant 0 : index
    %236 = vector.load %arg14[%c0_91, %c0_92] : memref<128x1xf32, #tpu.memory_space<vmem>>, vector<128x1xf32>
    tpu.vector_store %arg14[%c0_91, %c0_92], %235 {strides = array<i32>} : memref<128x1xf32, #tpu.memory_space<vmem>>, vector<128x1xf32>,
    return
  }
  func.func @transform_0(%arg0: i32) -> (i32, i32) {
    %c0_i32 = arith.constant 0 : i32
    %c0_i32_0 = arith.constant 0 : i32
    return %arg0, %c0_i32 : i32, i32
  }
  func.func @transform_1(%arg0: i32) -> (i32, i32) {
    %c0_i32 = arith.constant 0 : i32
    %c0_i32_0 = arith.constant 0 : i32
    %c0_i32_1 = arith.constant 0 : i32
    return %c0_i32, %c0_i32_0 : i32, i32
  }
  func.func @transform_2(%arg0: i32) -> (i32, i32) {
    %c0_i32 = arith.constant 0 : i32
    %c0_i32_0 = arith.constant 0 : i32
    %c0_i32_1 = arith.constant 0 : i32
    return %c0_i32, %c0_i32_0 : i32, i32
  }
  func.func @transform_3(%arg0: i32) -> (i32, i32) {
    %c0_i32 = arith.constant 0 : i32
    %c0_i32_0 = arith.constant 0 : i32
    %c0_i32_1 = arith.constant 0 : i32
    return %c0_i32, %c0_i32_0 : i32, i32
  }
  func.func @transform_4(%arg0: i32) -> (i32, i32) {
    %c0_i32 = arith.constant 0 : i32
    %c0_i32_0 = arith.constant 0 : i32
    %c0_i32_1 = arith.constant 0 : i32
    return %c0_i32, %c0_i32_0 : i32, i32
  }
  func.func @transform_5(%arg0: i32) -> (i32, i32) {
    %c0_i32 = arith.constant 0 : i32
    %c0_i32_0 = arith.constant 0 : i32
    %c0_i32_1 = arith.constant 0 : i32
    return %c0_i32, %c0_i32_0 : i32, i32
  }
  func.func @transform_6(%arg0: i32) -> (i32, i32) {
    %c0_i32 = arith.constant 0 : i32
    %c0_i32_0 = arith.constant 0 : i32
    %c0_i32_1 = arith.constant 0 : i32
    return %c0_i32, %c0_i32_0 : i32, i32
  }
  func.func @transform_7(%arg0: i32) -> (i32, i32) {
    %c0_i32 = arith.constant 0 : i32
    %c0_i32_0 = arith.constant 0 : i32
    %c0_i32_1 = arith.constant 0 : i32
    return %c0_i32, %c0_i32_0 : i32, i32
  }
  func.func @transform_8(%arg0: i32) -> (i32, i32) {
    %c0_i32 = arith.constant 0 : i32
    %c0_i32_0 = arith.constant 0 : i32
    %c0_i32_1 = arith.constant 0 : i32
    return %c0_i32, %c0_i32_0 : i32, i32
  }
  func.func @transform_9(%arg0: i32) -> (i32, i32) {
    %c0_i32 = arith.constant 0 : i32
    %c0_i32_0 = arith.constant 0 : i32
    %c0_i32_1 = arith.constant 0 : i32
    return %c0_i32, %c0_i32_0 : i32, i32
  }
  func.func @transform_10(%arg0: i32) -> (i32, i32) {
    %c0_i32 = arith.constant 0 : i32
    %c0_i32_0 = arith.constant 0 : i32
    %c0_i32_1 = arith.constant 0 : i32
    return %c0_i32, %c0_i32_0 : i32, i32
  }
  func.func @transform_11(%arg0: i32) -> (i32, i32) {
    %c0_i32 = arith.constant 0 : i32
    %c0_i32_0 = arith.constant 0 : i32
    %c0_i32_1 = arith.constant 0 : i32
    return %c0_i32, %c0_i32_0 : i32, i32
  }
  func.func @transform_12(%arg0: i32) -> (i32, i32) {
    %c0_i32 = arith.constant 0 : i32
    %c0_i32_0 = arith.constant 0 : i32
    %c0_i32_1 = arith.constant 0 : i32
    return %c0_i32, %c0_i32_0 : i32, i32
  }
  func.func @transform_13(%arg0: i32) -> (i32, i32) {
    %c0_i32 = arith.constant 0 : i32
    %c0_i32_0 = arith.constant 0 : i32
    return %arg0, %c0_i32 : i32, i32
  }
}

</mosaic_0001>

<bundles_post_ra>
// kernel: tpu_custom_call.1
= control target key start
LH: loop header
LB: loop body
LE: loop exit
PB: predicated region body
PF: predicated region fallthrough
CT: control target
= control target key end

     0   :  { %s5221_s27 = smov 0   ;;  %s8549_s0 = inlined_call_operand.vmem [shape: s32[256,16], index: 0, kind: input, shape index: {}]   ;;  %s8550_s1 = inlined_call_operand.vmem [shape: bf16[128,64], index: 1, kind: input, shape index: {}]   ;;  %s8551_s2 = inlined_call_operand.vmem [shape: f32[64,128], index: 2, kind: input, shape index: {}]   ;;  %s8552_s3 = inlined_call_operand.vmem [shape: f32[64,128], index: 3, kind: input, shape index: {}]   ;;  %s8553_s4 = inlined_call_operand.vmem [shape: f32[1,128], index: 4, kind: input, shape index: {}]   ;;  %s8554_s5 = inlined_call_operand.vmem [shape: f32[1,128], index: 5, kind: input, shape index: {}]   ;;  %s8555_s6 = inlined_call_operand.vmem [shape: f32[1,128], index: 6, kind: input, shape index: {}]   ;;  %s8556_s7 = inlined_call_operand.vmem [shape: f32[128,128], index: 7, kind: input, shape index: {}]   ;;  %s8557_s8 = inlined_call_operand.vmem [shape: f32[1,128], index: 8, kind: input, shape index: {}]   ;;  %s8558_s9 = inlined_call_operand.vmem [shape: f32[1,128], index: 9, kind: input, shape index: {}]   ;;  %s8559_s10 = inlined_call_operand.vmem [shape: f32[1,128], index: 10, kind: input, shape index: {}]   ;;  %s8560_s11 = inlined_call_operand.vmem [shape: f32[1,128], index: 11, kind: input, shape index: {}]   ;;  %s8561_s12 = inlined_call_operand.<no memory space> [shape: f32[1,1], index: 12, kind: input, shape index: {}]   ;;  %s8562_s13 = inlined_call_operand.vmem [shape: f32[256,1], index: 13, kind: output, shape index: {}]  }
   0x1   :  { %v18_v0 = vstv %s8561_s12 }
   0x2   :  { %19 = vst [vmem:[#allocation2] sm:$0x1] %v18_v0 }
   0x3 LB: > { %s4484_s28 = sadd.s32 4294967295, %s5128_s27   ;;  %p4488_p0 = scmp.ge.s32.totalorder %s5128_s27, 1  ;;  %s5128_s27 = sphi %s5221_s27, %s25_s27  }
   0x4   : > { %p390_p1 = scmp.lt.s32.totalorder %s5128_s27, 3 }
   0x6   : > { %p391_p2 = pnand %p4488_p0, %p390_p1 }
   0x8   : > { %394 = sbr.rel (%p391_p2) target bundleno = 2142 (0x85e), region = 72 }
   0xd   : > { %s4489_s29 = sshll.u32 %s4484_s28, 4  ;;  %v5130_v1 = vmov 0   ;;  %v5302_v17 = vld [vmem:[%s8550_s1 + $0x38] sm:$0xff]  ;;  %v5131_v19 = vmov 1   ;;  %v5316_v20 = vld [vmem:[%s8550_s1 + $0x30] sm:$0xff]  ;;  %v5323_v21 = vld [vmem:[%s8550_s1 + $0x28] sm:$0xff]  ;;  %v478_v28 = vlaneseq }
   0xe   : > { %4875 = vset.pattern.permute.xlu2 %v5130_v1  ;;  %4874 = vset.pattern.permute.xlu1 %v5130_v1  ;;  %p435_p3 = scmp.lt.s32.totalorder %s4489_s29, 31  ;;  %v5336_v22 = vld [vmem:[%s8550_s1 + $0x20] sm:$0xff]  ;;  %v5344_v23 = vld [vmem:[%s8550_s1 + $0x18] sm:$0xff]  ;;  %v5357_v24 = vld [vmem:[%s8550_s1 + $0x10] sm:$0xff]  ;;  %v5132_v27 = vmov 2   ;;  %v5134_v39 = vmov 3  }
   0xf   : > { %4873 = vset.pattern.permute.xlu0 %v5130_v1  ;;  %4823 = vmatpush.bf16.msra.mxu3 %v5302_v17  ;;  %v5365_v25 = vld [vmem:[%s8550_s1 + $0x8] sm:$0xff]  ;;  %v5374_v26 = vld [vmem:[%s8550_s1] sm:$0xff]  ;;  %v5419_v30 = vand.u32 127, %v478_v28  ;;  %v8567_v32 = vmov 1.0|1.0   ;;  %v5135_v55 = vmov 4  }
  0x10   : > { %s8897_s29 = smov (!%p435_p3, %s4489_s29), 31  ;;  %616 = vmatpush.bf16.msra.mxu0 %v5302_v17  ;;  %4831 = vmatpush.bf16.msra.mxu1 %v5302_v17 }
  0x11   : > { %s4490_s12 = sshll.u32 %s8897_s29, 3  ;;  %4839 = vmatpush.bf16.msra.mxu2 %v5302_v17 }
  0x12   : > { %s5237_s15 = scalar_lea.vmem %s8549_s0, %s4490_s12  ;;  %s8484_s24 = scalar_lea.vmem %s8562_s13, %s4490_s12 }
  0x13   : > { %v5240_v2 = vld [vmem:[%s5237_s15 + $0x20] sm:$0xff]  ;;  %v5243_v3 = vld [vmem:[%s5237_s15 + $0x10] sm:$0xff]  ;;  %v5252_v5 = vld [vmem:[%s5237_s15 + $0x28] sm:$0xff]  ;;  %4824 = vmatpush.bf16.msra.mxu3 %v5316_v20 }
  0x14   : > { %v5246_v4 = vld [vmem:[%s5237_s15] sm:$0xff]  ;;  %493 = vperm.xlu2 %4875, %v5240_v2   ;;  %487 = vperm.xlu1 %4874, %v5243_v3   ;;  %v5255_v6 = vld [vmem:[%s5237_s15 + $0x18] sm:$0xff]  ;;  %v5258_v7 = vld [vmem:[%s5237_s15 + $0x8] sm:$0xff] }
  0x15   : > { %481 = vperm.xlu0 %4873, %v5246_v4   ;;  %v5264_v8 = vld [vmem:[%s5237_s15 + $0x40] sm:$0xff]  ;;  %v5267_v9 = vld [vmem:[%s5237_s15 + $0x38] sm:$0xff]  ;;  %v5270_v10 = vld [vmem:[%s5237_s15 + $0x30] sm:$0xff]  ;;  %617 = vmatpush.bf16.msra.mxu0 %v5316_v20 }
  0x16   : > { %v5276_v11 = vld [vmem:[%s5237_s15 + $0x58] sm:$0xff]  ;;  %v5279_v12 = vld [vmem:[%s5237_s15 + $0x50] sm:$0xff]  ;;  %v5282_v13 = vld [vmem:[%s5237_s15 + $0x48] sm:$0xff]  ;;  %4832 = vmatpush.bf16.msra.mxu1 %v5316_v20  ;;  %4840 = vmatpush.bf16.msra.mxu2 %v5316_v20 }
  0x17   : > { %v5288_v14 = vld [vmem:[%s5237_s15 + $0x70] sm:$0xff]  ;;  %v5291_v15 = vld [vmem:[%s5237_s15 + $0x68] sm:$0xff]  ;;  %v5294_v16 = vld [vmem:[%s5237_s15 + $0x60] sm:$0xff]  ;;  %4825 = vmatpush.bf16.msra.mxu3 %v5323_v21 }
  0x18   : > { %v5309_v18 = vld [vmem:[%s5237_s15 + $0x78] sm:$0xff] }
  0x19   : > { %618 = vmatpush.bf16.msra.mxu0 %v5323_v21 }
  0x1a   : > { %4833 = vmatpush.bf16.msra.mxu1 %v5323_v21  ;;  %4841 = vmatpush.bf16.msra.mxu2 %v5323_v21 }
  0x1b   : > { %4826 = vmatpush.bf16.msra.mxu3 %v5336_v22 }
  0x1c   : > { %496 = vperm.xlu2 %4875, %v5252_v5   ;;  %490 = vperm.xlu1 %4874, %v5255_v6  }
  0x1d   : > { %484 = vperm.xlu0 %4873, %v5258_v7   ;;  %619 = vmatpush.bf16.msra.mxu0 %v5336_v22 }
  0x1e   : > { %4834 = vmatpush.bf16.msra.mxu1 %v5336_v22  ;;  %4842 = vmatpush.bf16.msra.mxu2 %v5336_v22 }
  0x1f   : > { %4827 = vmatpush.bf16.msra.mxu3 %v5344_v23 }
  0x21   : > { %620 = vmatpush.bf16.msra.mxu0 %v5344_v23 }
  0x22   : > { %4835 = vmatpush.bf16.msra.mxu1 %v5344_v23  ;;  %4843 = vmatpush.bf16.msra.mxu2 %v5344_v23 }
  0x23   : > { %4828 = vmatpush.bf16.msra.mxu3 %v5357_v24 }
  0x24   : > { %505 = vperm.xlu2 %4875, %v5264_v8   ;;  %502 = vperm.xlu1 %4874, %v5267_v9  }
  0x25   : > { %499 = vperm.xlu0 %4873, %v5270_v10   ;;  %621 = vmatpush.bf16.msra.mxu0 %v5357_v24 }
  0x26   : > { %4836 = vmatpush.bf16.msra.mxu1 %v5357_v24  ;;  %4844 = vmatpush.bf16.msra.mxu2 %v5357_v24 }
  0x27   : > { %4829 = vmatpush.bf16.msra.mxu3 %v5365_v25 }
  0x29   : > { %622 = vmatpush.bf16.msra.mxu0 %v5365_v25 }
  0x2a   : > { %4837 = vmatpush.bf16.msra.mxu1 %v5365_v25  ;;  %4845 = vmatpush.bf16.msra.mxu2 %v5365_v25 }
  0x2b   : > { %4830 = vmatpush.bf16.msra.mxu3 %v5374_v26 }
  0x2c   : > { %514 = vperm.xlu2 %4875, %v5276_v11   ;;  %511 = vperm.xlu1 %4874, %v5279_v12  }
  0x2d   : > { %508 = vperm.xlu0 %4873, %v5282_v13   ;;  %623 = vmatpush.bf16.msra.mxu0 %v5374_v26 }
  0x2e   : > { %4838 = vmatpush.bf16.msra.mxu1 %v5374_v26  ;;  %4846 = vmatpush.bf16.msra.mxu2 %v5374_v26 }
  0x2f   : > { %1107 = vmatpush.bf16.msrb.mxu3 %v5302_v17 }
  0x31   : > { %769 = vmatpush.bf16.msrb.mxu0 %v5302_v17 }
  0x32   : > { %1445 = vmatpush.bf16.msrb.mxu1 %v5302_v17  ;;  %1614 = vmatpush.bf16.msrb.mxu2 %v5302_v17 }
  0x33   : > { %1108 = vmatpush.bf16.msrb.mxu3 %v5316_v20 }
  0x34   : > { %523 = vperm.xlu2 %4875, %v5288_v14   ;;  %520 = vperm.xlu1 %4874, %v5291_v15  }
  0x35   : > { %517 = vperm.xlu0 %4873, %v5294_v16   ;;  %770 = vmatpush.bf16.msrb.mxu0 %v5316_v20 }
  0x36   : > { %1446 = vmatpush.bf16.msrb.mxu1 %v5316_v20  ;;  %1615 = vmatpush.bf16.msrb.mxu2 %v5316_v20 }
  0x37   : > { %1109 = vmatpush.bf16.msrb.mxu3 %v5323_v21 }
  0x39   : > { %771 = vmatpush.bf16.msrb.mxu0 %v5323_v21 }
  0x3a   : > { %1447 = vmatpush.bf16.msrb.mxu1 %v5323_v21  ;;  %1616 = vmatpush.bf16.msrb.mxu2 %v5323_v21 }
  0x3b   : > { %1110 = vmatpush.bf16.msrb.mxu3 %v5336_v22 }
  0x3c   : > { %4877 = vset.pattern.permute.xlu2 %v5131_v19  ;;  %4876 = vset.pattern.permute.xlu1 %v5131_v19 }
  0x3d   : > { %526 = vperm.xlu0 %4873, %v5309_v18   ;;  %685 = vperm.xlu2 %4877, %v5258_v7  }
  0x3e   : > { %682 = vperm.xlu1 %4876, %v5246_v4   ;;  %772 = vmatpush.bf16.msrb.mxu0 %v5336_v22 }
  0x3f   : > { %1448 = vmatpush.bf16.msrb.mxu1 %v5336_v22  ;;  %1617 = vmatpush.bf16.msrb.mxu2 %v5336_v22 }
  0x40   : > { %1111 = vmatpush.bf16.msrb.mxu3 %v5344_v23 }
  0x42   : > { %773 = vmatpush.bf16.msrb.mxu0 %v5344_v23 }
  0x43   : > { %1449 = vmatpush.bf16.msrb.mxu1 %v5344_v23  ;;  %1618 = vmatpush.bf16.msrb.mxu2 %v5344_v23 }
  0x44   : > { %1112 = vmatpush.bf16.msrb.mxu3 %v5357_v24 }
  0x45   : > { %4878 = vset.pattern.permute.xlu0 %v5131_v19  ;;  %694 = vperm.xlu2 %4877, %v5240_v2  }
  0x46   : > { %691 = vperm.xlu1 %4876, %v5255_v6   ;;  %688 = vperm.xlu0 %4878, %v5243_v3  }
  0x47   : > { %774 = vmatpush.bf16.msrb.mxu0 %v5357_v24  ;;  %1450 = vmatpush.bf16.msrb.mxu1 %v5357_v24 }
  0x48   : > { %1113 = vmatpush.bf16.msrb.mxu3 %v5365_v25  ;;  %1619 = vmatpush.bf16.msrb.mxu2 %v5357_v24 }
  0x4b   : > { %775 = vmatpush.bf16.msrb.mxu0 %v5365_v25  ;;  %1451 = vmatpush.bf16.msrb.mxu1 %v5365_v25 }
  0x4c   : > { %1114 = vmatpush.bf16.msrb.mxu3 %v5374_v26  ;;  %1620 = vmatpush.bf16.msrb.mxu2 %v5365_v25 }
  0x4d   : > { %700 = vperm.xlu2 %4877, %v5270_v10  }
  0x4e   : > { %697 = vperm.xlu1 %4876, %v5252_v5   ;;  %703 = vperm.xlu0 %4878, %v5267_v9  }
  0x4f   : > { %776 = vmatpush.bf16.msrb.mxu0 %v5374_v26  ;;  %1452 = vmatpush.bf16.msrb.mxu1 %v5374_v26 }
  0x50   : > { %1621 = vmatpush.bf16.msrb.mxu2 %v5374_v26 }
  0x55   : > { %709 = vperm.xlu2 %4877, %v5282_v13  }
  0x56   : > { %706 = vperm.xlu1 %4876, %v5264_v8   ;;  %712 = vperm.xlu0 %4878, %v5279_v12  }
  0x5d   : > { %718 = vperm.xlu2 %4877, %v5294_v16  }
  0x5e   : > { %715 = vperm.xlu1 %4876, %v5276_v11   ;;  %721 = vperm.xlu0 %4878, %v5291_v15  }
  0x65   : > { %727 = vperm.xlu2 %4877, %v5309_v18  }
  0x66   : > { %724 = vperm.xlu1 %4876, %v5288_v14   ;;  %4879 = vset.pattern.permute.xlu0 %v5132_v27 }
  0x67   : > { %851 = vperm.xlu0 %4879, %v5246_v4  }
  0x6d   : > { %4881 = vset.pattern.permute.xlu2 %v5132_v27 }
  0x6e   : > { %4880 = vset.pattern.permute.xlu1 %v5132_v27  ;;  %v494_v29 = vpop.permute.xlu2 %493  ;;  %857 = vperm.xlu2 %4881, %v5243_v3  }
  0x6f   : > { %854 = vperm.xlu1 %4880, %v5258_v7   ;;  %866 = vperm.xlu0 %4879, %v5252_v5   ;;  %vm532_vm0 = vcmp.eq.s32.totalorder %v494_v29, %v5419_v30  ;;  %v5136_v29 = vmov 5  }
  0x76   : > { %v497_v31 = vpop.permute.xlu2 %496  ;;  %863 = vperm.xlu2 %4881, %v5240_v2  }
  0x77   : > { %vm533_vm1 = vcmp.eq.s32.totalorder %v497_v31, %v5419_v30  ;;  %860 = vperm.xlu1 %4880, %v5255_v6   ;;  %875 = vperm.xlu0 %4879, %v5264_v8  }
  0x78   : > { %vm4529_vm2 = vmpackc.low %vm533_vm1, %vm532_vm0 }
  0x79   : > { %4530 = vmatmul.msk.bf16.vlgmr.msra.gmra.mxu3 %vm4529_vm2, %v8567_v32 }
  0x7a   : > { %1783 = vmatpush.bf16.msra.mxu3 %v5302_v17 }
  0x7e   : > { %v5436_v33 = vpop.permute.xlu2 %505  ;;  %872 = vperm.xlu2 %4881, %v5267_v9   ;;  %1784 = vmatpush.bf16.msra.mxu3 %v5316_v20 }
  0x7f   : > { %869 = vperm.xlu1 %4880, %v5270_v10   ;;  %884 = vperm.xlu0 %4879, %v5276_v11   ;;  %vm536_vm13 = vcmp.eq.s32.totalorder %v5436_v33, %v5419_v30 }
  0x82   : > { %1785 = vmatpush.bf16.msra.mxu3 %v5323_v21 }
  0x86   : > { %v5443_v34 = vpop.permute.xlu2 %514  ;;  %v488_v35 = vpop.permute.xlu1 %487  ;;  %881 = vperm.xlu2 %4881, %v5279_v12   ;;  %1786 = vmatpush.bf16.msra.mxu3 %v5336_v22 }
  0x87   : > { %878 = vperm.xlu1 %4880, %v5282_v13   ;;  %893 = vperm.xlu0 %4879, %v5288_v14   ;;  %v482_v36 = vpop.permute.xlu0 %481  ;;  %vm530_vm10 = vcmp.eq.s32.totalorder %v488_v35, %v5419_v30 }
  0x88   : > { %vm528_vm3 = vcmp.eq.s32.totalorder %v482_v36, %v5419_v30 }
  0x8a   : > { %1787 = vmatpush.bf16.msra.mxu3 %v5344_v23 }
  0x8e   : > { %v5451_v37 = vpop.permute.xlu2 %523  ;;  %v491_v38 = vpop.permute.xlu1 %490  ;;  %890 = vperm.xlu2 %4881, %v5291_v15   ;;  %1788 = vmatpush.bf16.msra.mxu3 %v5357_v24 }
  0x8f   : > { %887 = vperm.xlu1 %4880, %v5294_v16   ;;  %4883 = vset.pattern.permute.xlu0 %v5134_v39  ;;  %v485_v40 = vpop.permute.xlu0 %484  ;;  %vm531_vm9 = vcmp.eq.s32.totalorder %v491_v38, %v5419_v30 }
  0x90   : > { %vm529_vm4 = vcmp.eq.s32.totalorder %v485_v40, %v5419_v30  ;;  %1023 = vperm.xlu0 %4883, %v5258_v7   ;;  %vm4527_vm11 = vmpackc.low %vm531_vm9, %vm530_vm10 }
  0x91   : > { %vm4525_vm5 = vmpackc.low %vm529_vm4, %vm528_vm3  ;;  %vm539_vm3 = vcmp.eq.s32.totalorder %v5443_v34, %v5419_v30 }
  0x92   : > { %4526 = vmatmul.msk.bf16.vlgmr.msra.gmra.mxu0 %vm4525_vm5, %v8567_v32  ;;  %1789 = vmatpush.bf16.msra.mxu3 %v5365_v25 }
  0x93   : > { %938 = vmatpush.bf16.msra.mxu0 %v5302_v17 }
  0x96   : > { %v503_v41 = vpop.permute.xlu1 %502  ;;  %4882 = vset.pattern.permute.xlu2 %v5134_v39  ;;  %1790 = vmatpush.bf16.msra.mxu3 %v5374_v26 }
  0x97   : > { %vm535_vm6 = vcmp.eq.s32.totalorder %v503_v41, %v5419_v30  ;;  %896 = vperm.xlu1 %4880, %v5309_v18   ;;  %v500_v42 = vpop.permute.xlu0 %499  ;;  %v686_v43 = vpop.permute.xlu2 %685  ;;  %1020 = vperm.xlu2 %4882, %v5246_v4  }
  0x98   : > { %vm534_vm7 = vcmp.eq.s32.totalorder %v500_v42, %v5419_v30  ;;  %1038 = vperm.xlu0 %4883, %v5270_v10   ;;  %939 = vmatpush.bf16.msra.mxu0 %v5316_v20  ;;  %vm730_vm15 = vcmp.eq.s32.totalorder %v686_v43, %v5419_v30 }
  0x99   : > { %vm4531_vm8 = vmpackc.low %vm535_vm6, %vm534_vm7 }
  0x9a   : > { %4532 = vmatmul.msk.bf16.gmra.mxu3 %vm4531_vm8, %v8567_v32 }
  0x9c   : > { %940 = vmatpush.bf16.msra.mxu0 %v5323_v21 }
  0x9e   : > { %v512_v44 = vpop.permute.xlu1 %511 }
  0x9f   : > { %4884 = vset.pattern.permute.xlu1 %v5134_v39  ;;  %v509_v45 = vpop.permute.xlu0 %508  ;;  %v695_v46 = vpop.permute.xlu2 %694  ;;  %1029 = vperm.xlu2 %4882, %v5255_v6   ;;  %vm538_vm2 = vcmp.eq.s32.totalorder %v512_v44, %v5419_v30 }
  0xa0   : > { %1026 = vperm.xlu1 %4884, %v5243_v3   ;;  %1047 = vperm.xlu0 %4883, %v5282_v13   ;;  %vm537_vm12 = vcmp.eq.s32.totalorder %v509_v45, %v5419_v30  ;;  %vm4535_vm4 = vmpackc.low %vm539_vm3, %vm538_vm2  ;;  %vm733_vm7 = vcmp.eq.s32.totalorder %v695_v46, %v5419_v30  ;;  %vm542_vm2 = vcmp.eq.s32.totalorder %v5451_v37, %v5419_v30 }
  0xa1   : > { %941 = vmatpush.bf16.msra.mxu0 %v5336_v22  ;;  %vm4533_vm14 = vmpackc.low %vm537_vm12, %vm536_vm13 }
  0xa2   : > { %4528 = vmatmul.msk.bf16.gmra.mxu0 %vm4527_vm11, %v8567_v32 }
  0xa5   : > { %942 = vmatpush.bf16.msra.mxu0 %v5344_v23 }
  0xa6   : > { %v5479_v47 = vpop.permute.xlu1 %520 }
  0xa7   : > { %v5481_v48 = vpop.permute.xlu0 %517  ;;  %v5483_v49 = vpop.permute.xlu2 %700  ;;  %1035 = vperm.xlu2 %4882, %v5252_v5   ;;  %vm541_vm11 = vcmp.eq.s32.totalorder %v5479_v47, %v5419_v30  ;;  %v5137_v47 = vmov 6  }
  0xa8   : > { %1032 = vperm.xlu1 %4884, %v5240_v2   ;;  %1056 = vperm.xlu0 %4883, %v5294_v16   ;;  %vm540_vm12 = vcmp.eq.s32.totalorder %v5481_v48, %v5419_v30 }
  0xa9   : > { %943 = vmatpush.bf16.msra.mxu0 %v5357_v24  ;;  %vm4537_vm13 = vmpackc.low %vm541_vm11, %vm540_vm12 }
  0xaa   : > { %4534 = vmatmul.msk.bf16.gmra.mxu3 %vm4533_vm14, %v8567_v32 }
  0xad   : > { %944 = vmatpush.bf16.msra.mxu0 %v5365_v25 }
  0xaf   : > { %v5493_v50 = vpop.permute.xlu0 %526  ;;  %v5495_v51 = vpop.permute.xlu2 %709  ;;  %1044 = vperm.xlu2 %4882, %v5264_v8  }
  0xb0   : > { %1041 = vperm.xlu1 %4884, %v5267_v9   ;;  %v683_v52 = vpop.permute.xlu1 %682  ;;  %1065 = vperm.xlu0 %4883, %v5309_v18  }
  0xb1   : > { %vm729_vm0 = vcmp.eq.s32.totalorder %v683_v52, %v5419_v30  ;;  %945 = vmatpush.bf16.msra.mxu0 %v5374_v26 }
  0xb2   : > { %vm4541_vm1 = vmpackc.low %vm730_vm15, %vm729_vm0  ;;  %vm735_vm15 = vcmp.eq.s32.totalorder %v5483_v49, %v5419_v30 }
  0xb3   : > { %4542 = vmatmul.msk.bf16.vlgmr.msrb.gmra.mxu0 %vm4541_vm1, %v8567_v32  ;;  %vm543_vm1 = vcmp.eq.s32.totalorder %v5493_v50, %v5419_v30 }
  0xb4   : > { %vm4539_vm3 = vmpackc.low %vm543_vm1, %vm542_vm2 }
  0xb5   : > { %1276 = vmatpush.bf16.msrb.mxu0 %v5302_v17 }
  0xb7   : > { %v5506_v53 = vpop.permute.xlu2 %718  ;;  %1053 = vperm.xlu2 %4882, %v5276_v11  }
  0xb8   : > { %1050 = vperm.xlu1 %4884, %v5279_v12   ;;  %v692_v54 = vpop.permute.xlu1 %691  ;;  %4887 = vset.pattern.permute.xlu0 %v5135_v55  ;;  %v689_v56 = vpop.permute.xlu0 %688 }
  0xb9   : > { %1195 = vperm.xlu0 %4887, %v5243_v3   ;;  %1277 = vmatpush.bf16.msrb.mxu0 %v5316_v20  ;;  %vm732_vm5 = vcmp.eq.s32.totalorder %v692_v54, %v5419_v30  ;;  %vm731_vm6 = vcmp.eq.s32.totalorder %v689_v56, %v5419_v30 }
  0xba   : > { %4536 = vmatmul.msk.bf16.gmra.mxu3 %vm4535_vm4, %v8567_v32  ;;  %vm4543_vm9 = vmpackc.low %vm732_vm5, %vm731_vm6  ;;  %vm738_vm6 = vcmp.eq.s32.totalorder %v5495_v51, %v5419_v30 }
  0xbd   : > { %1278 = vmatpush.bf16.msrb.mxu0 %v5323_v21 }
  0xbf   : > { %v5518_v57 = vpop.permute.xlu2 %727  ;;  %1062 = vperm.xlu2 %4882, %v5288_v14  }
  0xc0   : > { %1059 = vperm.xlu1 %4884, %v5291_v15   ;;  %v698_v58 = vpop.permute.xlu1 %697  ;;  %v704_v59 = vpop.permute.xlu0 %703 }
  0xc1   : > { %vm734_vm8 = vcmp.eq.s32.totalorder %v698_v58, %v5419_v30  ;;  %1210 = vperm.xlu0 %4887, %v5267_v9   ;;  %1279 = vmatpush.bf16.msrb.mxu0 %v5336_v22  ;;  %vm736_vm14 = vcmp.eq.s32.totalorder %v704_v59, %v5419_v30 }
  0xc2   : > { %vm4545_vm10 = vmpackc.low %vm734_vm8, %vm733_vm7 }
  0xc3   : > { %4544 = vmatmul.msk.bf16.gmra.mxu0 %vm4543_vm9, %v8567_v32  ;;  %4546 = vmatmul.msk.bf16.vlgmr.msra.gmra.mxu1 %vm4545_vm10, %v8567_v32  ;;  %vm4547_vm0 = vmpackc.low %vm736_vm14, %vm735_vm15 }
  0xc4   : > { %2121 = vmatpush.bf16.msra.mxu1 %v5302_v17 }
  0xc5   : > { %1280 = vmatpush.bf16.msrb.mxu0 %v5344_v23 }
  0xc7   : > { %4886 = vset.pattern.permute.xlu2 %v5135_v55 }
  0xc8   : > { %4885 = vset.pattern.permute.xlu1 %v5135_v55  ;;  %v707_v60 = vpop.permute.xlu1 %706  ;;  %v5534_v61 = vpop.permute.xlu0 %712  ;;  %1192 = vperm.xlu2 %4886, %v5258_v7  }
  0xc9   : > { %v5537_v62 = vpop.permute.xlu2 %857  ;;  %1189 = vperm.xlu1 %4885, %v5246_v4   ;;  %1219 = vperm.xlu0 %4887, %v5279_v12   ;;  %vm737_vm4 = vcmp.eq.s32.totalorder %v707_v60, %v5419_v30 }
  0xca   : > { %4538 = vmatmul.msk.bf16.gmra.mxu3 %vm4537_vm13, %v8567_v32  ;;  %1281 = vmatpush.bf16.msrb.mxu0 %v5357_v24  ;;  %vm4549_vm8 = vmpackc.low %vm738_vm6, %vm737_vm4  ;;  %vm739_vm13 = vcmp.eq.s32.totalorder %v5534_v61, %v5419_v30 }
  0xcb   : > { %2122 = vmatpush.bf16.msra.mxu1 %v5316_v20 }
  0xce   : > { %1282 = vmatpush.bf16.msrb.mxu0 %v5365_v25 }
  0xcf   : > { %2123 = vmatpush.bf16.msra.mxu1 %v5323_v21 }
  0xd0   : > { %v5547_v63 = vpop.permute.xlu1 %715  ;;  %v5549_v0 = vpop.permute.xlu0 %721  ;;  %1201 = vperm.xlu2 %4886, %v5240_v2  }
  0xd1   : > { %v864_v1 = vpop.permute.xlu2 %863  ;;  %1198 = vperm.xlu1 %4885, %v5255_v6   ;;  %1228 = vperm.xlu0 %4887, %v5291_v15   ;;  %vm740_vm14 = vcmp.eq.s32.totalorder %v5547_v63, %v5419_v30  ;;  %vm742_vm6 = vcmp.eq.s32.totalorder %v5549_v0, %v5419_v30  ;;  %v5138_v0 = vmov 7  }
  0xd2   : > { %1283 = vmatpush.bf16.msrb.mxu0 %v5374_v26  ;;  %vm902_vm9 = vcmp.eq.s32.totalorder %v864_v1, %v5419_v30  ;;  %vm4551_vm1 = vmpackc.low %vm740_vm14, %vm739_vm13 }
  0xd3   : > { %4548 = vmatmul.msk.bf16.gmra.mxu1 %vm4547_vm0, %v8567_v32  ;;  %vm900_vm0 = vcmp.eq.s32.totalorder %v5537_v62, %v5419_v30 }
  0xd4   : > { %2124 = vmatpush.bf16.msra.mxu1 %v5336_v22 }
  0xd8   : > { %v5563_v19 = vpop.permute.xlu1 %724  ;;  %1207 = vperm.xlu2 %4886, %v5270_v10   ;;  %2125 = vmatpush.bf16.msra.mxu1 %v5344_v23 }
  0xd9   : > { %v873_v27 = vpop.permute.xlu2 %872  ;;  %1204 = vperm.xlu1 %4885, %v5252_v5   ;;  %v852_v28 = vpop.permute.xlu0 %851  ;;  %4888 = vset.pattern.permute.xlu0 %v5136_v29 }
  0xda   : > { %4540 = vmatmul.msk.bf16.gmra.mxu3 %vm4539_vm3, %v8567_v32  ;;  %1358 = vperm.xlu0 %4888, %v5246_v4   ;;  %vm898_vm5 = vcmp.eq.s32.totalorder %v852_v28, %v5419_v30  ;;  %vm905_vm2 = vcmp.eq.s32.totalorder %v873_v27, %v5419_v30 }
  0xdc   : > { %2126 = vmatpush.bf16.msra.mxu1 %v5357_v24 }
  0xe0   : > { %1216 = vperm.xlu2 %4886, %v5282_v13   ;;  %2127 = vmatpush.bf16.msra.mxu1 %v5365_v25 }
  0xe1   : > { %v5577_v31 = vpop.permute.xlu2 %881  ;;  %1213 = vperm.xlu1 %4885, %v5264_v8   ;;  %v855_v33 = vpop.permute.xlu1 %854 }
  0xe2   : > { %vm899_vm7 = vcmp.eq.s32.totalorder %v855_v33, %v5419_v30  ;;  %v867_v34 = vpop.permute.xlu0 %866  ;;  %1373 = vperm.xlu0 %4888, %v5252_v5  }
  0xe3   : > { %vm4557_vm10 = vmpackc.low %vm899_vm7, %vm898_vm5  ;;  %vm903_vm11 = vcmp.eq.s32.totalorder %v867_v34, %v5419_v30  ;;  %4550 = vmatmul.msk.bf16.gmra.mxu1 %vm4549_vm8, %v8567_v32 }
  0xe4   : > { %4558 = vmatmul.msk.bf16.vlgmr.msra.gmra.mxu0 %vm4557_vm10, %v8567_v32  ;;  %vm4561_vm12 = vmpackc.low %vm903_vm11, %vm902_vm9  ;;  %2128 = vmatpush.bf16.msra.mxu1 %v5374_v26  ;;  %vm741_vm9 = vcmp.eq.s32.totalorder %v5506_v53, %v5419_v30 }
  0xe5   : > { %4562 = vmatmul.msk.bf16.vlgmr.msra.gmra.mxu2 %vm4561_vm12, %v8567_v32  ;;  %1952 = vmatpush.bf16.msra.mxu0 %v5302_v17  ;;  %vm4553_vm11 = vmpackc.low %vm742_vm6, %vm741_vm9 }
  0xe6   : > { %2290 = vmatpush.bf16.msra.mxu2 %v5302_v17 }
  0xe8   : > { %1225 = vperm.xlu2 %4886, %v5294_v16  }
  0xe9   : > { %v5591_v35 = vpop.permute.xlu2 %890  ;;  %1222 = vperm.xlu1 %4885, %v5276_v11   ;;  %v861_v36 = vpop.permute.xlu1 %860  ;;  %1953 = vmatpush.bf16.msra.mxu0 %v5316_v20 }
  0xea   : > { %v876_v37 = vpop.permute.xlu0 %875  ;;  %1382 = vperm.xlu0 %4888, %v5264_v8   ;;  %2291 = vmatpush.bf16.msra.mxu2 %v5316_v20  ;;  %vm901_vm15 = vcmp.eq.s32.totalorder %v861_v36, %v5419_v30 }
  0xeb   : > { %vm4559_vm4 = vmpackc.low %vm901_vm15, %vm900_vm0  ;;  %vm906_vm7 = vcmp.eq.s32.totalorder %v876_v37, %v5419_v30  ;;  %vm743_vm15 = vcmp.eq.s32.totalorder %v5563_v19, %v5419_v30 }
  0xed   : > { %1954 = vmatpush.bf16.msra.mxu0 %v5323_v21 }
  0xee   : > { %2292 = vmatpush.bf16.msra.mxu2 %v5323_v21 }
  0xf0   : > { %1234 = vperm.xlu2 %4886, %v5309_v18  }
  0xf1   : > { %1231 = vperm.xlu1 %4885, %v5288_v14   ;;  %v870_v38 = vpop.permute.xlu1 %869  ;;  %v1021_v39 = vpop.permute.xlu2 %1020  ;;  %1955 = vmatpush.bf16.msra.mxu0 %v5336_v22 }
  0xf2   : > { %vm904_vm3 = vcmp.eq.s32.totalorder %v870_v38, %v5419_v30  ;;  %v5611_v40 = vpop.permute.xlu0 %884  ;;  %1391 = vperm.xlu0 %4888, %v5276_v11   ;;  %2293 = vmatpush.bf16.msra.mxu2 %v5336_v22  ;;  %vm1067_vm10 = vcmp.eq.s32.totalorder %v1021_v39, %v5419_v30 }
  0xf3   : > { %4552 = vmatmul.msk.bf16.gmra.mxu1 %vm4551_vm1, %v8567_v32  ;;  %vm4563_vm5 = vmpackc.low %vm905_vm2, %vm904_vm3  ;;  %vm909_vm0 = vcmp.eq.s32.totalorder %v5611_v40, %v5419_v30  ;;  %vm744_vm1 = vcmp.eq.s32.totalorder %v5518_v57, %v5419_v30  ;;  %vm908_vm2 = vcmp.eq.s32.totalorder %v5577_v31, %v5419_v30 }
  0xf4   : > { %4560 = vmatmul.msk.bf16.gmra.mxu0 %vm4559_vm4, %v8567_v32  ;;  %vm4555_vm3 = vmpackc.low %vm744_vm1, %vm743_vm15 }
  0xf5   : > { %4564 = vmatmul.msk.bf16.gmra.mxu2 %vm4563_vm5, %v8567_v32  ;;  %1956 = vmatpush.bf16.msra.mxu0 %v5344_v23  ;;  %vm4567_vm6 = vmpackc.low %vm909_vm0, %vm908_vm2 }
  0xf6   : > { %2294 = vmatpush.bf16.msra.mxu2 %v5344_v23 }
  0xf8   : > { %4890 = vset.pattern.permute.xlu2 %v5136_v29 }
  0xf9   : > { %4889 = vset.pattern.permute.xlu1 %v5136_v29  ;;  %v879_v41 = vpop.permute.xlu1 %878  ;;  %1364 = vperm.xlu2 %4890, %v5243_v3   ;;  %v1030_v42 = vpop.permute.xlu2 %1029 }
  0xfa   : > { %1361 = vperm.xlu1 %4889, %v5258_v7   ;;  %v5622_v43 = vpop.permute.xlu0 %893  ;;  %1400 = vperm.xlu0 %4888, %v5288_v14   ;;  %vm907_vm8 = vcmp.eq.s32.totalorder %v879_v41, %v5419_v30  ;;  %vm1070_vm4 = vcmp.eq.s32.totalorder %v1030_v42, %v5419_v30 }
  0xfb   : > { %1957 = vmatpush.bf16.msra.mxu0 %v5357_v24  ;;  %2295 = vmatpush.bf16.msra.mxu2 %v5357_v24  ;;  %vm4565_vm13 = vmpackc.low %vm907_vm8, %vm906_vm7 }
  0xfc   : > { %v5683_v53 = vpop.f32.mrf.mxu3 }
  0xff   : > { %1958 = vmatpush.bf16.msra.mxu0 %v5365_v25  ;;  %2296 = vmatpush.bf16.msra.mxu2 %v5365_v25 }
 0x101   : > { %v5636_v44 = vpop.permute.xlu1 %887  ;;  %1370 = vperm.xlu2 %4890, %v5240_v2   ;;  %v5639_v45 = vpop.permute.xlu2 %1035 }
 0x102   : > { %1367 = vperm.xlu1 %4889, %v5255_v6   ;;  %v1024_v46 = vpop.permute.xlu0 %1023  ;;  %4892 = vset.pattern.permute.xlu0 %v5137_v47  ;;  %vm910_vm8 = vcmp.eq.s32.totalorder %v5636_v44, %v5419_v30 }
 0x103   : > { %vm1068_vm12 = vcmp.eq.s32.totalorder %v1024_v46, %v5419_v30  ;;  %4554 = vmatmul.msk.bf16.gmra.mxu1 %vm4553_vm11, %v8567_v32  ;;  %1530 = vperm.xlu0 %4892, %v5258_v7   ;;  %vm1072_vm11 = vcmp.eq.s32.totalorder %v5639_v45, %v5419_v30  ;;  %v5853_v46 = vld [vmem:[%s5237_s15] sm:$0xff] }
 0x104   : > { %vm4573_vm14 = vmpackc.low %vm1068_vm12, %vm1067_vm10  ;;  %1959 = vmatpush.bf16.msra.mxu0 %v5374_v26  ;;  %2297 = vmatpush.bf16.msra.mxu2 %v5374_v26  ;;  %vm911_vm10 = vcmp.eq.s32.totalorder %v5591_v35, %v5419_v30 }
 0x105   : > { %4566 = vmatmul.msk.bf16.gmra.mxu2 %vm4565_vm13, %v8567_v32  ;;  %4574 = vmatmul.msk.bf16.vlgmr.msrb.gmra.mxu3 %vm4573_vm14, %v8567_v32  ;;  %vm4569_vm12 = vmpackc.low %vm911_vm10, %vm910_vm8  ;;  %vm912_vm14 = vcmp.eq.s32.totalorder %v5622_v43, %v5419_v30 }
 0x106   : > { %2459 = vmatpush.bf16.msrb.mxu3 %v5302_v17 }
 0x109   : > { %v5651_v48 = vpop.permute.xlu1 %896  ;;  %1379 = vperm.xlu2 %4890, %v5267_v9   ;;  %v5654_v49 = vpop.permute.xlu2 %1044 }
 0x10a   : > { %1376 = vperm.xlu1 %4889, %v5270_v10   ;;  %v5657_v7 = vpop.permute.xlu0 %1038  ;;  %2460 = vmatpush.bf16.msrb.mxu3 %v5316_v20  ;;  %vm913_vm15 = vcmp.eq.s32.totalorder %v5651_v48, %v5419_v30  ;;  %vm1075_vm8 = vcmp.eq.s32.totalorder %v5654_v49, %v5419_v30  ;;  %v8565_v48 = vmov 8  }
 0x10b   : > { %1545 = vperm.xlu0 %4892, %v5270_v10   ;;  %vm1073_vm0 = vcmp.eq.s32.totalorder %v5657_v7, %v5419_v30  ;;  %vm4571_vm2 = vmpackc.low %vm913_vm15, %vm912_vm14 }
 0x10e   : > { %2461 = vmatpush.bf16.msrb.mxu3 %v5323_v21 }
 0x10f   : > { %v5664_v50 = vpop.f32.mrf.mxu0 }
 0x111   : > { %1388 = vperm.xlu2 %4890, %v5279_v12   ;;  %v5671_v51 = vpop.permute.xlu2 %1053 }
 0x112   : > { %1385 = vperm.xlu1 %4889, %v5282_v13   ;;  %v1027_v10 = vpop.permute.xlu1 %1026  ;;  %v5676_v52 = vpop.permute.xlu0 %1047  ;;  %2462 = vmatpush.bf16.msrb.mxu3 %v5336_v22  ;;  %vm1078_vm14 = vcmp.eq.s32.totalorder %v5671_v51, %v5419_v30 }
 0x113   : > { %vm1069_vm5 = vcmp.eq.s32.totalorder %v1027_v10, %v5419_v30  ;;  %4556 = vmatmul.msk.bf16.gmra.mxu1 %vm4555_vm3, %v8567_v32  ;;  %1554 = vperm.xlu0 %4892, %v5282_v13   ;;  %v5698_v13 = vpop.f32.mrf.mxu3 }
 0x114   : > { %vm4575_vm7 = vmpackc.low %vm1070_vm4, %vm1069_vm5  ;;  %8670 = vst [vmem:[#allocation4_spill] sm:$0xff] %v5698_v13  ;;  %v6082_v13 = vld [vmem:[%s5237_s15 + $0x10] sm:$0xff] }
 0x115   : > { %4568 = vmatmul.msk.bf16.gmra.mxu2 %vm4567_vm6, %v8567_v32  ;;  %4576 = vmatmul.msk.bf16.gmra.mxu3 %vm4575_vm7, %v8567_v32  ;;  %vm1076_vm7 = vcmp.eq.s32.totalorder %v5676_v52, %v5419_v30 }
 0x116   : > { %2463 = vmatpush.bf16.msrb.mxu3 %v5344_v23 }
 0x117   : > { %v5688_v54 = vpop.f32.mrf.mxu0 }
 0x118   : > { %8669 = vst [vmem:[#allocation3_spill] sm:$0xff] %v5688_v54 }
 0x119   : > { %1397 = vperm.xlu2 %4890, %v5291_v15   ;;  %v5691_v55 = vpop.permute.xlu2 %1062 }
 0x11a   : > { %1394 = vperm.xlu1 %4889, %v5294_v16   ;;  %v1033_v56 = vpop.permute.xlu1 %1032  ;;  %v5694_v57 = vpop.permute.xlu0 %1056  ;;  %2464 = vmatpush.bf16.msrb.mxu3 %v5357_v24 }
 0x11b   : > { %1563 = vperm.xlu0 %4892, %v5294_v16   ;;  %vm1071_vm9 = vcmp.eq.s32.totalorder %v1033_v56, %v5419_v30  ;;  %v5881_v56 = vld [vmem:[%s5237_s15 + $0x18] sm:$0xff] }
 0x11c   : > { %vm4577_vm13 = vmpackc.low %vm1072_vm11, %vm1071_vm9 }
 0x11d   : > { %v5719_v61 = vpop.f32.mrf.mxu3  ;;  %vm4581_vm9 = vmpackc.low %vm1076_vm7, %vm1075_vm8 }
 0x11e   : > { %2465 = vmatpush.bf16.msrb.mxu3 %v5365_v25 }
 0x11f   : > { %v5701_v58 = vpop.f32.mrf.mxu0 }
 0x121   : > { %4891 = vset.pattern.permute.xlu2 %v5137_v47 }
 0x122   : > { %1403 = vperm.xlu1 %4889, %v5309_v18   ;;  %v1042_v59 = vpop.permute.xlu1 %1041  ;;  %v5710_v16 = vpop.permute.xlu0 %1065  ;;  %1527 = vperm.xlu2 %4891, %v5246_v4  }
 0x123   : > { %v1193_v60 = vpop.permute.xlu2 %1192  ;;  %1572 = vperm.xlu0 %4892, %v5309_v18   ;;  %2466 = vmatpush.bf16.msrb.mxu3 %v5374_v26  ;;  %vm1074_vm1 = vcmp.eq.s32.totalorder %v1042_v59, %v5419_v30  ;;  %v5889_v59 = vld [vmem:[%s5237_s15 + $0x28] sm:$0xff] }
 0x124   : > { %vm4579_vm3 = vmpackc.low %vm1074_vm1, %vm1073_vm0  ;;  %vm1237_vm4 = vcmp.eq.s32.totalorder %v1193_v60, %v5419_v30 }
 0x125   : > { %4570 = vmatmul.msk.bf16.gmra.mxu2 %vm4569_vm12, %v8567_v32  ;;  %4578 = vmatmul.msk.bf16.gmra.mxu3 %vm4577_vm13, %v8567_v32  ;;  %v5738_v1 = vpop.f32.mrf.mxu3 }
 0x126   : > { %8672 = vst [vmem:[#allocation6_spill] sm:$0xff] %v5738_v1 }
 0x127   : > { %v5721_v62 = vpop.f32.mrf.mxu0 }
 0x128   : > { %8671 = vst [vmem:[#allocation5_spill] sm:$0xff] %v5721_v62 }
 0x12a   : > { %4893 = vset.pattern.permute.xlu1 %v5137_v47  ;;  %v5724_v4 = vpop.permute.xlu1 %1050  ;;  %1536 = vperm.xlu2 %4891, %v5255_v6  }
 0x12b   : > { %v5727_v63 = vpop.permute.xlu2 %1201  ;;  %1533 = vperm.xlu1 %4893, %v5243_v3   ;;  %v5730_v18 = vpop.permute.xlu0 %1195  ;;  %4896 = vset.pattern.permute.xlu0 %v5138_v0  ;;  %vm1077_vm13 = vcmp.eq.s32.totalorder %v5724_v4, %v5419_v30  ;;  %v5949_v4 = vld [vmem:[%s5237_s15 + $0x48] sm:$0xff] }
 0x12c   : > { %1702 = vperm.xlu0 %4896, %v5243_v3   ;;  %vm1238_vm10 = vcmp.eq.s32.totalorder %v5730_v18, %v5419_v30  ;;  %vm4583_vm15 = vmpackc.low %vm1078_vm14, %vm1077_vm13  ;;  %vm1240_vm1 = vcmp.eq.s32.totalorder %v5727_v63, %v5419_v30  ;;  %vm1081_vm13 = vcmp.eq.s32.totalorder %v5691_v55, %v5419_v30  ;;  %v8688_v55 = vmov 1.0|1.0  }
 0x12d   : > { %v5764_v34 = vpop.f32.mrf.mxu3 }
 0x130   : > { %v5740_v19 = vpop.f32.mrf.mxu0 }
 0x131   : > { %v5747_v27 = vadd.f32 %v5740_v19, %v5664_v50  ;;  %v834_v3 = vmax.f32 %v5664_v50, %v5740_v19  ;;  %v5927_v50 = vld [vmem:[%s5237_s15 + $0x40] sm:$0xff] }
 0x132   : > { %v5751_v28 = vpop.permute.xlu1 %1059  ;;  %1542 = vperm.xlu2 %4891, %v5252_v5   ;;  %8680 = vst [vmem:[#allocation14_spill] sm:$0xff] %v5927_v50 }
 0x133   : > { %v5754_v29 = vpop.permute.xlu2 %1207  ;;  %1539 = vperm.xlu1 %4893, %v5240_v2   ;;  %v5757_v31 = vpop.permute.xlu0 %1210 }
 0x134   : > { %1717 = vperm.xlu0 %4896, %v5267_v9   ;;  %vm1243_vm7 = vcmp.eq.s32.totalorder %v5757_v31, %v5419_v30  ;;  %v5962_v31 = vld [vmem:[%s5237_s15 + $0x50] sm:$0xff] }
 0x135   : > { %4572 = vmatmul.msk.bf16.gmra.mxu2 %vm4571_vm2, %v8567_v32  ;;  %4580 = vmatmul.msk.bf16.gmra.mxu3 %vm4579_vm3, %v8567_v32  ;;  %v5802_v41 = vpop.f32.mrf.mxu3  ;;  %vm1079_vm3 = vcmp.eq.s32.totalorder %v5694_v57, %v5419_v30  ;;  %8685 = vst [vmem:[#allocation19_spill] sm:$0xff] %v5962_v31 }
 0x136   : > { %8674 = vst [vmem:[#allocation8_spill] sm:$0xff] %v5802_v41  ;;  %v6018_v41 = vld [vmem:[%s8550_s1 + $0x28] sm:$0xff] }
 0x138   : > { %v5762_v33 = vpop.f32.mrf.mxu0 }
 0x139   : > { %8673 = vst [vmem:[#allocation7_spill] sm:$0xff] %v5762_v33 }
 0x13a   : > { %1551 = vperm.xlu2 %4891, %v5264_v8  }
 0x13b   : > { %v5767_v5 = vpop.permute.xlu2 %1216  ;;  %1548 = vperm.xlu1 %4893, %v5267_v9   ;;  %v1190_v2 = vpop.permute.xlu1 %1189 }
 0x13c   : > { %vm1236_vm5 = vcmp.eq.s32.totalorder %v1190_v2, %v5419_v30  ;;  %v5772_v35 = vpop.permute.xlu0 %1219  ;;  %1726 = vperm.xlu0 %4896, %v5279_v12  }
 0x13d   : > { %vm4589_vm6 = vmpackc.low %vm1237_vm4, %vm1236_vm5  ;;  %v5826_v44 = vpop.f32.mrf.mxu3  ;;  %vm1080_vm4 = vcmp.eq.s32.totalorder %v5751_v28, %v5419_v30  ;;  %v5917_v28 = vld [vmem:[%s5237_s15 + $0x30] sm:$0xff] }
 0x13e   : > { %4590 = vmatmul.msk.bf16.vlgmr.msrb.gmra.mxu0 %vm4589_vm6, %v8567_v32  ;;  %8679 = vst [vmem:[#allocation13_spill] sm:$0xff] %v5917_v28  ;;  %vm4585_vm5 = vmpackc.low %vm1080_vm4, %vm1079_vm3  ;;  %vm1242_vm6 = vcmp.eq.s32.totalorder %v5754_v29, %v5419_v30 }
 0x13f   : > { %2628 = vmatpush.bf16.msrb.mxu0 %v5302_v17 }
 0x140   : > { %v5779_v8 = vpop.f32.mrf.mxu0  ;;  %v5781_v9 = vpop.f32.mrf.mxu1 }
 0x141   : > { %v836_v36 = vmax.f32 %v5701_v58, %v5779_v8  ;;  %v5787_v37 = vadd.f32 %v5779_v8, %v5701_v58  ;;  %v838_v38 = vmax.f32 %v5683_v53, %v5781_v9  ;;  %v5793_v17 = vadd.f32 %v5781_v9, %v5683_v53  ;;  %v6007_v8 = vld [vmem:[%s8550_s1 + $0x30] sm:$0xff] }
 0x142   : > { %1560 = vperm.xlu2 %4891, %v5276_v11  }
 0x143   : > { %v5798_v39 = vpop.permute.xlu2 %1225  ;;  %1557 = vperm.xlu1 %4893, %v5279_v12   ;;  %v1199_v40 = vpop.permute.xlu1 %1198  ;;  %2629 = vmatpush.bf16.msrb.mxu0 %v5316_v20 }
 0x144   : > { %v5804_v42 = vpop.permute.xlu0 %1228  ;;  %1735 = vperm.xlu0 %4896, %v5291_v15   ;;  %vm1239_vm11 = vcmp.eq.s32.totalorder %v1199_v40, %v5419_v30 }
 0x145   : > { %4582 = vmatmul.msk.bf16.gmra.mxu3 %vm4581_vm9, %v8567_v32  ;;  %vm4591_vm12 = vmpackc.low %vm1239_vm11, %vm1238_vm10  ;;  %v5862_v49 = vpop.f32.mrf.mxu3 }
 0x146   : > { %8676 = vst [vmem:[#allocation10_spill] sm:$0xff] %v5862_v49  ;;  %vm4595_vm10 = vmpackc.low %vm1243_vm7, %vm1242_vm6  ;;  %v6001_v49 = vld [vmem:[%s5237_s15 + $0x58] sm:$0xff] }
 0x147   : > { %2630 = vmatpush.bf16.msrb.mxu0 %v5323_v21  ;;  %v8563_v21 = vmov 10  }
 0x148   : > { %v5812_v11 = vpop.f32.mrf.mxu1  ;;  %v5867_v51 = vpop.f32.mrf.mxu0 }
 0x149   : > { %8675 = vst [vmem:[#allocation9_spill] sm:$0xff] %v5812_v11 }
 0x14a   : > { %1569 = vperm.xlu2 %4891, %v5288_v14   ;;  %8678 = vst [vmem:[#allocation12_spill] sm:$0xff] %v5867_v51 }
 0x14b   : > { %v5818_v12 = vpop.permute.xlu2 %1234  ;;  %1566 = vperm.xlu1 %4893, %v5291_v15   ;;  %v1205_v20 = vpop.permute.xlu1 %1204  ;;  %2631 = vmatpush.bf16.msrb.mxu0 %v5336_v22 }
 0x14c   : > { %v5822_v43 = vpop.permute.xlu0 %1358  ;;  %4905 = vset.pattern.permute.xlu0 %v8563_v21  ;;  %vm1241_vm0 = vcmp.eq.s32.totalorder %v1205_v20, %v5419_v30 }
 0x14d   : > { %2212 = vperm.xlu0 %4905, %v5255_v6   ;;  %vm4593_vm2 = vmpackc.low %vm1241_vm0, %vm1240_vm1  ;;  %v5904_v18 = vpop.f32.mrf.mxu3  ;;  %vm1405_vm8 = vcmp.eq.s32.totalorder %v5822_v43, %v5419_v30  ;;  %vm1245_vm1 = vcmp.eq.s32.totalorder %v5767_v5, %v5419_v30  ;;  %v6050_v5 = vld [vmem:[%s8550_s1 + $0x20] sm:$0xff] }
 0x14e   : > { %4592 = vmatmul.msk.bf16.gmra.mxu0 %vm4591_vm12, %v8567_v32  ;;  %vm1082_vm12 = vcmp.eq.s32.totalorder %v5710_v16, %v5419_v30  ;;  %v5995_v16 = vld [vmem:[%s5237_s15 + $0x60] sm:$0xff] }
 0x14f   : > { %2632 = vmatpush.bf16.msrb.mxu0 %v5344_v23  ;;  %v5847_v23 = vld [vmem:[%s5237_s15 + $0x8] sm:$0xff]  ;;  %8687 = vst [vmem:[#allocation21_spill] sm:$0xff] %v5995_v16  ;;  %vm4587_vm14 = vmpackc.low %vm1082_vm12, %vm1081_vm13 }
 0x150   : > { %v5830_v14 = vpop.f32.mrf.mxu1 }
 0x151   : > { %v5838_v22 = vadd.f32 %v5830_v14, %v5719_v61 }
 0x152   : > { %4895 = vset.pattern.permute.xlu2 %v5138_v0 }
 0x153   : > { %4894 = vset.pattern.permute.xlu1 %v5138_v0  ;;  %v5844_v6 = vpop.permute.xlu1 %1213  ;;  %1699 = vperm.xlu2 %4895, %v5847_v23   ;;  %v5850_v45 = vpop.permute.xlu2 %1364 }
 0x154   : > { %1696 = vperm.xlu1 %4894, %v5853_v46   ;;  %v5856_v47 = vpop.permute.xlu0 %1373  ;;  %2633 = vmatpush.bf16.msrb.mxu0 %v5357_v24  ;;  %v5873_v24 = vld [vmem:[%s5237_s15 + $0x20] sm:$0xff]  ;;  %vm1407_vm3 = vcmp.eq.s32.totalorder %v5850_v45, %v5419_v30 }
 0x155   : > { %4584 = vmatmul.msk.bf16.gmra.mxu3 %vm4583_vm15, %v8567_v32  ;;  %4906 = vset.pattern.permute.xlu0 %v8565_v48  ;;  %vm1244_vm15 = vcmp.eq.s32.totalorder %v5844_v6, %v5419_v30 }
 0x156   : > { %1865 = vperm.xlu0 %4906, %v5853_v46   ;;  %vm4597_vm4 = vmpackc.low %vm1245_vm1, %vm1244_vm15  ;;  %vm1249_vm15 = vcmp.eq.s32.totalorder %v5804_v42, %v5419_v30 }
 0x158   : > { %v5864_v7 = vpop.f32.mrf.mxu1  ;;  %2634 = vmatpush.bf16.msrb.mxu0 %v5365_v25 }
 0x159   : > { %8677 = vst [vmem:[#allocation11_spill] sm:$0xff] %v5864_v7  ;;  %v8690_v7 = vmax.f32 %v5719_v61, %v5830_v14  ;;  %v6042_v61 = vld [vmem:[%s5237_s15 + $0x70] sm:$0xff] }
 0x15b   : > { %v5870_v10 = vpop.permute.xlu1 %1222  ;;  %1708 = vperm.xlu2 %4895, %v5873_v24   ;;  %v5876_v52 = vpop.permute.xlu2 %1370 }
 0x15c   : > { %1705 = vperm.xlu1 %4894, %v5881_v56   ;;  %v5884_v25 = vpop.permute.xlu0 %1382  ;;  %2635 = vmatpush.bf16.msrb.mxu0 %v5374_v26 }
 0x15e   : > { %4594 = vmatmul.msk.bf16.gmra.mxu0 %vm4593_vm2, %v8567_v32  ;;  %1880 = vperm.xlu0 %4906, %v5889_v59  }
 0x160   : > { %v5892_v60 = vpop.f32.mrf.mxu1 }
 0x161   : > { %v5902_v26 = vadd.f32 %v5892_v60, %v5764_v34  ;;  %v947_v63 = vpop.f32.mrf.mxu0  ;;  %v8697_v62 = vmax.f32 %v5764_v34, %v5892_v60  ;;  %v6151_v60 = vld [vmem:[%s8550_s1] sm:$0xff] }
 0x162   : > { %v5909_v0 = vmax.f32 %v834_v3, %v947_v63  ;;  %v5912_v57 = vadd.f32 %v947_v63, %v5747_v27 }
 0x163   : > { %v5914_v2 = vpop.permute.xlu1 %1231  ;;  %1714 = vperm.xlu2 %4895, %v5917_v28   ;;  %v5920_v40 = vpop.permute.xlu2 %1379 }
 0x164   : > { %1711 = vperm.xlu1 %4894, %v5889_v59   ;;  %v5923_v20 = vpop.permute.xlu0 %1391 }
 0x165   : > { %4586 = vmatmul.msk.bf16.gmra.mxu3 %vm4585_vm5, %v8567_v32 }
 0x166   : > { %1889 = vperm.xlu0 %4906, %v5927_v50  }
 0x168   : > { %v957_v19 = vpop.f32.mrf.mxu2  ;;  %v5930_v27 = vpop.f32.mrf.mxu1 }
 0x169   : > { %8681 = vst [vmem:[#allocation15_spill] sm:$0xff] %v5930_v27  ;;  %v5935_v3 = vmax.f32 %v838_v38, %v957_v19  ;;  %v5938_v63 = vadd.f32 %v957_v19, %v5793_v17  ;;  %v5940_v21 = vpop.f32.mrf.mxu0  ;;  %v5955_v38 = vpop.f32.mrf.mxu3  ;;  %v5973_v19 = vld [vmem:[%s8550_s1 + $0x38] sm:$0xff] }
 0x16a   : > { %8682 = vst [vmem:[#allocation16_spill] sm:$0xff] %v5940_v21 }
 0x16b   : > { %1723 = vperm.xlu2 %4895, %v5949_v4   ;;  %v5952_v53 = vpop.permute.xlu2 %1388  ;;  %8683 = vst [vmem:[#allocation17_spill] sm:$0xff] %v5955_v38 }
 0x16c   : > { %1720 = vperm.xlu1 %4894, %v5927_v50   ;;  %v1362_v9 = vpop.permute.xlu1 %1361  ;;  %v5958_v29 = vpop.permute.xlu0 %1400 }
 0x16d   : > { %vm1406_vm9 = vcmp.eq.s32.totalorder %v1362_v9, %v5419_v30  ;;  %8684 = vst [vmem:[#allocation18_spill] sm:$0xff] %v5958_v29 }
 0x16e   : > { %vm4605_vm11 = vmpackc.low %vm1406_vm9, %vm1405_vm8  ;;  %4596 = vmatmul.msk.bf16.gmra.mxu0 %vm4595_vm10, %v8567_v32  ;;  %1895 = vperm.xlu0 %4906, %v5962_v31   ;;  %vm1246_vm8 = vcmp.eq.s32.totalorder %v5772_v35, %v5419_v30  ;;  %vm1247_vm9 = vcmp.eq.s32.totalorder %v5870_v10, %v5419_v30  ;;  %vm1409_vm10 = vcmp.eq.s32.totalorder %v5876_v52, %v5419_v30 }
 0x16f   : > { %4606 = vmatmul.msk.bf16.vlgmr.msrb.gmra.mxu1 %vm4605_vm11, %v8567_v32  ;;  %vm1410_vm11 = vcmp.eq.s32.totalorder %v5856_v47, %v5419_v30  ;;  %vm4599_vm12 = vmpackc.low %vm1247_vm9, %vm1246_vm8  ;;  %vm1413_vm8 = vcmp.eq.s32.totalorder %v5884_v25, %v5419_v30  ;;  %v8707_v25 = vmov 9  }
 0x170   : > { %v5966_v17 = vpop.f32.mrf.mxu2  ;;  %v5968_v43 = vpop.f32.mrf.mxu1  ;;  %2797 = vmatpush.bf16.msrb.mxu1 %v5973_v19  ;;  %vm4609_vm13 = vmpackc.low %vm1410_vm11, %vm1409_vm10  ;;  %vm1251_vm10 = vcmp.eq.s32.totalorder %v5818_v12, %v5419_v30 }
 0x171   : > { %8686 = vst [vmem:[#allocation20_spill] sm:$0xff] %v5966_v17  ;;  %v5982_v48 = vadd.f32 %v5968_v43, %v5826_v44  ;;  %v952_v15 = vpop.f32.mrf.mxu0 }
 0x172   : > { %v5987_v32 = vmax.f32 %v836_v36, %v952_v15  ;;  %v5990_v38 = vadd.f32 %v952_v15, %v5787_v37  ;;  %v6011_v36 = vpop.f32.mrf.mxu3 }
 0x173   : > { %1732 = vperm.xlu2 %4895, %v5995_v16   ;;  %v5998_v9 = vpop.permute.xlu2 %1397 }
 0x174   : > { %1729 = vperm.xlu1 %4894, %v6001_v49   ;;  %v1368_v58 = vpop.permute.xlu1 %1367  ;;  %2798 = vmatpush.bf16.msrb.mxu1 %v6007_v8 }
 0x175   : > { %4588 = vmatmul.msk.bf16.gmra.mxu3 %vm4587_vm14, %v8688_v55  ;;  %v1531_v37 = vpop.permute.xlu0 %1530  ;;  %vm1408_vm0 = vcmp.eq.s32.totalorder %v1368_v58, %v5419_v30  ;;  %vm1248_vm14 = vcmp.eq.s32.totalorder %v5798_v39, %v5419_v30 }
 0x176   : > { %vm1575_vm2 = vcmp.eq.s32.totalorder %v1531_v37, %v5419_v30  ;;  %vm4607_vm6 = vmpackc.low %vm1408_vm0, %vm1407_vm3  ;;  %v6093_v37 = vld [vmem:[%s8550_s1 + $0x10] sm:$0xff] }
 0x177   : > { %8695 = vst [vmem:[#allocation26_spill] sm:$0xff] %v6093_v37  ;;  %vm4601_vm1 = vmpackc.low %vm1249_vm15, %vm1248_vm14 }
 0x178   : > { %v962_v15 = vpop.f32.mrf.mxu2  ;;  %v6013_v27 = vpop.f32.mrf.mxu1  ;;  %2799 = vmatpush.bf16.msrb.mxu1 %v6018_v41 }
 0x179   : > { %8689 = vst [vmem:[#allocation22_spill] sm:$0xff] %v6013_v27  ;;  %v6026_v1 = vmax.f32 %v8690_v7, %v962_v15  ;;  %v6029_v17 = vadd.f32 %v962_v15, %v5838_v22  ;;  %v6035_v27 = vld [vmem:[%s5237_s15 + $0x78] sm:$0xff] }
 0x17a   : > { %v6065_v7 = vld [vmem:[%s8550_s1 + $0x18] sm:$0xff]  ;;  %v6068_v58 = vpop.f32.mrf.mxu3 }
 0x17b   : > { %1741 = vperm.xlu2 %4895, %v6035_v27   ;;  %8692 = vst [vmem:[#allocation24_spill] sm:$0xff] %v6065_v7 }
 0x17c   : > { %1738 = vperm.xlu1 %4894, %v6042_v61   ;;  %v6045_v14 = vpop.permute.xlu1 %1376  ;;  %v1528_v22 = vpop.permute.xlu2 %1527  ;;  %2800 = vmatpush.bf16.msrb.mxu1 %v6050_v5  ;;  %8693 = vst [vmem:[#allocation25_spill] sm:$0xff] %v6068_v58 }
 0x17d   : > { %vm1574_vm5 = vcmp.eq.s32.totalorder %v1528_v22, %v5419_v30  ;;  %v8694_v22 = vmov 8   ;;  %v6110_v31 = vpop.permute.xlu0 %1545  ;;  %vm1411_vm0 = vcmp.eq.s32.totalorder %v6045_v14, %v5419_v30 }
 0x17e   : > { %vm4621_vm7 = vmpackc.low %vm1575_vm2, %vm1574_vm5  ;;  %4598 = vmatmul.msk.bf16.gmra.mxu0 %vm4597_vm4, %v8688_v55  ;;  %vm1412_vm2 = vcmp.eq.s32.totalorder %v5920_v40, %v5419_v30 }
 0x17f   : > { %4608 = vmatmul.msk.bf16.gmra.mxu1 %vm4607_vm6, %v8688_v55  ;;  %4622 = vmatmul.msk.bf16.vlgmr.msrb.gmra.mxu2 %vm4621_vm7, %v8688_v55  ;;  %vm4611_vm5 = vmpackc.low %vm1412_vm2, %vm1411_vm0  ;;  %vm1250_vm7 = vcmp.eq.s32.totalorder %v5914_v2, %v5419_v30  ;;  %vm1415_vm0 = vcmp.eq.s32.totalorder %v5952_v53, %v5419_v30  ;;  %vm1580_vm2 = vcmp.eq.s32.totalorder %v6110_v31, %v5419_v30 }
 0x180   : > { %v6057_v6 = vpop.f32.mrf.mxu2  ;;  %v6059_v45 = vpop.f32.mrf.mxu1  ;;  %2966 = vmatpush.bf16.msrb.mxu2 %v5973_v19  ;;  %2801 = vmatpush.bf16.msrb.mxu1 %v6065_v7 }
 0x181   : > { %8691 = vst [vmem:[#allocation23_spill] sm:$0xff] %v6057_v6  ;;  %v6074_v15 = vadd.f32 %v6059_v45, %v5904_v18  ;;  %v8581_v6 = vmov 11  }
 0x182   : > { %4927 = vset.pattern.permute.xlu0 %v8581_v6 }
 0x183   : > { %4898 = vset.pattern.permute.xlu2 %v8694_v22  ;;  %2372 = vperm.xlu0 %4927, %v5853_v46  }
 0x184   : > { %4897 = vset.pattern.permute.xlu1 %v8694_v22  ;;  %v6079_v11 = vpop.permute.xlu1 %1385  ;;  %1871 = vperm.xlu2 %4898, %v6082_v13   ;;  %v6085_v58 = vpop.permute.xlu2 %1536 }
 0x185   : > { %1868 = vperm.xlu1 %4897, %v5847_v23   ;;  %2967 = vmatpush.bf16.msrb.mxu2 %v6007_v8  ;;  %vm1577_vm3 = vcmp.eq.s32.totalorder %v6085_v58, %v5419_v30  ;;  %v8602_v58 = vmov 9   ;;  %vm1414_vm9 = vcmp.eq.s32.totalorder %v6079_v11, %v5419_v30 }
 0x186   : > { %2802 = vmatpush.bf16.msrb.mxu1 %v6093_v37  ;;  %vm4613_vm14 = vmpackc.low %vm1414_vm9, %vm1413_vm8 }
 0x188   : > { %v967_v6 = vpop.f32.mrf.mxu2  ;;  %v6096_v51 = vpop.f32.mrf.mxu1 }
 0x189   : > { %8696 = vst [vmem:[#allocation27_spill] sm:$0xff] %v6096_v51  ;;  %v6103_v21 = vmax.f32 %v8697_v62, %v967_v6  ;;  %v6106_v33 = vadd.f32 %v967_v6, %v5902_v26  ;;  %v6108_v54 = vpop.f32.mrf.mxu3  ;;  %2968 = vmatpush.bf16.msrb.mxu2 %v6018_v41  ;;  %v6124_v62 = vld [vmem:[%s8550_s1 + $0x8] sm:$0xff]  ;;  %v6163_v6 = vpop.permute.xlu0 %1554 }
 0x18a   : > { %v6118_v22 = vadd.f32 %v6108_v54, %v5912_v57  ;;  %2803 = vmatpush.bf16.msrb.mxu1 %v6124_v62 }
 0x18b   : > { %2387 = vperm.xlu0 %4927, %v5889_v59  }
 0x18c   : > { %v6131_v34 = vpop.permute.xlu1 %1394  ;;  %1877 = vperm.xlu2 %4898, %v5873_v24   ;;  %v6134_v10 = vpop.permute.xlu2 %1542 }
 0x18d   : > { %1874 = vperm.xlu1 %4897, %v5881_v56   ;;  %2969 = vmatpush.bf16.msrb.mxu2 %v6050_v5  ;;  %vm1417_vm9 = vcmp.eq.s32.totalorder %v6131_v34, %v5419_v30 }
 0x18e   : > { %4600 = vmatmul.msk.bf16.gmra.mxu0 %vm4599_vm12, %v8688_v55  ;;  %2804 = vmatpush.bf16.msrb.mxu1 %v6151_v60  ;;  %vm4603_vm12 = vmpackc.low %vm1251_vm10, %vm1250_vm7  ;;  %vm1583_vm10 = vcmp.eq.s32.totalorder %v6163_v6, %v5419_v30 }
 0x18f   : > { %4610 = vmatmul.msk.bf16.gmra.mxu1 %vm4609_vm13, %v8688_v55  ;;  %vm1579_vm13 = vcmp.eq.s32.totalorder %v6134_v10, %v5419_v30 }
 0x190   : > { %v6144_v47 = vpop.f32.mrf.mxu2  ;;  %v6146_v52 = vpop.f32.mrf.mxu1 }
 0x191   : > { %8698 = vst [vmem:[#allocation28_spill] sm:$0xff] %v6144_v47  ;;  %v6158_v26 = vadd.f32 %v6146_v52, %v6011_v36  ;;  %v6160_v57 = vpop.f32.mrf.mxu3  ;;  %2970 = vmatpush.bf16.msrb.mxu2 %v6065_v7  ;;  %v6168_v47 = vld [vmem:[%s5237_s15 + $0x38] sm:$0xff]  ;;  %v6209_v42 = vpop.permute.xlu0 %1563 }
 0x192   : > { %8699 = vst [vmem:[#allocation29_spill] sm:$0xff] %v6160_v57  ;;  %v8701_v57 = vmax.f32 %v5826_v44, %v5968_v43 }
 0x193   : > { %2390 = vperm.xlu0 %4927, %v5917_v28  }
 0x194   : > { %v6165_v51 = vpop.permute.xlu1 %1403  ;;  %1886 = vperm.xlu2 %4898, %v6168_v47   ;;  %v6171_v50 = vpop.permute.xlu2 %1551 }
 0x195   : > { %8700 = vst [vmem:[#allocation30_spill] sm:$0xff] %v6165_v51  ;;  %1883 = vperm.xlu1 %4897, %v5917_v28   ;;  %2971 = vmatpush.bf16.msrb.mxu2 %v6093_v37  ;;  %v8706_v37 = vmax.f32 %v5904_v18, %v6059_v45  ;;  %v6272_v45 = vpop.f32.mrf.mxu0 }
 0x196   : > { %8710 = vst [vmem:[#allocation35_spill] sm:$0xff] %v6272_v45 }
 0x198   : > { %v972_v35 = vpop.f32.mrf.mxu2 }
 0x199   : > { %v6179_v29 = vmax.f32 %v8701_v57, %v972_v35  ;;  %v6182_v51 = vadd.f32 %v972_v35, %v5982_v48  ;;  %v6184_v7 = vpop.f32.mrf.mxu3  ;;  %2972 = vmatpush.bf16.msrb.mxu2 %v6124_v62  ;;  %v8702_v48 = vmov 10   ;;  %v8705_v35 = vmov 11   ;;  %v6228_v57 = vpop.permute.xlu0 %1572 }
 0x19a   : > { %v6194_v28 = vadd.f32 %v6184_v7, %v5990_v38 }
 0x19b   : > { %2399 = vperm.xlu0 %4927, %v5949_v4  }
 0x19c   : > { %v6199_v44 = vpop.permute.xlu2 %1560  ;;  %4900 = vset.pattern.permute.xlu2 %v8702_v48 }
 0x19d   : > { %4899 = vset.pattern.permute.xlu1 %v8702_v48  ;;  %v1534_v39 = vpop.permute.xlu1 %1533  ;;  %2206 = vperm.xlu2 %4900, %v5847_v23  }
 0x19e   : > { %vm1576_vm4 = vcmp.eq.s32.totalorder %v1534_v39, %v5419_v30  ;;  %2203 = vperm.xlu1 %4899, %v5853_v46   ;;  %4602 = vmatmul.msk.bf16.gmra.mxu0 %vm4601_vm1, %v8688_v55  ;;  %vm1416_vm1 = vcmp.eq.s32.totalorder %v5923_v20, %v5419_v30 }
 0x19f   : > { %4612 = vmatmul.msk.bf16.gmra.mxu1 %vm4611_vm5, %v8688_v55  ;;  %vm4623_vm6 = vmpackc.low %vm1577_vm3, %vm1576_vm4  ;;  %2973 = vmatpush.bf16.msrb.mxu2 %v6151_v60 }
 0x1a0   : > { %v6215_v40 = vpop.f32.mrf.mxu2  ;;  %4624 = vmatmul.msk.bf16.gmra.mxu2 %vm4623_vm6, %v8688_v55  ;;  %vm4615_vm4 = vmpackc.low %vm1416_vm1, %vm1415_vm0 }
 0x1a1   : > { %8703 = vst [vmem:[#allocation31_spill] sm:$0xff] %v6215_v40  ;;  %v6218_v38 = vpop.f32.mrf.mxu3  ;;  %v6265_v12 = vpop.permute.xlu0 %1702 }
 0x1a2   : > { %8704 = vst [vmem:[#allocation32_spill] sm:$0xff] %v6218_v38 }
 0x1a3   : > { %2408 = vperm.xlu0 %4927, %v5995_v16  }
 0x1a4   : > { %v6221_v43 = vpop.permute.xlu2 %1569 }
 0x1a5   : > { %v1540_v14 = vpop.permute.xlu1 %1539  ;;  %4902 = vset.pattern.permute.xlu2 %v8602_v58 }
 0x1a6   : > { %4901 = vset.pattern.permute.xlu1 %v8705_v35  ;;  %2034 = vperm.xlu2 %4902, %v5853_v46   ;;  %vm1578_vm11 = vcmp.eq.s32.totalorder %v1540_v14, %v5419_v30 }
 0x1a7   : > { %2375 = vperm.xlu1 %4901, %v5847_v23   ;;  %vm4625_vm15 = vmpackc.low %vm1579_vm13, %vm1578_vm11  ;;  %vm1582_vm11 = vcmp.eq.s32.totalorder %v6171_v50, %v5419_v30 }
 0x1a8   : > { %v977_v39 = vpop.f32.mrf.mxu2 }
 0x1a9   : > { %v6233_v40 = vmax.f32 %v8706_v37, %v977_v39  ;;  %v6236_v38 = vadd.f32 %v977_v39, %v6074_v15  ;;  %v6238_v58 = vpop.f32.mrf.mxu3  ;;  %v6297_v45 = vpop.permute.xlu0 %1717 }
 0x1aa   : > { %v6246_v16 = vadd.f32 %v6238_v58, %v5938_v63 }
 0x1ab   : > { %4936 = vset.pattern.permute.xlu0 %v8702_v48 }
 0x1ac   : > { %2215 = vperm.xlu0 %4936, %v5873_v24  }
 0x1ad   : > { %v1549_v18 = vpop.permute.xlu1 %1548  ;;  %v1700_v2 = vpop.permute.xlu2 %1699 }
 0x1ae   : > { %4604 = vmatmul.msk.bf16.gmra.mxu0 %vm4603_vm12, %v8688_v55  ;;  %4904 = vset.pattern.permute.xlu2 %v8702_v48  ;;  %vm1581_vm3 = vcmp.eq.s32.totalorder %v1549_v18, %v5419_v30  ;;  %vm1744_vm6 = vcmp.eq.s32.totalorder %v1700_v2, %v5419_v30  ;;  %vm1418_vm12 = vcmp.eq.s32.totalorder %v5998_v9, %v5419_v30 }
 0x1af   : > { %4903 = vset.pattern.permute.xlu1 %v8707_v25  ;;  %4614 = vmatmul.msk.bf16.gmra.mxu1 %vm4613_vm14, %v8688_v55  ;;  %vm4627_vm5 = vmpackc.low %vm1581_vm3, %vm1580_vm2 }
 0x1b0   : > { %v6261_v11 = vpop.f32.mrf.mxu2  ;;  %2037 = vperm.xlu1 %4903, %v5847_v23   ;;  %4626 = vmatmul.msk.bf16.gmra.mxu2 %vm4625_vm15, %v8688_v55  ;;  %v8711_v23 = vmax.f32 %v6011_v36, %v6146_v52  ;;  %vm4617_vm13 = vmpackc.low %vm1418_vm12, %vm1417_vm9  ;;  %vm1745_vm15 = vcmp.eq.s32.totalorder %v6265_v12, %v5419_v30  ;;  %v8717_v12 = vld [vmem:[#allocation18_spill] sm:$0xff] }
 0x1b1   : > { %8708 = vst [vmem:[#allocation33_spill] sm:$0xff] %v6261_v11  ;;  %v6267_v63 = vpop.f32.mrf.mxu3  ;;  %2209 = vperm.xlu2 %4904, %v6082_v13   ;;  %vm4629_vm14 = vmpackc.low %vm1583_vm10, %vm1582_vm11  ;;  %vm1419_vm2 = vcmp.eq.s32.totalorder %v8717_v12, %v5419_v30  ;;  %vm1586_vm11 = vcmp.eq.s32.totalorder %v6209_v42, %v5419_v30 }
 0x1b2   : > { %8709 = vst [vmem:[#allocation34_spill] sm:$0xff] %v6267_v63 }
 0x1b4   : > { %2248 = vperm.xlu0 %4936, %v6035_v27  }
 0x1b5   : > { %v6274_v37 = vpop.permute.xlu1 %1557  ;;  %v6276_v15 = vpop.permute.xlu2 %1708 }
 0x1b6   : > { %vm1747_vm9 = vcmp.eq.s32.totalorder %v6276_v15, %v5419_v30 }
 0x1b8   : > { %v982_v10 = vpop.f32.mrf.mxu2  ;;  %4907 = vset.pattern.permute.xlu1 %v8705_v35 }
 0x1b9   : > { %v6282_v14 = vmax.f32 %v8711_v23, %v982_v10  ;;  %v6285_v39 = vadd.f32 %v982_v10, %v6158_v26  ;;  %v6287_v46 = vpop.f32.mrf.mxu3  ;;  %2378 = vperm.xlu1 %4907, %v6082_v13   ;;  %4908 = vset.pattern.permute.xlu2 %v8705_v35 }
 0x1ba   : > { %v1178_v11 = vmax.f32 %v6026_v1, %v6287_v46  ;;  %v6295_v63 = vadd.f32 %v6287_v46, %v6029_v17  ;;  %2381 = vperm.xlu2 %4908, %v5881_v56   ;;  %v8712_v17 = vmax.f32 %v5909_v0, %v6108_v54  ;;  %v6331_v0 = vpop.permute.xlu0 %1726 }
 0x1bb   : > { %v1285_v36 = vpop.f32.mrf.mxu0 }
 0x1bc   : > { %v6311_v52 = vmax.f32 %v8712_v17, %v1285_v36  ;;  %v6314_v26 = vadd.f32 %v1285_v36, %v6118_v22  ;;  %4941 = vset.pattern.permute.xlu0 %v8707_v25 }
 0x1bd   : > { %v6316_v10 = vpop.permute.xlu1 %1566  ;;  %v6318_v53 = vpop.permute.xlu2 %1714  ;;  %2055 = vperm.xlu0 %4941, %v6168_v47  }
 0x1be   : > { %vm1587_vm12 = vcmp.eq.s32.totalorder %v6316_v10, %v5419_v30  ;;  %v8724_v10 = vld [vmem:[#allocation14_spill] sm:$0xff] }
 0x1bf   : > { %4616 = vmatmul.msk.bf16.gmra.mxu1 %vm4615_vm4, %v8688_v55  ;;  %vm1584_vm4 = vcmp.eq.s32.totalorder %v6274_v37, %v5419_v30 }
 0x1c0   : > { %4628 = vmatmul.msk.bf16.gmra.mxu2 %vm4627_vm5, %v8688_v55 }
 0x1c1   : > { %v6322_v20 = vpop.f32.mrf.mxu3  ;;  %4909 = vset.pattern.permute.xlu1 %v8707_v25 }
 0x1c2   : > { %8713 = vst [vmem:[#allocation36_spill] sm:$0xff] %v6322_v20  ;;  %2040 = vperm.xlu1 %4909, %v6082_v13   ;;  %4910 = vset.pattern.permute.xlu2 %v8707_v25  ;;  %v6371_v50 = vpop.permute.xlu0 %1735  ;;  %v8756_v20 = vmov 13  }
 0x1c3   : > { %v6327_v54 = vpop.f32.mrf.mxu0  ;;  %2043 = vperm.xlu2 %4910, %v5881_v56  }
 0x1c5   : > { %v6334_v31 = vpop.permute.xlu2 %1723  ;;  %2067 = vperm.xlu0 %4941, %v6001_v49  }
 0x1c6   : > { %v1697_v22 = vpop.permute.xlu1 %1696 }
 0x1c7   : > { %vm1743_vm7 = vcmp.eq.s32.totalorder %v1697_v22, %v5419_v30  ;;  %v8718_v22 = vld [vmem:[#allocation30_spill] sm:$0xff] }
 0x1c8   : > { %vm4637_vm8 = vmpackc.low %vm1744_vm6, %vm1743_vm7  ;;  %vm1420_vm3 = vcmp.eq.s32.totalorder %v8718_v22, %v5419_v30  ;;  %vm1585_vm6 = vcmp.eq.s32.totalorder %v6199_v44, %v5419_v30  ;;  %v6439_v44 = vpop.f32.mrf.mxu1 }
 0x1c9   : > { %v6338_v18 = vpop.f32.mrf.mxu3  ;;  %4638 = vmatmul.msk.bf16.vlgmr.msra.gmra.mxu3 %vm4637_vm8, %v8688_v55  ;;  %vm4619_vm5 = vmpackc.low %vm1420_vm3, %vm1419_vm2  ;;  %8723 = vst [vmem:[#allocation18_spill] sm:$0xff] %v6439_v44 }
 0x1ca   : > { %v1180_v56 = vmax.f32 %v6103_v21, %v6338_v18  ;;  %v6345_v23 = vadd.f32 %v6338_v18, %v6106_v33  ;;  %4911 = vset.pattern.permute.xlu1 %v8702_v48  ;;  %3135 = vmatpush.bf16.msra.mxu3 %v5973_v19  ;;  %v8714_v33 = vmax.f32 %v5987_v32, %v6184_v7  ;;  %vm4631_vm7 = vmpackc.low %vm1585_vm6, %vm1584_vm4 }
 0x1cb   : > { %2218 = vperm.xlu1 %4911, %v5889_v59   ;;  %v1290_v2 = vpop.f32.mrf.mxu0  ;;  %4912 = vset.pattern.permute.xlu2 %v8705_v35  ;;  %vm1588_vm4 = vcmp.eq.s32.totalorder %v6221_v43, %v5419_v30 }
 0x1cc   : > { %v6360_v36 = vmax.f32 %v8714_v33, %v1290_v2  ;;  %v6363_v19 = vadd.f32 %v1290_v2, %v6194_v28  ;;  %2384 = vperm.xlu2 %4912, %v5873_v24   ;;  %v8719_v2 = vmax.f32 %v5935_v3, %v6238_v58  ;;  %v8721_v3 = vld [vmem:[#allocation26_spill] sm:$0xff] }
 0x1cd   : > { %v6369_v34 = vpop.permute.xlu2 %1732  ;;  %2076 = vperm.xlu0 %4941, %v6042_v61  }
 0x1ce   : > { %v1706_v17 = vpop.permute.xlu1 %1705  ;;  %3136 = vmatpush.bf16.msra.mxu3 %v6007_v8  ;;  %v6394_v8 = vpop.permute.xlu0 %2212 }
 0x1cf   : > { %4618 = vmatmul.msk.bf16.gmra.mxu1 %vm4617_vm13, %v8688_v55  ;;  %vm1746_vm0 = vcmp.eq.s32.totalorder %v1706_v17, %v5419_v30  ;;  %v8720_v17 = vld [vmem:[#allocation13_spill] sm:$0xff]  ;;  %vm4633_vm13 = vmpackc.low %vm1587_vm12, %vm1586_vm11 }
 0x1d0   : > { %4630 = vmatmul.msk.bf16.gmra.mxu2 %vm4629_vm14, %v8688_v55  ;;  %vm4639_vm1 = vmpackc.low %vm1746_vm0, %vm1745_vm15  ;;  %vm1749_vm14 = vcmp.eq.s32.totalorder %v6318_v53, %v5419_v30  ;;  %vm1750_vm15 = vcmp.eq.s32.totalorder %v6297_v45, %v5419_v30  ;;  %v6508_v45 = vpop.f32.mrf.mxu2 }
 0x1d1   : > { %v6379_v32 = vpop.f32.mrf.mxu3  ;;  %8728 = vst [vmem:[#allocation26_spill] sm:$0xff] %v6508_v45 }
 0x1d2   : > { %8715 = vst [vmem:[#allocation37_spill] sm:$0xff] %v6379_v32  ;;  %3137 = vmatpush.bf16.msra.mxu3 %v6018_v41 }
 0x1d3   : > { %4913 = vset.pattern.permute.xlu1 %v8707_v25  ;;  %v6383_v28 = vpop.f32.mrf.mxu0 }
 0x1d4   : > { %2046 = vperm.xlu1 %4913, %v5873_v24   ;;  %4914 = vset.pattern.permute.xlu2 %v8707_v25 }
 0x1d5   : > { %v6390_v9 = vpop.permute.xlu2 %1741  ;;  %2049 = vperm.xlu2 %4914, %v5889_v59   ;;  %v8716_v59 = vld [vmem:[#allocation24_spill] sm:$0xff] }
 0x1d6   : > { %v1712_v41 = vpop.permute.xlu1 %1711  ;;  %3138 = vmatpush.bf16.msra.mxu3 %v6050_v5 }
 0x1d7   : > { %vm1748_vm8 = vcmp.eq.s32.totalorder %v1712_v41, %v5419_v30 }
 0x1d8   : > { %vm4641_vm10 = vmpackc.low %vm1748_vm8, %vm1747_vm9  ;;  %vm1752_vm9 = vcmp.eq.s32.totalorder %v6334_v31, %v5419_v30 }
 0x1d9   : > { %v6397_v24 = vpop.f32.mrf.mxu3  ;;  %4640 = vmatmul.msk.bf16.gmra.mxu3 %vm4639_vm1, %v8688_v55  ;;  %vm4643_vm1 = vmpackc.low %vm1750_vm15, %vm1749_vm14 }
 0x1da   : > { %v6404_v6 = vadd.f32 %v6397_v24, %v6182_v51  ;;  %3139 = vmatpush.bf16.msra.mxu3 %v8716_v59  ;;  %v8731_v31 = vmax.f32 %v6179_v29, %v6397_v24 }
 0x1db   : > { %v1295_v5 = vpop.f32.mrf.mxu0 }
 0x1dc   : > { %v6416_v33 = vmax.f32 %v8719_v2, %v1295_v5  ;;  %v6419_v51 = vadd.f32 %v1295_v5, %v6246_v16  ;;  %4915 = vset.pattern.permute.xlu1 %v8702_v48  ;;  %v1866_v16 = vpop.permute.xlu0 %1865 }
 0x1dd   : > { %2221 = vperm.xlu1 %4915, %v8720_v17   ;;  %4916 = vset.pattern.permute.xlu2 %v8702_v48  ;;  %vm1912_vm0 = vcmp.eq.s32.totalorder %v1866_v16, %v5419_v30 }
 0x1de   : > { %v6426_v59 = vpop.permute.xlu1 %1720  ;;  %v6428_v37 = vpop.permute.xlu2 %1871  ;;  %2224 = vperm.xlu2 %4916, %v6168_v47   ;;  %3140 = vmatpush.bf16.msra.mxu3 %v8721_v3 }
 0x1df   : > { %4620 = vmatmul.msk.bf16.gmra.mxu1 %vm4619_vm5, %v8688_v55  ;;  %vm1589_vm5 = vcmp.eq.s32.totalorder %v6228_v57, %v5419_v30  ;;  %vm1914_vm11 = vcmp.eq.s32.totalorder %v6428_v37, %v5419_v30 }
 0x1e0   : > { %4632 = vmatmul.msk.bf16.gmra.mxu2 %vm4631_vm7, %v8688_v55  ;;  %vm4635_vm6 = vmpackc.low %vm1589_vm5, %vm1588_vm4  ;;  %vm1751_vm7 = vcmp.eq.s32.totalorder %v6426_v59, %v5419_v30 }
 0x1e1   : > { %v6434_v58 = vpop.f32.mrf.mxu3 }
 0x1e2   : > { %8722 = vst [vmem:[#allocation24_spill] sm:$0xff] %v6434_v58  ;;  %3141 = vmatpush.bf16.msra.mxu3 %v6124_v62 }
 0x1e3   : > { %v6437_v12 = vpop.f32.mrf.mxu0 }
 0x1e4   : > { %v6462_v2 = vpop.permute.xlu0 %1880 }
 0x1e5   : > { %4917 = vset.pattern.permute.xlu1 %v8705_v35 }
 0x1e6   : > { %2393 = vperm.xlu1 %4917, %v6168_v47   ;;  %v6444_v22 = vpop.permute.xlu1 %1729  ;;  %v6446_v5 = vpop.permute.xlu2 %1877  ;;  %4918 = vset.pattern.permute.xlu2 %v8707_v25 }
 0x1e7   : > { %2052 = vperm.xlu2 %4918, %v8720_v17   ;;  %3142 = vmatpush.bf16.msra.mxu3 %v6151_v60 }
 0x1e9   : > { %v6453_v62 = vpop.f32.mrf.mxu3  ;;  %4642 = vmatmul.msk.bf16.gmra.mxu3 %vm4641_vm10, %v8688_v55  ;;  %vm4645_vm10 = vmpackc.low %vm1752_vm9, %vm1751_vm7 }
 0x1ea   : > { %v6460_v41 = vadd.f32 %v6453_v62, %v6236_v38 }
 0x1eb   : > { %v1300_v3 = vpop.f32.mrf.mxu0 }
 0x1ec   : > { %v6471_v60 = vmax.f32 %v1178_v11, %v1300_v3  ;;  %v6474_v15 = vadd.f32 %v1300_v3, %v6295_v63  ;;  %v1454_v17 = vpop.f32.mrf.mxu1  ;;  %v6489_v46 = vpop.permute.xlu0 %1889 }
 0x1ed   : > { %v1510_v38 = vmax.f32 %v6311_v52, %v1454_v17  ;;  %v1494_v47 = vadd.f32 %v1454_v17, %v6314_v26  ;;  %v8727_v52 = vmov 8  }
 0x1ee   : > { %4919 = vset.pattern.permute.xlu1 %v8702_v48  ;;  %v6479_v7 = vpop.permute.xlu1 %1738  ;;  %v6481_v42 = vpop.permute.xlu2 %1886 }
 0x1ef   : > { %2227 = vperm.xlu1 %4919, %v8724_v10   ;;  %4920 = vset.pattern.permute.xlu2 %v8702_v48 }
 0x1f0   : > { %4634 = vmatmul.msk.bf16.gmra.mxu2 %vm4633_vm13, %v8688_v55  ;;  %2230 = vperm.xlu2 %4920, %v5949_v4  }
 0x1f1   : > { %v6487_v1 = vpop.f32.mrf.mxu3 }
 0x1f2   : > { %8725 = vst [vmem:[#allocation30_spill] sm:$0xff] %v6487_v1 }
 0x1f3   : > { %v6491_v11 = vpop.f32.mrf.mxu0 }
 0x1f4   : > { %8726 = vst [vmem:[#allocation13_spill] sm:$0xff] %v6491_v11  ;;  %v6493_v63 = vpop.f32.mrf.mxu1 }
 0x1f7   : > { %4921 = vset.pattern.permute.xlu1 %v8727_v52  ;;  %v1869_v26 = vpop.permute.xlu1 %1868  ;;  %v2207_v3 = vpop.permute.xlu2 %2206 }
 0x1f8   : > { %vm1913_vm2 = vcmp.eq.s32.totalorder %v1869_v26, %v5419_v30  ;;  %1892 = vperm.xlu1 %4921, %v5949_v4   ;;  %4922 = vset.pattern.permute.xlu2 %v8705_v35  ;;  %vm2251_vm13 = vcmp.eq.s32.totalorder %v2207_v3, %v5419_v30 }
 0x1f9   : > { %vm4653_vm3 = vmpackc.low %vm1913_vm2, %vm1912_vm0  ;;  %v6504_v17 = vpop.f32.mrf.mxu3  ;;  %4644 = vmatmul.msk.bf16.gmra.mxu3 %vm4643_vm1, %v8688_v55  ;;  %2396 = vperm.xlu2 %4922, %v8724_v10   ;;  %vm1753_vm0 = vcmp.eq.s32.totalorder %v6331_v0, %v5419_v30  ;;  %vm1754_vm1 = vcmp.eq.s32.totalorder %v6444_v22, %v5419_v30  ;;  %vm1916_vm2 = vcmp.eq.s32.totalorder %v6446_v5, %v5419_v30 }
 0x1fa   : > { %v6514_v16 = vadd.f32 %v6504_v17, %v6285_v39  ;;  %4654 = vmatmul.msk.bf16.vlgmr.msra.gmra.mxu0 %vm4653_vm3, %v8688_v55  ;;  %v6531_v39 = vpop.permute.xlu0 %1895  ;;  %vm1917_vm3 = vcmp.eq.s32.totalorder %v6462_v2, %v5419_v30  ;;  %vm4647_vm4 = vmpackc.low %vm1754_vm1, %vm1753_vm0  ;;  %v8733_v5 = vmax.f32 %v6233_v40, %v6453_v62  ;;  %vm1919_vm0 = vcmp.eq.s32.totalorder %v6481_v42, %v5419_v30 }
 0x1fb   : > { %v1305_v26 = vpop.f32.mrf.mxu0  ;;  %vm4657_vm5 = vmpackc.low %vm1917_vm3, %vm1916_vm2  ;;  %vm1757_vm2 = vcmp.eq.s32.totalorder %v6479_v7, %v5419_v30 }
 0x1fc   : > { %v6524_v45 = vmax.f32 %v1180_v56, %v1305_v26  ;;  %v6527_v53 = vadd.f32 %v1305_v26, %v6345_v23  ;;  %v6529_v44 = vpop.f32.mrf.mxu1 }
 0x1fd   : > { %v6537_v43 = vadd.f32 %v6529_v44, %v6363_v19 }
 0x1ff   : > { %v1875_v57 = vpop.permute.xlu1 %1874 }
 0x200   : > { %4923 = vset.pattern.permute.xlu1 %v8707_v25  ;;  %4636 = vmatmul.msk.bf16.gmra.mxu2 %vm4635_vm6, %v8688_v55  ;;  %v6543_v21 = vpop.permute.xlu2 %2034  ;;  %vm1915_vm8 = vcmp.eq.s32.totalorder %v1875_v57, %v5419_v30  ;;  %vm2253_vm6 = vcmp.eq.s32.totalorder %v6394_v8, %v5419_v30 }
 0x201   : > { %2058 = vperm.xlu1 %4923, %v8724_v10   ;;  %4924 = vset.pattern.permute.xlu2 %v8707_v25  ;;  %vm4655_vm12 = vmpackc.low %vm1915_vm8, %vm1914_vm11  ;;  %vm2081_vm9 = vcmp.eq.s32.totalorder %v6543_v21, %v5419_v30 }
 0x202   : > { %v1623_v18 = vpop.f32.mrf.mxu2  ;;  %2061 = vperm.xlu2 %4924, %v5949_v4   ;;  %v6557_v10 = vpop.permute.xlu0 %2372  ;;  %v8730_v4 = vld [vmem:[#allocation19_spill] sm:$0xff] }
 0x203   : > { %v6546_v56 = vpop.f32.mrf.mxu0  ;;  %v6548_v23 = vmax.f32 %v1510_v38, %v1623_v18  ;;  %v6550_v19 = vadd.f32 %v1623_v18, %v1494_v47 }
 0x204   : > { %8729 = vst [vmem:[#allocation14_spill] sm:$0xff] %v6546_v56  ;;  %v6552_v26 = vpop.f32.mrf.mxu1 }
 0x207   : > { %v6561_v1 = vpop.permute.xlu1 %1883 }
 0x209   : > { %4925 = vset.pattern.permute.xlu1 %v8702_v48  ;;  %4646 = vmatmul.msk.bf16.gmra.mxu3 %vm4645_vm10, %v8688_v55 }
 0x20a   : > { %2233 = vperm.xlu1 %4925, %v8730_v4   ;;  %4656 = vmatmul.msk.bf16.gmra.mxu0 %vm4655_vm12, %v8688_v55  ;;  %v6587_v32 = vpop.permute.xlu0 %2387  ;;  %v6616_v3 = vpop.f32.mrf.mxu2  ;;  %vm1755_vm12 = vcmp.eq.s32.totalorder %v6369_v34, %v5419_v30 }
 0x20b   : > { %v1310_v59 = vpop.f32.mrf.mxu0  ;;  %4926 = vset.pattern.permute.xlu2 %v8702_v48  ;;  %v2210_v47 = vpop.permute.xlu2 %2209 }
 0x20c   : > { %v6573_v38 = vmax.f32 %v8731_v31, %v1310_v59  ;;  %v6576_v37 = vadd.f32 %v1310_v59, %v6404_v6  ;;  %v6578_v57 = vpop.f32.mrf.mxu1  ;;  %2236 = vperm.xlu2 %4926, %v6001_v49   ;;  %vm2252_vm7 = vcmp.eq.s32.totalorder %v2210_v47, %v5419_v30 }
 0x20d   : > { %v6585_v58 = vadd.f32 %v6578_v57, %v6419_v51  ;;  %vm4687_vm8 = vmpackc.low %vm2253_vm6, %vm2252_vm7  ;;  %vm1758_vm6 = vcmp.eq.s32.totalorder %v6390_v9, %v5419_v30 }
 0x20e   : > { %vm4651_vm7 = vmpackc.low %vm1758_vm6, %vm1757_vm2 }
 0x210   : > { %v2204_v56 = vpop.permute.xlu1 %2203 }
 0x211   : > { %vm2250_vm14 = vcmp.eq.s32.totalorder %v2204_v56, %v5419_v30 }
 0x212   : > { %vm4685_vm15 = vmpackc.low %vm2251_vm13, %vm2250_vm14  ;;  %4928 = vset.pattern.permute.xlu1 %v8727_v52  ;;  %v6614_v0 = vpop.permute.xlu0 %2390  ;;  %vm1756_vm13 = vcmp.eq.s32.totalorder %v6371_v50, %v5419_v30  ;;  %vm1918_vm14 = vcmp.eq.s32.totalorder %v6561_v1, %v5419_v30  ;;  %v8738_v1 = vmax.f32 %v6282_v14, %v6504_v17 }
 0x213   : > { %1898 = vperm.xlu1 %4928, %v6001_v49   ;;  %v6593_v29 = vpop.f32.mrf.mxu0  ;;  %4686 = vmatmul.msk.bf16.vlgmr.msra.gmra.mxu2 %vm4685_vm15, %v8688_v55  ;;  %vm4649_vm15 = vmpackc.low %vm1756_vm13, %vm1755_vm12 }
 0x214   : > { %8732 = vst [vmem:[#allocation19_spill] sm:$0xff] %v6593_v29  ;;  %v6596_v24 = vpop.f32.mrf.mxu1  ;;  %4929 = vset.pattern.permute.xlu2 %v8705_v35  ;;  %v6599_v6 = vpop.permute.xlu2 %2381  ;;  %vm4659_vm1 = vmpackc.low %vm1919_vm0, %vm1918_vm14 }
 0x215   : > { %2402 = vperm.xlu2 %4929, %v8730_v4  }
 0x219   : > { %v6610_v51 = vpop.permute.xlu1 %2375  ;;  %4648 = vmatmul.msk.bf16.gmra.mxu3 %vm4647_vm4, %v8688_v55 }
 0x21a   : > { %4658 = vmatmul.msk.bf16.gmra.mxu0 %vm4657_vm5, %v8688_v55  ;;  %vm2420_vm12 = vcmp.eq.s32.totalorder %v6610_v51, %v5419_v30 }
 0x21b   : > { %4930 = vset.pattern.permute.xlu1 %v8705_v35  ;;  %v1315_v22 = vpop.f32.mrf.mxu0 }
 0x21c   : > { %v6622_v56 = vmax.f32 %v8733_v5, %v1315_v22  ;;  %v6625_v2 = vadd.f32 %v1315_v22, %v6460_v41  ;;  %2405 = vperm.xlu1 %4930, %v6001_v49   ;;  %v6628_v59 = vpop.f32.mrf.mxu1  ;;  %v8735_v41 = vmax.f32 %v6360_v36, %v6529_v44  ;;  %v6664_v36 = vpop.permute.xlu0 %2399 }
 0x21d   : > { %v1516_v31 = vmax.f32 %v6471_v60, %v6628_v59  ;;  %v6634_v18 = vadd.f32 %v6628_v59, %v6474_v15  ;;  %4931 = vset.pattern.permute.xlu2 %v8707_v25  ;;  %v2044_v29 = vpop.permute.xlu2 %2043 }
 0x21e   : > { %2064 = vperm.xlu2 %4931, %v8730_v4   ;;  %v8737_v4 = vld [vmem:[#allocation21_spill] sm:$0xff]  ;;  %vm2084_vm3 = vcmp.eq.s32.totalorder %v2044_v29, %v5419_v30 }
 0x222   : > { %v2038_v49 = vpop.permute.xlu1 %2037 }
 0x223   : > { %vm2082_vm10 = vcmp.eq.s32.totalorder %v2038_v49, %v5419_v30  ;;  %v6644_v40 = vpop.f32.mrf.mxu0  ;;  %v1628_v62 = vpop.f32.mrf.mxu2  ;;  %4688 = vmatmul.msk.bf16.gmra.mxu2 %vm4687_vm8, %v8688_v55 }
 0x224   : > { %8734 = vst [vmem:[#allocation38_spill] sm:$0xff] %v6644_v40  ;;  %vm4669_vm11 = vmpackc.low %vm2082_vm10, %vm2081_vm9  ;;  %v6650_v8 = vmax.f32 %v8735_v41, %v1628_v62  ;;  %v6653_v15 = vadd.f32 %v1628_v62, %v6537_v43  ;;  %4932 = vset.pattern.permute.xlu1 %v8702_v48  ;;  %v6656_v21 = vpop.f32.mrf.mxu1  ;;  %v6672_v43 = vld [vmem:[%s5237_s15 + $0x68] sm:$0xff]  ;;  %v6701_v14 = vpop.permute.xlu0 %2408 }
 0x225   : > { %8736 = vst [vmem:[#allocation39_spill] sm:$0xff] %v6656_v21  ;;  %2239 = vperm.xlu1 %4932, %v8737_v4   ;;  %4670 = vmatmul.msk.bf16.vlgmr.msra.gmra.mxu1 %vm4669_vm11, %v8688_v55  ;;  %vm2419_vm11 = vcmp.eq.s32.totalorder %v6557_v10, %v5419_v30 }
 0x226   : > { %4933 = vset.pattern.permute.xlu2 %v8702_v48  ;;  %v6669_v44 = vpop.permute.xlu2 %2384  ;;  %vm4701_vm0 = vmpackc.low %vm2420_vm12, %vm2419_vm11 }
 0x227   : > { %2242 = vperm.xlu2 %4933, %v6672_v43  }
 0x229   : > { %4650 = vmatmul.msk.bf16.gmra.mxu3 %vm4649_vm15, %v8688_v55 }
 0x22a   : > { %4660 = vmatmul.msk.bf16.gmra.mxu0 %vm4659_vm1, %v8688_v55 }
 0x22b   : > { %v6679_v34 = vpop.permute.xlu1 %2378  ;;  %v1320_v50 = vpop.f32.mrf.mxu0 }
 0x22c   : > { %v6684_v47 = vmax.f32 %v8738_v1, %v1320_v50  ;;  %v6687_v22 = vadd.f32 %v1320_v50, %v6514_v16  ;;  %v6689_v5 = vpop.f32.mrf.mxu2  ;;  %v6691_v49 = vpop.f32.mrf.mxu1  ;;  %v8616_v16 = vmov 14   ;;  %v8739_v50 = vmax.f32 %v6416_v33, %v6578_v57 }
 0x22d   : > { %v6697_v62 = vadd.f32 %v6691_v49, %v6527_v53  ;;  %4934 = vset.pattern.permute.xlu1 %v8727_v52  ;;  %4954 = vset.pattern.permute.xlu0 %v8616_v16  ;;  %v2216_v7 = vpop.permute.xlu0 %2215  ;;  %v8618_v33 = vmov 12   ;;  %vm2421_vm6 = vcmp.eq.s32.totalorder %v6679_v34, %v5419_v30 }
 0x22e   : > { %1901 = vperm.xlu1 %4934, %v8737_v4   ;;  %2885 = vperm.xlu0 %4954, %v6082_v13   ;;  %vm2254_vm8 = vcmp.eq.s32.totalorder %v2216_v7, %v5419_v30 }
 0x22f   : > { %4935 = vset.pattern.permute.xlu2 %v8727_v52  ;;  %v2050_v17 = vpop.permute.xlu2 %2049 }
 0x230   : > { %1904 = vperm.xlu2 %4935, %v6672_v43   ;;  %vm2086_vm13 = vcmp.eq.s32.totalorder %v2050_v17, %v5419_v30 }
 0x234   : > { %v1633_v53 = vpop.f32.mrf.mxu2  ;;  %v2041_v41 = vpop.permute.xlu1 %2040 }
 0x235   : > { %v6713_v1 = vmax.f32 %v8739_v50, %v1633_v53  ;;  %v6716_v42 = vadd.f32 %v1633_v53, %v6585_v58  ;;  %vm2083_vm4 = vcmp.eq.s32.totalorder %v2041_v41, %v5419_v30  ;;  %v6719_v16 = vpop.f32.mrf.mxu1  ;;  %v6731_v58 = vld [vmem:[%s5237_s15 + $0x8] sm:$0xff]  ;;  %v6752_v50 = vld [vmem:[%s5237_s15 + $0x20] sm:$0xff]  ;;  %v6773_v60 = vpop.permute.xlu0 %2248 }
 0x236   : > { %8740 = vst [vmem:[#allocation21_spill] sm:$0xff] %v6719_v16  ;;  %vm4671_vm5 = vmpackc.low %vm2084_vm3, %vm2083_vm4  ;;  %4937 = vset.pattern.permute.xlu1 %v8705_v35  ;;  %4955 = vset.pattern.permute.xlu0 %v8618_v33 }
 0x237   : > { %2411 = vperm.xlu1 %4937, %v6672_v43   ;;  %4672 = vmatmul.msk.bf16.gmra.mxu1 %vm4671_vm5, %v8688_v55 }
 0x238   : > { %4938 = vset.pattern.permute.xlu2 %v8707_v25  ;;  %v2225_v13 = vpop.permute.xlu2 %2224  ;;  %2544 = vperm.xlu0 %4955, %v6731_v58  }
 0x239   : > { %4652 = vmatmul.msk.bf16.gmra.mxu3 %vm4651_vm7, %v8688_v55  ;;  %2070 = vperm.xlu2 %4938, %v8737_v4   ;;  %vm2257_vm1 = vcmp.eq.s32.totalorder %v2225_v13, %v5419_v30  ;;  %vm2422_vm7 = vcmp.eq.s32.totalorder %v6599_v6, %v5419_v30  ;;  %v8748_v6 = vmov 14  }
 0x23c   : > { %v6734_v9 = vpop.f32.mrf.mxu2 }
 0x23d   : > { %8741 = vst [vmem:[#allocation40_spill] sm:$0xff] %v6734_v9  ;;  %v6737_v57 = vpop.f32.mrf.mxu1  ;;  %v2219_v29 = vpop.permute.xlu1 %2218 }
 0x23e   : > { %v6743_v4 = vadd.f32 %v6737_v57, %v6576_v37  ;;  %vm2255_vm9 = vcmp.eq.s32.totalorder %v2219_v29, %v5419_v30  ;;  %v6755_v37 = vpop.f32.mrf.mxu3 }
 0x23f   : > { %vm4689_vm10 = vmpackc.low %vm2255_vm9, %vm2254_vm8  ;;  %4939 = vset.pattern.permute.xlu1 %v8707_v25  ;;  %8742 = vst [vmem:[#allocation41_spill] sm:$0xff] %v6755_v37  ;;  %v6801_v37 = vld [vmem:[%s5237_s15 + $0x18] sm:$0xff] }
 0x240   : > { %2073 = vperm.xlu1 %4939, %v6672_v43   ;;  %4690 = vmatmul.msk.bf16.gmra.mxu2 %vm4689_vm10, %v8688_v55  ;;  %vm4703_vm9 = vmpackc.low %vm2422_vm7, %vm2421_vm6  ;;  %vm2425_vm6 = vcmp.eq.s32.totalorder %v6614_v0, %v5419_v30 }
 0x241   : > { %4940 = vset.pattern.permute.xlu2 %v8702_v48  ;;  %v2053_v41 = vpop.permute.xlu2 %2052  ;;  %2553 = vperm.xlu0 %4955, %v6752_v50  }
 0x242   : > { %2245 = vperm.xlu2 %4940, %v6042_v61   ;;  %vm2087_vm4 = vcmp.eq.s32.totalorder %v2053_v41, %v5419_v30 }
 0x244   : > { %v1638_v7 = vpop.f32.mrf.mxu2 }
 0x245   : > { %v6760_v29 = vmax.f32 %v1516_v31, %v1638_v7  ;;  %v6763_v33 = vadd.f32 %v1638_v7, %v6634_v18  ;;  %v6765_v53 = vpop.f32.mrf.mxu1  ;;  %v8622_v7 = vmov 15  }
 0x246   : > { %8743 = vst [vmem:[#allocation42_spill] sm:$0xff] %v6765_v53  ;;  %v2047_v48 = vpop.permute.xlu1 %2046  ;;  %v8627_v53 = vmov 13  }
 0x247   : > { %vm2085_vm14 = vcmp.eq.s32.totalorder %v2047_v48, %v5419_v30 }
 0x248   : > { %vm4673_vm15 = vmpackc.low %vm2086_vm13, %vm2085_vm14  ;;  %4942 = vset.pattern.permute.xlu1 %v8727_v52  ;;  %vm2424_vm13 = vcmp.eq.s32.totalorder %v6587_v32, %v5419_v30  ;;  %vm2423_vm14 = vcmp.eq.s32.totalorder %v6669_v44, %v5419_v30  ;;  %v8752_v44 = vmov 15  }
 0x249   : > { %1907 = vperm.xlu1 %4942, %v6042_v61   ;;  %4674 = vmatmul.msk.bf16.gmra.mxu1 %vm4673_vm15, %v8688_v55  ;;  %vm1920_vm15 = vcmp.eq.s32.totalorder %v6489_v46, %v5419_v30 }
 0x24a   : > { %4702 = vmatmul.msk.bf16.vlgmr.msrb.gmra.mxu3 %vm4701_vm0, %v8688_v55  ;;  %4943 = vset.pattern.permute.xlu2 %v8727_v52  ;;  %v2231_v10 = vpop.permute.xlu2 %2230  ;;  %vm4705_vm0 = vmpackc.low %vm2424_vm13, %vm2423_vm14 }
 0x24b   : > { %1910 = vperm.xlu2 %4943, %v6035_v27   ;;  %4964 = vset.pattern.permute.xlu0 %v8622_v7  ;;  %v6830_v7 = vld [vmem:[%s5237_s15 + $0x30] sm:$0xff]  ;;  %vm2259_vm10 = vcmp.eq.s32.totalorder %v2231_v10, %v5419_v30  ;;  %v8750_v10 = vmov 12  }
 0x24c   : > { %v6781_v18 = vpop.f32.mrf.mxu2  ;;  %v6783_v51 = vpop.f32.mrf.mxu3  ;;  %3057 = vperm.xlu0 %4964, %v6801_v37  }
 0x24d   : > { %8744 = vst [vmem:[#allocation43_spill] sm:$0xff] %v6781_v18  ;;  %v6785_v59 = vpop.f32.mrf.mxu1  ;;  %v6791_v17 = vadd.f32 %v6783_v51, %v6550_v19  ;;  %v2056_v19 = vpop.permute.xlu0 %2055  ;;  %v6890_v18 = vld [vmem:[%s5237_s15 + $0x40] sm:$0xff] }
 0x24e   : > { %v6798_v48 = vadd.f32 %v6785_v59, %v6625_v2  ;;  %vm2088_vm5 = vcmp.eq.s32.totalorder %v2056_v19, %v5419_v30 }
 0x24f   : > { %v2222_v40 = vpop.permute.xlu1 %2221  ;;  %vm4675_vm8 = vmpackc.low %vm2088_vm5, %vm2087_vm4 }
 0x250   : > { %vm2256_vm2 = vcmp.eq.s32.totalorder %v2222_v40, %v5419_v30  ;;  %v8745_v40 = vmax.f32 %v6524_v45, %v6691_v49  ;;  %v6841_v45 = vld [vmem:[%s5237_s15 + $0x78] sm:$0xff] }
 0x251   : > { %vm4691_vm3 = vmpackc.low %vm2257_vm1, %vm2256_vm2  ;;  %4944 = vset.pattern.permute.xlu1 %v8705_v35 }
 0x252   : > { %2414 = vperm.xlu1 %4944, %v6042_v61   ;;  %4692 = vmatmul.msk.bf16.gmra.mxu2 %vm4691_vm3, %v8688_v55 }
 0x253   : > { %4945 = vset.pattern.permute.xlu2 %v8705_v35  ;;  %v6810_v2 = vpop.permute.xlu2 %2396 }
 0x254   : > { %v1643_v31 = vpop.f32.mrf.mxu2  ;;  %v6812_v52 = vpop.f32.mrf.mxu3  ;;  %2417 = vperm.xlu2 %4945, %v6035_v27   ;;  %3066 = vperm.xlu0 %4964, %v6830_v7  }
 0x255   : > { %v6820_v61 = vmax.f32 %v8745_v40, %v1643_v31  ;;  %v6823_v13 = vadd.f32 %v1643_v31, %v6697_v62  ;;  %v6825_v35 = vpop.f32.mrf.mxu1  ;;  %v8749_v40 = vmax.f32 %v6573_v38, %v6737_v57 }
 0x256   : > { %8746 = vst [vmem:[#allocation44_spill] sm:$0xff] %v6825_v35 }
 0x258   : > { %v6835_v27 = vpop.permute.xlu1 %2393 }
 0x259   : > { %4676 = vmatmul.msk.bf16.gmra.mxu1 %vm4675_vm8, %v8688_v55  ;;  %vm2426_vm7 = vcmp.eq.s32.totalorder %v6835_v27, %v5419_v30  ;;  %v6950_v27 = vld [vmem:[%s5237_s15 + $0x48] sm:$0xff] }
 0x25a   : > { %4704 = vmatmul.msk.bf16.gmra.mxu3 %vm4703_vm9, %v8688_v55  ;;  %4946 = vset.pattern.permute.xlu1 %v8707_v25  ;;  %v5111_v25 = vld [vmem:[%s5237_s15] sm:$0xff]  ;;  %vm4707_vm8 = vmpackc.low %vm2426_vm7, %vm2425_vm6 }
 0x25b   : > { %2079 = vperm.xlu1 %4946, %v6841_v45  }
 0x25c   : > { %v6844_v34 = vpop.f32.mrf.mxu2  ;;  %v6846_v49 = vpop.f32.mrf.mxu3  ;;  %4947 = vset.pattern.permute.xlu2 %v8748_v6  ;;  %4973 = vset.pattern.permute.xlu0 %v8627_v53 }
 0x25d   : > { %8747 = vst [vmem:[#allocation45_spill] sm:$0xff] %v6844_v34  ;;  %v6849_v62 = vpop.f32.mrf.mxu1  ;;  %v6855_v31 = vadd.f32 %v6846_v49, %v6653_v15  ;;  %2879 = vperm.xlu2 %4947, %v5111_v25   ;;  %v2062_v19 = vpop.permute.xlu2 %2061  ;;  %v6866_v34 = vld [vmem:[%s5237_s15 + $0x28] sm:$0xff] }
 0x25e   : > { %v6862_v35 = vadd.f32 %v6849_v62, %v6687_v22  ;;  %2725 = vperm.xlu0 %4973, %v6866_v34   ;;  %vm2090_vm3 = vcmp.eq.s32.totalorder %v2062_v19, %v5419_v30 }
 0x261   : > { %v2228_v41 = vpop.permute.xlu1 %2227 }
 0x262   : > { %vm2258_vm11 = vcmp.eq.s32.totalorder %v2228_v41, %v5419_v30 }
 0x263   : > { %vm4693_vm12 = vmpackc.low %vm2259_vm10, %vm2258_vm11  ;;  %4948 = vset.pattern.permute.xlu1 %v8748_v6 }
 0x264   : > { %v1648_v15 = vpop.f32.mrf.mxu2  ;;  %2882 = vperm.xlu1 %4948, %v6731_v58   ;;  %v6873_v22 = vpop.f32.mrf.mxu3  ;;  %4694 = vmatmul.msk.bf16.gmra.mxu2 %vm4693_vm12, %v8688_v55 }
 0x265   : > { %v6879_v53 = vmax.f32 %v8749_v40, %v1648_v15  ;;  %v6882_v16 = vadd.f32 %v1648_v15, %v6743_v4  ;;  %4949 = vset.pattern.permute.xlu2 %v8750_v10  ;;  %v6910_v40 = vpop.f32.mrf.mxu0 }
 0x266   : > { %2541 = vperm.xlu2 %4949, %v5111_v25   ;;  %v2237_v41 = vpop.permute.xlu2 %2236  ;;  %2734 = vperm.xlu0 %4973, %v6890_v18   ;;  %8753 = vst [vmem:[#allocation47_spill] sm:$0xff] %v6910_v40  ;;  %v8755_v40 = vmax.f32 %v6622_v56, %v6785_v59  ;;  %v8757_v56 = vmax.f32 %v6548_v23, %v6783_v51  ;;  %v2068_v51 = vpop.permute.xlu0 %2067 }
 0x267   : > { %vm2261_vm9 = vcmp.eq.s32.totalorder %v2237_v41, %v5419_v30  ;;  %vm2092_vm13 = vcmp.eq.s32.totalorder %v2068_v51, %v5419_v30  ;;  %v5116_v41 = vld [vmem:[%s5237_s15 + $0x10] sm:$0xff] }
 0x26a   : > { %4706 = vmatmul.msk.bf16.gmra.mxu3 %vm4705_vm0, %v8688_v55  ;;  %v1893_v38 = vpop.permute.xlu1 %1892  ;;  %vm2428_vm0 = vcmp.eq.s32.totalorder %v6664_v36, %v5419_v30 }
 0x26b   : > { %vm1921_vm1 = vcmp.eq.s32.totalorder %v1893_v38, %v5419_v30  ;;  %v6917_v38 = vld [vmem:[%s5237_s15 + $0x58] sm:$0xff] }
 0x26c   : > { %vm4661_vm2 = vmpackc.low %vm1921_vm1, %vm1920_vm15  ;;  %v6897_v32 = vpop.f32.mrf.mxu2  ;;  %4950 = vset.pattern.permute.xlu1 %v8752_v44  ;;  %v6900_v57 = vpop.f32.mrf.mxu3  ;;  %vm1922_vm15 = vcmp.eq.s32.totalorder %v6531_v39, %v5419_v30  ;;  %vm2427_vm1 = vcmp.eq.s32.totalorder %v6810_v2, %v5419_v30 }
 0x26d   : > { %8751 = vst [vmem:[#allocation46_spill] sm:$0xff] %v6897_v32  ;;  %v6906_v46 = vadd.f32 %v6900_v57, %v6716_v42  ;;  %3048 = vperm.xlu1 %4950, %v5111_v25   ;;  %4662 = vmatmul.msk.bf16.gmra.mxu0 %vm4661_vm2, %v8688_v55 }
 0x26e   : > { %4951 = vset.pattern.permute.xlu2 %v8752_v44  ;;  %4986 = vset.pattern.permute.xlu0 %v8750_v10 }
 0x26f   : > { %3051 = vperm.xlu2 %4951, %v6731_v58   ;;  %v6913_v15 = vpop.permute.xlu2 %2402  ;;  %2574 = vperm.xlu0 %4986, %v6917_v38  }
 0x270   : > { %vm2429_vm6 = vcmp.eq.s32.totalorder %v6913_v15, %v5419_v30  ;;  %v7051_v15 = vpop.f32.mrf.mxu1 }
 0x271   : > { %8765 = vst [vmem:[#allocation53_spill] sm:$0xff] %v7051_v15 }
 0x273   : > { %v2059_v4 = vpop.permute.xlu1 %2058 }
 0x274   : > { %vm2089_vm4 = vcmp.eq.s32.totalorder %v2059_v4, %v5419_v30  ;;  %v1653_v42 = vpop.f32.mrf.mxu2  ;;  %v6922_v32 = vpop.f32.mrf.mxu3 }
 0x275   : > { %8754 = vst [vmem:[#allocation48_spill] sm:$0xff] %v6922_v32  ;;  %vm4677_vm5 = vmpackc.low %vm2090_vm3, %vm2089_vm4  ;;  %v6927_v21 = vmax.f32 %v8755_v40, %v1653_v42  ;;  %v6930_v11 = vadd.f32 %v1653_v42, %v6798_v48  ;;  %4952 = vset.pattern.permute.xlu1 %v8756_v20 }
 0x276   : > { %2710 = vperm.xlu1 %4952, %v5111_v25   ;;  %4678 = vmatmul.msk.bf16.gmra.mxu1 %vm4677_vm5, %v8688_v55  ;;  %vm4709_vm4 = vmpackc.low %vm2428_vm0, %vm2427_vm1  ;;  %vm2431_vm1 = vcmp.eq.s32.totalorder %v6701_v14, %v5419_v30 }
 0x277   : > { %v1961_v19 = vpop.f32.mrf.mxu0  ;;  %4953 = vset.pattern.permute.xlu2 %v8756_v20  ;;  %4987 = vset.pattern.permute.xlu0 %v8748_v6 }
 0x278   : > { %v6942_v59 = vmax.f32 %v8757_v56, %v1961_v19  ;;  %v6945_v48 = vadd.f32 %v1961_v19, %v6791_v17  ;;  %2713 = vperm.xlu2 %4953, %v6731_v58   ;;  %v2065_v0 = vpop.permute.xlu2 %2064  ;;  %2906 = vperm.xlu0 %4987, %v6950_v27   ;;  %v6976_v19 = vld [vmem:[%s5237_s15 + $0x60] sm:$0xff]  ;;  %v8759_v56 = vmax.f32 %v6684_v47, %v6849_v62 }
 0x279   : > { %vm2091_vm12 = vcmp.eq.s32.totalorder %v2065_v0, %v5419_v30 }
 0x27a   : > { %4708 = vmatmul.msk.bf16.gmra.mxu3 %vm4707_vm8, %v8688_v55  ;;  %vm4679_vm14 = vmpackc.low %vm2092_vm13, %vm2091_vm12 }
 0x27c   : > { %v6954_v25 = vpop.f32.mrf.mxu2  ;;  %v2234_v23 = vpop.permute.xlu1 %2233 }
 0x27d   : > { %8758 = vst [vmem:[#allocation49_spill] sm:$0xff] %v6954_v25  ;;  %vm2260_vm10 = vcmp.eq.s32.totalorder %v2234_v23, %v5419_v30  ;;  %v6958_v58 = vpop.f32.mrf.mxu3 }
 0x27e   : > { %vm4695_vm11 = vmpackc.low %vm2261_vm9, %vm2260_vm10  ;;  %v6964_v4 = vadd.f32 %v6958_v58, %v6763_v33  ;;  %4956 = vset.pattern.permute.xlu1 %v8748_v6 }
 0x27f   : > { %2888 = vperm.xlu1 %4956, %v6801_v37   ;;  %v6968_v40 = vpop.f32.mrf.mxu0  ;;  %4696 = vmatmul.msk.bf16.gmra.mxu2 %vm4695_vm11, %v8688_v55 }
 0x280   : > { %4957 = vset.pattern.permute.xlu2 %v8750_v10  ;;  %2915 = vperm.xlu0 %4987, %v6976_v19  }
 0x281   : > { %2547 = vperm.xlu2 %4957, %v5116_v41   ;;  %v2243_v42 = vpop.permute.xlu2 %2242 }
 0x282   : > { %vm2263_vm7 = vcmp.eq.s32.totalorder %v2243_v42, %v5419_v30 }
 0x284   : > { %v1658_v33 = vpop.f32.mrf.mxu2 }
 0x285   : > { %v6982_v23 = vmax.f32 %v8759_v56, %v1658_v33  ;;  %v6985_v0 = vadd.f32 %v1658_v33, %v6862_v35  ;;  %v6987_v51 = vpop.f32.mrf.mxu3  ;;  %v1899_v17 = vpop.permute.xlu1 %1898  ;;  %v8761_v35 = vmax.f32 %v6650_v8, %v6846_v49 }
 0x286   : > { %8760 = vst [vmem:[#allocation50_spill] sm:$0xff] %v6987_v51  ;;  %vm1923_vm2 = vcmp.eq.s32.totalorder %v1899_v17, %v5419_v30  ;;  %4680 = vmatmul.msk.bf16.gmra.mxu1 %vm4679_vm14, %v8688_v55  ;;  %vm2265_vm14 = vcmp.eq.s32.totalorder %v6773_v60, %v5419_v30 }
 0x287   : > { %vm4663_vm3 = vmpackc.low %vm1923_vm2, %vm1922_vm15  ;;  %4958 = vset.pattern.permute.xlu1 %v8750_v10  ;;  %v1966_v47 = vpop.f32.mrf.mxu0 }
 0x288   : > { %v7001_v62 = vmax.f32 %v8761_v35, %v1966_v47  ;;  %v7004_v39 = vadd.f32 %v1966_v47, %v6855_v31  ;;  %2550 = vperm.xlu1 %4958, %v6801_v37   ;;  %4664 = vmatmul.msk.bf16.gmra.mxu0 %vm4663_vm3, %v8688_v55  ;;  %v7031_v47 = vld [vmem:[%s5237_s15 + $0x70] sm:$0xff] }
 0x289   : > { %4959 = vset.pattern.permute.xlu2 %v8752_v44  ;;  %4996 = vset.pattern.permute.xlu0 %v8752_v44 }
 0x28a   : > { %4710 = vmatmul.msk.bf16.gmra.mxu3 %vm4709_vm4, %v8688_v55  ;;  %3054 = vperm.xlu2 %4959, %v5116_v41   ;;  %v1905_v36 = vpop.permute.xlu2 %1904 }
 0x28b   : > { %3087 = vperm.xlu0 %4996, %v6672_v43   ;;  %vm1925_vm11 = vcmp.eq.s32.totalorder %v1905_v36, %v5419_v30 }
 0x28c   : > { %v7014_v2 = vpop.f32.mrf.mxu2 }
 0x28d   : > { %v7012_v8 = vpop.f32.mrf.mxu3  ;;  %8762 = vst [vmem:[#allocation51_spill] sm:$0xff] %v7014_v2  ;;  %v8764_v2 = vmax.f32 %v6713_v1, %v6900_v57 }
 0x28e   : > { %v7020_v31 = vadd.f32 %v7012_v8, %v6823_v13  ;;  %v2406_v17 = vpop.permute.xlu1 %2405 }
 0x28f   : > { %v7022_v33 = vpop.f32.mrf.mxu0  ;;  %vm2430_vm5 = vcmp.eq.s32.totalorder %v2406_v17, %v5419_v30 }
 0x290   : > { %4960 = vset.pattern.permute.xlu1 %v8756_v20  ;;  %vm4711_vm8 = vmpackc.low %vm2430_vm5, %vm2429_vm6 }
 0x291   : > { %2716 = vperm.xlu1 %4960, %v5116_v41  }
 0x292   : > { %4961 = vset.pattern.permute.xlu2 %v8756_v20 }
 0x293   : > { %2719 = vperm.xlu2 %4961, %v6801_v37   ;;  %v7027_v56 = vpop.permute.xlu2 %2070  ;;  %5001 = vset.pattern.permute.xlu0 %v8750_v10 }
 0x294   : > { %2583 = vperm.xlu0 %5001, %v7031_v47   ;;  %vm2093_vm4 = vcmp.eq.s32.totalorder %v7027_v56, %v5419_v30 }
 0x295   : > { %v7035_v13 = vpop.f32.mrf.mxu3 }
 0x296   : > { %8763 = vst [vmem:[#allocation52_spill] sm:$0xff] %v7035_v13  ;;  %v2299_v35 = vpop.f32.mrf.mxu2  ;;  %v8768_v13 = vmax.f32 %v6760_v29, %v6958_v58 }
 0x297   : > { %v2186_v41 = vmax.f32 %v6942_v59, %v2299_v35  ;;  %v2240_v49 = vpop.permute.xlu1 %2239  ;;  %v1971_v37 = vpop.f32.mrf.mxu0 }
 0x298   : > { %vm2262_vm9 = vcmp.eq.s32.totalorder %v2240_v49, %v5419_v30  ;;  %v7045_v25 = vmax.f32 %v8764_v2, %v1971_v37  ;;  %v7048_v17 = vadd.f32 %v1971_v37, %v6906_v46 }
 0x299   : > { %vm4697_vm10 = vmpackc.low %vm2263_vm7, %vm2262_vm9  ;;  %4962 = vset.pattern.permute.xlu1 %v8748_v6 }
 0x29a   : > { %4712 = vmatmul.msk.bf16.gmra.mxu3 %vm4711_vm8, %v8688_v55  ;;  %2891 = vperm.xlu1 %4962, %v6752_v50  }
 0x29b   : > { %4698 = vmatmul.msk.bf16.gmra.mxu2 %vm4697_vm10, %v8688_v55  ;;  %4963 = vset.pattern.permute.xlu2 %v8748_v6 }
 0x29c   : > { %2894 = vperm.xlu2 %4963, %v6866_v34   ;;  %5006 = vset.pattern.permute.xlu0 %v8756_v20  ;;  %v2246_v57 = vpop.permute.xlu2 %2245 }
 0x29d   : > { %v7059_v1 = vpop.f32.mrf.mxu3  ;;  %2755 = vperm.xlu0 %5006, %v6841_v45   ;;  %vm2264_vm15 = vcmp.eq.s32.totalorder %v2246_v57, %v5419_v30 }
 0x29e   : > { %v7066_v59 = vadd.f32 %v7059_v1, %v6882_v16  ;;  %v7068_v42 = vpop.f32.mrf.mxu2  ;;  %vm4699_vm0 = vmpackc.low %vm2265_vm14, %vm2264_vm15 }
 0x29f   : > { %v7070_v2 = vpop.f32.mrf.mxu0 }
 0x2a0   : > { %8766 = vst [vmem:[#allocation54_spill] sm:$0xff] %v7070_v2  ;;  %v1902_v49 = vpop.permute.xlu1 %1901 }
 0x2a1   : > { %vm1924_vm12 = vcmp.eq.s32.totalorder %v1902_v49, %v5419_v30 }
 0x2a2   : > { %vm4665_vm13 = vmpackc.low %vm1925_vm11, %vm1924_vm12  ;;  %4965 = vset.pattern.permute.xlu1 %v8750_v10  ;;  %v2130_v37 = vpop.f32.mrf.mxu1 }
 0x2a3   : > { %v7075_v15 = vmax.f32 %v2186_v41, %v2130_v37  ;;  %v2170_v46 = vadd.f32 %v2130_v37, %v6945_v48  ;;  %2556 = vperm.xlu1 %4965, %v6866_v34   ;;  %4666 = vmatmul.msk.bf16.gmra.mxu0 %vm4665_vm13, %v8688_v55 }
 0x2a4   : > { %4966 = vset.pattern.permute.xlu2 %v8752_v44 }
 0x2a5   : > { %v7083_v16 = vpop.f32.mrf.mxu3  ;;  %3060 = vperm.xlu2 %4966, %v6752_v50   ;;  %v1911_v36 = vpop.permute.xlu2 %1910  ;;  %v7087_v41 = vadd.f32 %v2299_v35, %v2170_v46  ;;  %5007 = vset.pattern.permute.xlu0 %v8752_v44 }
 0x2a6   : > { %8767 = vst [vmem:[#allocation55_spill] sm:$0xff] %v7083_v16  ;;  %v2304_v48 = vpop.f32.mrf.mxu2  ;;  %vm1927_vm7 = vcmp.eq.s32.totalorder %v1911_v36, %v5419_v30 }
 0x2a7   : > { %v2188_v49 = vmax.f32 %v7001_v62, %v2304_v48  ;;  %v1976_v37 = vpop.f32.mrf.mxu0 }
 0x2a8   : > { %v7094_v60 = vmax.f32 %v8768_v13, %v1976_v37  ;;  %v7097_v16 = vadd.f32 %v1976_v37, %v6964_v4  ;;  %v7118_v13 = vpop.permute.xlu0 %2076 }
 0x2a9   : > { %v2412_v57 = vpop.permute.xlu1 %2411 }
 0x2aa   : > { %vm2432_vm2 = vcmp.eq.s32.totalorder %v2412_v57, %v5419_v30  ;;  %v7104_v62 = vpop.f32.mrf.mxu1 }
 0x2ab   : > { %vm4713_vm3 = vmpackc.low %vm2432_vm2, %vm2431_vm1  ;;  %4700 = vmatmul.msk.bf16.gmra.mxu2 %vm4699_vm0, %v8688_v55  ;;  %4967 = vset.pattern.permute.xlu1 %v8752_v44  ;;  %vm2095_vm0 = vcmp.eq.s32.totalorder %v7118_v13, %v5419_v30 }
 0x2ac   : > { %3063 = vperm.xlu1 %4967, %v6866_v34   ;;  %4714 = vmatmul.msk.bf16.gmra.mxu3 %vm4713_vm3, %v8688_v55 }
 0x2ad   : > { %v7108_v29 = vpop.f32.mrf.mxu3  ;;  %4968 = vset.pattern.permute.xlu2 %v8756_v20 }
 0x2ae   : > { %v7115_v58 = vadd.f32 %v7108_v29, %v6930_v11  ;;  %2722 = vperm.xlu2 %4968, %v6752_v50   ;;  %v2418_v4 = vpop.permute.xlu2 %2417  ;;  %v5119_v50 = vld [vmem:[%s5237_s15 + $0x38] sm:$0xff]  ;;  %v7139_v14 = vpop.f32.mrf.mxu2 }
 0x2af   : > { %vm2434_vm10 = vcmp.eq.s32.totalorder %v2418_v4, %v5419_v30 }
 0x2b2   : > { %v2074_v34 = vpop.permute.xlu1 %2073 }
 0x2b3   : > { %vm2094_vm5 = vcmp.eq.s32.totalorder %v2074_v34, %v5419_v30  ;;  %v7137_v34 = vpop.permute.xlu0 %2885 }
 0x2b4   : > { %vm4681_vm6 = vmpackc.low %vm2094_vm5, %vm2093_vm4  ;;  %4969 = vset.pattern.permute.xlu1 %v8748_v6  ;;  %v2135_v35 = vpop.f32.mrf.mxu1 }
 0x2b5   : > { %v7124_v46 = vpop.f32.mrf.mxu3  ;;  %v7126_v11 = vmax.f32 %v2188_v49, %v2135_v35  ;;  %v2172_v37 = vadd.f32 %v2135_v35, %v7004_v39  ;;  %2897 = vperm.xlu1 %4969, %v6830_v7   ;;  %4682 = vmatmul.msk.bf16.gmra.mxu1 %vm4681_vm6, %v8688_v55 }
 0x2b6   : > { %8769 = vst [vmem:[#allocation56_spill] sm:$0xff] %v7124_v46  ;;  %4970 = vset.pattern.permute.xlu2 %v8748_v6 }
 0x2b7   : > { %2900 = vperm.xlu2 %4970, %v5119_v50   ;;  %v7133_v56 = vpop.permute.xlu2 %2879  ;;  %v7135_v57 = vadd.f32 %v2304_v48, %v2172_v37 }
 0x2b8   : > { %vm2926_vm3 = vcmp.eq.s32.totalorder %v7133_v56, %v5419_v30 }
 0x2bb   : > { %v1908_v49 = vpop.permute.xlu1 %1907  ;;  %v2545_v35 = vpop.permute.xlu0 %2544 }
 0x2bc   : > { %vm1926_vm8 = vcmp.eq.s32.totalorder %v1908_v49, %v5419_v30  ;;  %v7152_v37 = vpop.f32.mrf.mxu1  ;;  %vm2589_vm14 = vcmp.eq.s32.totalorder %v2545_v35, %v5419_v30 }
 0x2bd   : > { %vm4667_vm9 = vmpackc.low %vm1927_vm7, %vm1926_vm8  ;;  %v7143_v39 = vpop.f32.mrf.mxu3  ;;  %4971 = vset.pattern.permute.xlu1 %v8750_v10 }
 0x2be   : > { %v7150_v48 = vadd.f32 %v7143_v39, %v6985_v0  ;;  %2559 = vperm.xlu1 %4971, %v6830_v7   ;;  %4668 = vmatmul.msk.bf16.gmra.mxu0 %vm4667_vm9, %v8688_v55 }
 0x2bf   : > { %4972 = vset.pattern.permute.xlu2 %v8750_v10 }
 0x2c0   : > { %2562 = vperm.xlu2 %4972, %v5119_v50   ;;  %v2542_v36 = vpop.permute.xlu2 %2541 }
 0x2c1   : > { %vm2588_vm13 = vcmp.eq.s32.totalorder %v2542_v36, %v5419_v30 }
 0x2c2   : > { %vm4717_vm15 = vmpackc.low %vm2589_vm14, %vm2588_vm13 }
 0x2c3   : > { %v2309_v49 = vpop.f32.mrf.mxu2 }
 0x2c4   : > { %v2190_v46 = vmax.f32 %v7045_v25, %v2309_v49  ;;  %v2415_v51 = vpop.permute.xlu1 %2414 }
 0x2c5   : > { %vm2433_vm11 = vcmp.eq.s32.totalorder %v2415_v51, %v5419_v30  ;;  %v7160_v0 = vpop.f32.mrf.mxu3 }
 0x2c6   : > { %8770 = vst [vmem:[#allocation57_spill] sm:$0xff] %v7160_v0  ;;  %vm4715_vm12 = vmpackc.low %vm2434_vm10, %vm2433_vm11  ;;  %4974 = vset.pattern.permute.xlu1 %v8752_v44  ;;  %v2140_v2 = vpop.f32.mrf.mxu1 }
 0x2c7   : > { %v7163_v32 = vmax.f32 %v2190_v46, %v2140_v2  ;;  %v2174_v9 = vadd.f32 %v2140_v2, %v7048_v17  ;;  %3069 = vperm.xlu1 %4974, %v5119_v50   ;;  %4716 = vmatmul.msk.bf16.gmra.mxu3 %vm4715_vm12, %v8688_v55 }
 0x2c8   : > { %4975 = vset.pattern.permute.xlu2 %v8756_v20 }
 0x2c9   : > { %8771 = vst [vmem:[#allocation58_spill] sm:$0xff] %v7163_v32  ;;  %2728 = vperm.xlu2 %4975, %v6830_v7   ;;  %v3052_v25 = vpop.permute.xlu2 %3051  ;;  %v7171_v51 = vadd.f32 %v2309_v49, %v2174_v9 }
 0x2ca   : > { %vm3096_vm6 = vcmp.eq.s32.totalorder %v3052_v25, %v5419_v30 }
 0x2cb   : > { %v7175_v4 = vpop.f32.mrf.mxu2 }
 0x2cc   : > { %8772 = vst [vmem:[#allocation59_spill] sm:$0xff] %v7175_v4 }
 0x2cd   : > { %v7177_v17 = vpop.f32.mrf.mxu3  ;;  %v2080_v2 = vpop.permute.xlu1 %2079 }
 0x2ce   : > { %v7183_v35 = vadd.f32 %v7177_v17, %v7087_v41  ;;  %vm2096_vm1 = vcmp.eq.s32.totalorder %v2080_v2, %v5419_v30  ;;  %v7186_v9 = vpop.f32.mrf.mxu1  ;;  %4718 = vmatmul.msk.bf16.vlgmr.msrb.gmra.mxu0 %vm4717_vm15, %v8688_v55  ;;  %vm2928_vm15 = vcmp.eq.s32.totalorder %v7137_v34, %v5419_v30 }
 0x2cf   : > { %8773 = vst [vmem:[#allocation60_spill] sm:$0xff] %v7186_v9  ;;  %vm4683_vm2 = vmpackc.low %vm2096_vm1, %vm2095_vm0  ;;  %4976 = vset.pattern.permute.xlu1 %v8756_v20 }
 0x2d0   : > { %2731 = vperm.xlu1 %4976, %v5119_v50   ;;  %4684 = vmatmul.msk.bf16.gmra.mxu1 %vm4683_vm2, %v8688_v55 }
 0x2d1   : > { %4977 = vset.pattern.permute.xlu2 %v8748_v6 }
 0x2d2   : > { %2903 = vperm.xlu2 %4977, %v6890_v18   ;;  %v2714_v7 = vpop.permute.xlu2 %2713 }
 0x2d3   : > { %vm2758_vm9 = vcmp.eq.s32.totalorder %v2714_v7, %v5419_v30 }
 0x2d5   : > { %v7193_v13 = vpop.f32.mrf.mxu3  ;;  %v2314_v41 = vpop.f32.mrf.mxu2 }
 0x2d6   : > { %v2192_v36 = vmax.f32 %v7094_v60, %v2314_v41  ;;  %v2883_v49 = vpop.permute.xlu1 %2882  ;;  %v2145_v2 = vpop.f32.mrf.mxu1 }
 0x2d7   : > { %vm2927_vm4 = vcmp.eq.s32.totalorder %v2883_v49, %v5419_v30  ;;  %v2176_v50 = vadd.f32 %v2145_v2, %v7097_v16 }
 0x2d8   : > { %vm4749_vm5 = vmpackc.low %vm2927_vm4, %vm2926_vm3  ;;  %v7200_v46 = vmax.f32 %v2192_v36, %v2145_v2  ;;  %4978 = vset.pattern.permute.xlu1 %v8750_v10  ;;  %v7215_v2 = vpop.permute.xlu0 %2553 }
 0x2d9   : > { %2565 = vperm.xlu1 %4978, %v6890_v18   ;;  %4750 = vmatmul.msk.bf16.vlgmr.msrb.gmra.mxu2 %vm4749_vm5, %v8688_v55  ;;  %v2345_v0 = vadd.f32 %v2314_v41, %v2176_v50 }
 0x2da   : > { %8774 = vst [vmem:[#allocation61_spill] sm:$0xff] %v7200_v46  ;;  %4979 = vset.pattern.permute.xlu2 %v8750_v10 }
 0x2db   : > { %2568 = vperm.xlu2 %4979, %v6950_v27   ;;  %v2548_v60 = vpop.permute.xlu2 %2547 }
 0x2dc   : > { %vm2590_vm2 = vcmp.eq.s32.totalorder %v2548_v60, %v5419_v30 }
 0x2dd   : > { %v7207_v56 = vpop.f32.mrf.mxu3 }
 0x2de   : > { %v7213_v36 = vadd.f32 %v7207_v56, %v7135_v57 }
 0x2df   : > { %v3049_v49 = vpop.permute.xlu1 %3048 }
 0x2e0   : > { %vm3095_vm7 = vcmp.eq.s32.totalorder %v3049_v49, %v5419_v30  ;;  %v3058_v25 = vpop.permute.xlu0 %3057  ;;  %v5120_v49 = vld [vmem:[%s5237_s15 + $0x50] sm:$0xff] }
 0x2e1   : > { %vm4765_vm8 = vmpackc.low %vm3096_vm6, %vm3095_vm7  ;;  %4980 = vset.pattern.permute.xlu1 %v8752_v44  ;;  %vm3098_vm13 = vcmp.eq.s32.totalorder %v3058_v25, %v5419_v30  ;;  %v7255_v25 = vpop.f32.mrf.mxu0 }
 0x2e2   : > { %3072 = vperm.xlu1 %4980, %v6890_v18   ;;  %4766 = vmatmul.msk.bf16.vlgmr.msra.gmra.mxu3 %vm4765_vm8, %v8688_v55  ;;  %8779 = vst [vmem:[#allocation66_spill] sm:$0xff] %v7255_v25 }
 0x2e3   : > { %4981 = vset.pattern.permute.xlu2 %v8752_v44 }
 0x2e4   : > { %3075 = vperm.xlu2 %4981, %v6950_v27   ;;  %v3055_v41 = vpop.permute.xlu2 %3054 }
 0x2e5   : > { %v7224_v57 = vpop.f32.mrf.mxu3  ;;  %vm3097_vm12 = vcmp.eq.s32.totalorder %v3055_v41, %v5419_v30 }
 0x2e6   : > { %vm4767_vm14 = vmpackc.low %vm3098_vm13, %vm3097_vm12 }
 0x2e8   : > { %v2711_v50 = vpop.permute.xlu1 %2710  ;;  %v7274_v4 = vpop.permute.xlu0 %3066 }
 0x2e9   : > { %vm2757_vm10 = vcmp.eq.s32.totalorder %v2711_v50, %v5419_v30 }
 0x2ea   : > { %vm4733_vm11 = vmpackc.low %vm2758_vm9, %vm2757_vm10  ;;  %4982 = vset.pattern.permute.xlu1 %v8756_v20  ;;  %v1981_v60 = vpop.f32.mrf.mxu0 }
 0x2eb   : > { %2737 = vperm.xlu1 %4982, %v6950_v27   ;;  %4734 = vmatmul.msk.bf16.vlgmr.msrb.gmra.mxu1 %vm4733_vm11, %v8688_v55  ;;  %v2009_v46 = vadd.f32 %v1981_v60, %v7020_v31 }
 0x2ec   : > { %4983 = vset.pattern.permute.xlu2 %v8748_v6 }
 0x2ed   : > { %v7234_v18 = vpop.f32.mrf.mxu3  ;;  %2909 = vperm.xlu2 %4983, %v5120_v49   ;;  %v2720_v7 = vpop.permute.xlu2 %2719 }
 0x2ee   : > { %8775 = vst [vmem:[#allocation62_spill] sm:$0xff] %v7234_v18  ;;  %v7241_v16 = vadd.f32 %v7234_v18, %v7171_v51  ;;  %v7253_v51 = vpop.f32.mrf.mxu2  ;;  %vm2760_vm5 = vcmp.eq.s32.totalorder %v2720_v7, %v5419_v30 }
 0x2ef   : > { %8778 = vst [vmem:[#allocation65_spill] sm:$0xff] %v7253_v51 }
 0x2f0   : > { %8776 = vst [vmem:[#allocation63_spill] sm:$0xff] %v7241_v16 }
 0x2f1   : > { %v2889_v27 = vpop.permute.xlu1 %2888 }
 0x2f2   : > { %vm2929_vm0 = vcmp.eq.s32.totalorder %v2889_v27, %v5419_v30  ;;  %4768 = vmatmul.msk.bf16.gmra.mxu3 %vm4767_vm14, %v8688_v55  ;;  %v7257_v27 = vpop.f32.mrf.mxu1  ;;  %vm2592_vm14 = vcmp.eq.s32.totalorder %v7215_v2, %v5419_v30  ;;  %v5121_v2 = vld [vmem:[%s5237_s15 + $0x68] sm:$0xff] }
 0x2f3   : > { %vm4751_vm1 = vmpackc.low %vm2929_vm0, %vm2928_vm15  ;;  %4984 = vset.pattern.permute.xlu1 %v8748_v6  ;;  %8780 = vst [vmem:[#allocation67_spill] sm:$0xff] %v7257_v27 }
 0x2f4   : > { %2912 = vperm.xlu1 %4984, %v6917_v38   ;;  %4752 = vmatmul.msk.bf16.gmra.mxu2 %vm4751_vm1, %v8688_v55 }
 0x2f5   : > { %v7249_v41 = vpop.f32.mrf.mxu3  ;;  %4985 = vset.pattern.permute.xlu2 %v8750_v10 }
 0x2f6   : > { %8777 = vst [vmem:[#allocation64_spill] sm:$0xff] %v7249_v41  ;;  %2571 = vperm.xlu2 %4985, %v5120_v49   ;;  %v2895_v34 = vpop.permute.xlu2 %2894  ;;  %v2319_v51 = vpop.f32.mrf.mxu2 }
 0x2f7   : > { %vm2931_vm8 = vcmp.eq.s32.totalorder %v2895_v34, %v5419_v30 }
 0x2fa   : > { %v2551_v50 = vpop.permute.xlu1 %2550  ;;  %v2150_v27 = vpop.f32.mrf.mxu1 }
 0x2fb   : > { %vm2591_vm3 = vcmp.eq.s32.totalorder %v2551_v50, %v5419_v30  ;;  %v2178_v7 = vadd.f32 %v2150_v27, %v2009_v46 }
 0x2fc   : > { %vm4719_vm4 = vmpackc.low %vm2591_vm3, %vm2590_vm2  ;;  %4988 = vset.pattern.permute.xlu1 %v8752_v44 }
 0x2fd   : > { %v7262_v18 = vpop.f32.mrf.mxu3  ;;  %3078 = vperm.xlu1 %4988, %v5120_v49   ;;  %4720 = vmatmul.msk.bf16.gmra.mxu0 %vm4719_vm4, %v8688_v55  ;;  %v2347_v31 = vadd.f32 %v2319_v51, %v2178_v7 }
 0x2fe   : > { %8781 = vst [vmem:[#allocation68_spill] sm:$0xff] %v7262_v18  ;;  %v7268_v25 = vadd.f32 %v7262_v18, %v2345_v0  ;;  %4989 = vset.pattern.permute.xlu2 %v8752_v44  ;;  %v8784_v0 = vmax.f32 %v6820_v61, %v7012_v8 }
 0x2ff   : > { %3081 = vperm.xlu2 %4989, %v6917_v38   ;;  %v7272_v50 = vpop.permute.xlu2 %3060 }
 0x300   : > { %8782 = vst [vmem:[#allocation69_spill] sm:$0xff] %v7268_v25  ;;  %v2025_v18 = vmax.f32 %v8784_v0, %v2319_v51  ;;  %v7287_v25 = vpop.f32.mrf.mxu2  ;;  %v2726_v0 = vpop.permute.xlu0 %2725  ;;  %vm3099_vm1 = vcmp.eq.s32.totalorder %v7272_v50, %v5419_v30  ;;  %v3246_v50 = vld [vmem:[%s8552_s3 + $0x30] sm:$0xff] }
 0x301   : > { %vm2762_vm12 = vcmp.eq.s32.totalorder %v2726_v0, %v5419_v30 }
 0x302   : > { %v2194_v16 = vmax.f32 %v2025_v18, %v1981_v60  ;;  %v7292_v9 = vpop.f32.mrf.mxu1 }
 0x303   : > { %v2717_v41 = vpop.permute.xlu1 %2716 }
 0x304   : > { %vm2759_vm6 = vcmp.eq.s32.totalorder %v2717_v41, %v5419_v30  ;;  %v7290_v41 = vpop.f32.mrf.mxu0  ;;  %v7294_v61 = vmax.f32 %v2194_v16, %v2150_v27 }
 0x305   : > { %vm4735_vm7 = vmpackc.low %vm2760_vm5, %vm2759_vm6  ;;  %v7278_v32 = vpop.f32.mrf.mxu3  ;;  %4990 = vset.pattern.permute.xlu1 %v8756_v20 }
 0x306   : > { %8783 = vst [vmem:[#allocation70_spill] sm:$0xff] %v7278_v32  ;;  %2740 = vperm.xlu1 %4990, %v5120_v49   ;;  %4736 = vmatmul.msk.bf16.gmra.mxu1 %vm4735_vm7, %v8688_v55 }
 0x307   : > { %4991 = vset.pattern.permute.xlu2 %v8756_v20 }
 0x308   : > { %2743 = vperm.xlu2 %4991, %v6917_v38   ;;  %v2723_v32 = vpop.permute.xlu2 %2722  ;;  %v2324_v16 = vpop.f32.mrf.mxu2 }
 0x309   : > { %vm2761_vm11 = vcmp.eq.s32.totalorder %v2723_v32, %v5419_v30 }
 0x30a   : > { %vm4737_vm13 = vmpackc.low %vm2762_vm12, %vm2761_vm11  ;;  %v2155_v27 = vpop.f32.mrf.mxu1 }
 0x30c   : > { %v2892_v8 = vpop.permute.xlu1 %2891  ;;  %v1986_v18 = vpop.f32.mrf.mxu0 }
 0x30d   : > { %vm2930_vm9 = vcmp.eq.s32.totalorder %v2892_v8, %v5419_v30  ;;  %v7298_v49 = vpop.f32.mrf.mxu3  ;;  %v2011_v32 = vadd.f32 %v1986_v18, %v7066_v59 }
 0x30e   : > { %vm4753_vm10 = vmpackc.low %vm2931_vm8, %vm2930_vm9  ;;  %v7303_v46 = vadd.f32 %v7298_v49, %v2347_v31  ;;  %4992 = vset.pattern.permute.xlu1 %v8748_v6 }
 0x30f   : > { %2918 = vperm.xlu1 %4992, %v6672_v43   ;;  %4754 = vmatmul.msk.bf16.gmra.mxu2 %vm4753_vm10, %v8688_v55  ;;  %v8785_v43 = vmax.f32 %v6879_v53, %v7059_v1  ;;  %v2180_v31 = vadd.f32 %v2155_v27, %v2011_v32  ;;  %v3247_v53 = vld [vmem:[%s8552_s3 + $0x38] sm:$0xff] }
 0x310   : > { %4993 = vset.pattern.permute.xlu2 %v8750_v10  ;;  %v3239_v1 = vld [vmem:[%s8551_s2 + $0x38] sm:$0xff]  ;;  %3305 = vmatpush.msra.mxu0 %v3247_v53  ;;  %v7339_v32 = vpop.f32.mrf.mxu2 }
 0x311   : > { %2577 = vperm.xlu2 %4993, %v6976_v19   ;;  %v2901_v51 = vpop.permute.xlu2 %2900  ;;  %v2027_v34 = vmax.f32 %v8785_v43, %v2324_v16  ;;  %3418 = vmatpush.msra.mxu1 %v3239_v1  ;;  %v2349_v43 = vadd.f32 %v2324_v16, %v2180_v31 }
 0x312   : > { %3306 = vmatpush.msra.mxu0 %v3246_v50  ;;  %vm2933_vm4 = vcmp.eq.s32.totalorder %v2901_v51, %v5419_v30 }
 0x313   : > { %v2196_v8 = vmax.f32 %v2027_v34, %v2155_v27  ;;  %v7335_v34 = vpop.permute.xlu0 %2734 }
 0x314   : > { %v7353_v16 = vpop.f32.mrf.mxu0 }
 0x315   : > { %v7318_v60 = vpop.f32.mrf.mxu3  ;;  %v2557_v7 = vpop.permute.xlu1 %2556  ;;  %v7333_v0 = vmax.f32 %v2196_v8, %v1986_v18  ;;  %v3238_v8 = vld [vmem:[%s8551_s2 + $0x30] sm:$0xff] }
 0x316   : > { %vm2593_vm15 = vcmp.eq.s32.totalorder %v2557_v7, %v5419_v30  ;;  %4738 = vmatmul.msk.bf16.gmra.mxu1 %vm4737_vm13, %v8688_v55  ;;  %vm3101_vm13 = vcmp.eq.s32.totalorder %v7274_v4, %v5419_v30 }
 0x317   : > { %vm4721_vm0 = vmpackc.low %vm2593_vm15, %vm2592_vm14  ;;  %4994 = vset.pattern.permute.xlu1 %v8750_v10  ;;  %8786 = vst [vmem:[#allocation71_spill] sm:$0xff] %v7333_v0  ;;  %3419 = vmatpush.msra.mxu1 %v3238_v8 }
 0x318   : > { %2580 = vperm.xlu1 %4994, %v5121_v2   ;;  %4722 = vmatmul.msk.bf16.gmra.mxu0 %vm4721_vm0, %v8688_v55 }
 0x319   : > { %4995 = vset.pattern.permute.xlu2 %v8752_v44 }
 0x31a   : > { %3084 = vperm.xlu2 %4995, %v6976_v19   ;;  %v2563_v59 = vpop.permute.xlu2 %2562 }
 0x31b   : > { %v7363_v1 = vpop.permute.xlu0 %2574  ;;  %vm2595_vm7 = vcmp.eq.s32.totalorder %v2563_v59, %v5419_v30 }
 0x31d   : > { %v7337_v27 = vpop.f32.mrf.mxu3 }
 0x31e   : > { %8787 = vst [vmem:[#allocation72_spill] sm:$0xff] %v7337_v27  ;;  %v7344_v38 = vadd.f32 %v7337_v27, %v2349_v43  ;;  %v3064_v53 = vpop.permute.xlu1 %3063  ;;  %v2329_v31 = vpop.f32.mrf.mxu2 }
 0x31f   : > { %vm3100_vm2 = vcmp.eq.s32.totalorder %v3064_v53, %v5419_v30  ;;  %v8789_v53 = vmax.f32 %v6927_v21, %v7108_v29 }
 0x320   : > { %vm4769_vm3 = vmpackc.low %vm3100_vm2, %vm3099_vm1  ;;  %4997 = vset.pattern.permute.xlu1 %v8756_v20  ;;  %v1991_v50 = vpop.f32.mrf.mxu0 }
 0x321   : > { %2746 = vperm.xlu1 %4997, %v6976_v19   ;;  %4770 = vmatmul.msk.bf16.gmra.mxu3 %vm4769_vm3, %v8688_v55  ;;  %v2029_v7 = vmax.f32 %v8789_v53, %v2329_v31 }
 0x322   : > { %4998 = vset.pattern.permute.xlu2 %v8756_v20 }
 0x323   : > { %2749 = vperm.xlu2 %4998, %v5121_v2   ;;  %v7355_v18 = vpop.permute.xlu2 %2728  ;;  %v7370_v2 = vpop.f32.mrf.mxu1  ;;  %v2198_v8 = vmax.f32 %v2029_v7, %v1991_v50  ;;  %v3237_v7 = vld [vmem:[%s8551_s2 + $0x28] sm:$0xff] }
 0x324   : > { %v2907_v21 = vpop.permute.xlu0 %2906  ;;  %3420 = vmatpush.msra.mxu1 %v3237_v7  ;;  %vm2763_vm0 = vcmp.eq.s32.totalorder %v7355_v18, %v5419_v30 }
 0x325   : > { %v7365_v19 = vpop.f32.mrf.mxu3  ;;  %vm2935_vm11 = vcmp.eq.s32.totalorder %v2907_v21, %v5419_v30 }
 0x326   : > { %8788 = vst [vmem:[#allocation73_spill] sm:$0xff] %v7365_v19  ;;  %v2013_v19 = vadd.f32 %v1991_v50, %v7115_v58 }
 0x327   : > { %v2898_v43 = vpop.permute.xlu1 %2897 }
 0x328   : > { %vm2932_vm5 = vcmp.eq.s32.totalorder %v2898_v43, %v5419_v30  ;;  %v7412_v4 = vpop.f32.mrf.mxu0 }
 0x329   : > { %vm4755_vm6 = vmpackc.low %vm2933_vm4, %vm2932_vm5  ;;  %4999 = vset.pattern.permute.xlu1 %v8748_v6  ;;  %8792 = vst [vmem:[#allocation76_spill] sm:$0xff] %v7412_v4 }
 0x32a   : > { %2921 = vperm.xlu1 %4999, %v7031_v47   ;;  %4756 = vmatmul.msk.bf16.gmra.mxu2 %vm4755_vm6, %v8688_v55 }
 0x32b   : > { %5000 = vset.pattern.permute.xlu2 %v8748_v6 }
 0x32c   : > { %2924 = vperm.xlu2 %5000, %v6841_v45   ;;  %v2904_v51 = vpop.permute.xlu2 %2903 }
 0x32d   : > { %vm2934_vm10 = vcmp.eq.s32.totalorder %v2904_v51, %v5419_v30 }
 0x32e   : > { %vm4757_vm12 = vmpackc.low %vm2935_vm11, %vm2934_vm10 }
 0x32f   : > { %v2498_v43 = vpop.f32.mrf.mxu3 }
 0x330   : > { %v7379_v27 = vmax.f32 %v2198_v8, %v2498_v43  ;;  %v2560_v0 = vpop.permute.xlu1 %2559  ;;  %v8795_v8 = vmax.f32 %v6982_v23, %v7143_v39  ;;  %v3244_v23 = vld [vmem:[%s8552_s3 + $0x20] sm:$0xff] }
 0x331   : > { %vm2594_vm8 = vcmp.eq.s32.totalorder %v2560_v0, %v5419_v30  ;;  %v3245_v0 = vld [vmem:[%s8552_s3 + $0x28] sm:$0xff]  ;;  %v3236_v39 = vld [vmem:[%s8551_s2 + $0x20] sm:$0xff] }
 0x332   : > { %8790 = vst [vmem:[#allocation74_spill] sm:$0xff] %v7379_v27  ;;  %vm4723_vm9 = vmpackc.low %vm2595_vm7, %vm2594_vm8  ;;  %5002 = vset.pattern.permute.xlu1 %v8750_v10  ;;  %v7385_v29 = vpop.f32.mrf.mxu1  ;;  %3307 = vmatpush.msra.mxu0 %v3245_v0 }
 0x333   : > { %v2182_v6 = vadd.f32 %v7385_v29, %v2013_v19  ;;  %2586 = vperm.xlu1 %5002, %v6841_v45   ;;  %4724 = vmatmul.msk.bf16.gmra.mxu0 %vm4723_vm9, %v8688_v55  ;;  %vm2599_vm9 = vcmp.eq.s32.totalorder %v7363_v1, %v5419_v30 }
 0x334   : > { %5003 = vset.pattern.permute.xlu2 %v8752_v44  ;;  %3308 = vmatpush.msra.mxu0 %v3244_v23 }
 0x335   : > { %v2351_v58 = vadd.f32 %v2329_v31, %v2182_v6  ;;  %3090 = vperm.xlu2 %5003, %v7031_v47   ;;  %v2569_v59 = vpop.permute.xlu2 %2568  ;;  %v7404_v31 = vpop.f32.mrf.mxu2  ;;  %3421 = vmatpush.msra.mxu1 %v3236_v39  ;;  %v3241_v39 = vld [vmem:[%s8552_s3 + $0x8] sm:$0xff] }
 0x336   : > { %vm2597_vm3 = vcmp.eq.s32.totalorder %v2569_v59, %v5419_v30 }
 0x337   : > { %v7394_v10 = vadd.f32 %v2498_v43, %v2351_v58  ;;  %v7415_v50 = vpop.f32.mrf.mxu3 }
 0x338   : > { %8793 = vst [vmem:[#allocation77_spill] sm:$0xff] %v7415_v50 }
 0x339   : > { %8791 = vst [vmem:[#allocation75_spill] sm:$0xff] %v7394_v10  ;;  %v3070_v19 = vpop.permute.xlu1 %3069 }
 0x33a   : > { %vm3102_vm14 = vcmp.eq.s32.totalorder %v3070_v19, %v5419_v30  ;;  %4758 = vmatmul.msk.bf16.gmra.mxu2 %vm4757_vm12, %v8688_v55  ;;  %vm2765_vm12 = vcmp.eq.s32.totalorder %v7335_v34, %v5419_v30  ;;  %v3234_v34 = vld [vmem:[%s8551_s2 + $0x10] sm:$0xff] }
 0x33b   : > { %vm4771_vm15 = vmpackc.low %vm3102_vm14, %vm3101_vm13  ;;  %5004 = vset.pattern.permute.xlu1 %v8752_v44 }
 0x33c   : > { %3093 = vperm.xlu1 %5004, %v6841_v45   ;;  %4772 = vmatmul.msk.bf16.gmra.mxu3 %vm4771_vm15, %v8688_v55  ;;  %v7420_v45 = vpop.f32.mrf.mxu1 }
 0x33d   : > { %5005 = vset.pattern.permute.xlu2 %v8756_v20  ;;  %v2334_v44 = vpop.f32.mrf.mxu2  ;;  %8794 = vst [vmem:[#allocation78_spill] sm:$0xff] %v7420_v45  ;;  %v1996_v20 = vpop.f32.mrf.mxu0 }
 0x33e   : > { %2752 = vperm.xlu2 %5005, %v7031_v47   ;;  %v3076_v53 = vpop.permute.xlu2 %3075  ;;  %v2031_v47 = vmax.f32 %v8795_v8, %v2334_v44  ;;  %v2015_v18 = vadd.f32 %v1996_v20, %v7150_v48 }
 0x33f   : > { %vm3104_vm6 = vcmp.eq.s32.totalorder %v3076_v53, %v5419_v30 }
 0x340   : > { %v2200_v21 = vmax.f32 %v2031_v47, %v1996_v20  ;;  %v3235_v47 = vld [vmem:[%s8551_s2 + $0x18] sm:$0xff] }
 0x341   : > { %3422 = vmatpush.msra.mxu1 %v3235_v47  ;;  %v3232_v47 = vld [vmem:[%s8551_s2] sm:$0xff] }
 0x342   : > { %v2732_v51 = vpop.permute.xlu1 %2731 }
 0x343   : > { %vm2764_vm1 = vcmp.eq.s32.totalorder %v2732_v51, %v5419_v30  ;;  %3423 = vmatpush.msra.mxu1 %v3234_v34 }
 0x344   : > { %vm4739_vm2 = vmpackc.low %vm2764_vm1, %vm2763_vm0 }
 0x345   : > { %4740 = vmatmul.msk.bf16.gmra.mxu1 %vm4739_vm2, %v8688_v55 }
 0x347   : > { %v2910_v43 = vpop.permute.xlu2 %2909 }
 0x348   : > { %vm2936_vm15 = vcmp.eq.s32.totalorder %v2910_v43, %v5419_v30 }
 0x34a   : > { %v2503_v6 = vpop.f32.mrf.mxu3 }
 0x34b   : > { %v7426_v58 = vmax.f32 %v2200_v21, %v2503_v6  ;;  %v2566_v0 = vpop.permute.xlu1 %2565 }
 0x34c   : > { %vm2596_vm4 = vcmp.eq.s32.totalorder %v2566_v0, %v5419_v30 }
 0x34d   : > { %8796 = vst [vmem:[#allocation79_spill] sm:$0xff] %v7426_v58  ;;  %vm4725_vm5 = vmpackc.low %vm2597_vm3, %vm2596_vm4  ;;  %v7431_v7 = vpop.f32.mrf.mxu1 }
 0x34e   : > { %8797 = vst [vmem:[#allocation80_spill] sm:$0xff] %v7431_v7  ;;  %v2184_v19 = vadd.f32 %v7431_v7, %v2015_v18  ;;  %4726 = vmatmul.msk.bf16.gmra.mxu0 %vm4725_vm5, %v8688_v55 }
 0x350   : > { %v2353_v48 = vadd.f32 %v2334_v44, %v2184_v19  ;;  %v2572_v59 = vpop.permute.xlu2 %2571  ;;  %v3243_v44 = vld [vmem:[%s8552_s3 + $0x18] sm:$0xff]  ;;  %v2916_v19 = vpop.permute.xlu0 %2915 }
 0x351   : > { %vm2598_vm10 = vcmp.eq.s32.totalorder %v2572_v59, %v5419_v30  ;;  %3309 = vmatpush.msra.mxu0 %v3243_v44  ;;  %v3240_v44 = vld [vmem:[%s8552_s3] sm:$0xff] }
 0x352   : > { %v7441_v51 = vadd.f32 %v2503_v6, %v2353_v48  ;;  %vm4727_vm11 = vmpackc.low %vm2599_vm9, %vm2598_vm10  ;;  %v3242_v6 = vld [vmem:[%s8552_s3 + $0x10] sm:$0xff]  ;;  %v3233_v48 = vld [vmem:[%s8551_s2 + $0x8] sm:$0xff] }
 0x353   : > { %3310 = vmatpush.msra.mxu0 %v3242_v6  ;;  %3424 = vmatpush.msra.mxu1 %v3233_v48  ;;  %v7498_v6 = vpop.f32.mrf.mxu3 }
 0x354   : > { %8798 = vst [vmem:[#allocation81_spill] sm:$0xff] %v7441_v51  ;;  %v3073_v20 = vpop.permute.xlu1 %3072 }
 0x355   : > { %vm3103_vm7 = vcmp.eq.s32.totalorder %v3073_v20, %v5419_v30  ;;  %3311 = vmatpush.msra.mxu0 %v3241_v39  ;;  %3425 = vmatpush.msra.mxu1 %v3232_v47  ;;  %8800 = vst [vmem:[#allocation83_spill] sm:$0xff] %v7498_v6  ;;  %v7500_v34 = vpop.f32.mrf.mxu1  ;;  %v8804_v39 = vld [vmem:[#allocation7_spill] sm:$0xff]  ;;  %v8806_v6 = vld [vmem:[#allocation29_spill] sm:$0xff] }
 0x356   : > { %vm4773_vm8 = vmpackc.low %vm3104_vm6, %vm3103_vm7  ;;  %8801 = vst [vmem:[#allocation84_spill] sm:$0xff] %v7500_v34 }
 0x357   : > { %4774 = vmatmul.msk.bf16.gmra.mxu3 %vm4773_vm8, %v8688_v55  ;;  %3312 = vmatpush.msra.mxu0 %v3240_v44 }
 0x358   : > { %v3088_v59 = vpop.permute.xlu0 %3087 }
 0x359   : > { %v3082_v8 = vpop.permute.xlu2 %3081  ;;  %vm3108_vm9 = vcmp.eq.s32.totalorder %v3088_v59, %v5419_v30 }
 0x35a   : > { %vm3106_vm2 = vcmp.eq.s32.totalorder %v3082_v8, %v5419_v30 }
 0x35d   : > { %v2738_v53 = vpop.permute.xlu1 %2737 }
 0x35e   : > { %vm2766_vm13 = vcmp.eq.s32.totalorder %v2738_v53, %v5419_v30  ;;  %4728 = vmatmul.msk.bf16.gmra.mxu0 %vm4727_vm11, %v8688_v55  ;;  %vm2938_vm11 = vcmp.eq.s32.totalorder %v2916_v19, %v5419_v30 }
 0x35f   : > { %vm4741_vm14 = vmpackc.low %vm2766_vm13, %vm2765_vm12 }
 0x360   : > { %4742 = vmatmul.msk.bf16.gmra.mxu1 %vm4741_vm14, %v8688_v55 }
 0x362   : > { %v2744_v1 = vpop.permute.xlu2 %2743 }
 0x363   : > { %vm2768_vm5 = vcmp.eq.s32.totalorder %v2744_v1, %v5419_v30 }
 0x365   : > { %v7512_v47 = vpop.f32.mrf.mxu3 }
 0x366   : > { %v2913_v21 = vpop.permute.xlu1 %2912 }
 0x367   : > { %vm2937_vm0 = vcmp.eq.s32.totalorder %v2913_v21, %v5419_v30  ;;  %v7495_v21 = vpop.f32.mrf.mxu0 }
 0x368   : > { %vm4759_vm1 = vmpackc.low %vm2937_vm0, %vm2936_vm15  ;;  %8799 = vst [vmem:[#allocation82_spill] sm:$0xff] %v7495_v21 }
 0x369   : > { %4760 = vmatmul.msk.bf16.gmra.mxu2 %vm4759_vm1, %v8688_v55 }
 0x36b   : > { %v2578_v0 = vpop.permute.xlu2 %2577 }
 0x36c   : > { %vm2600_vm14 = vcmp.eq.s32.totalorder %v2578_v0, %v5419_v30  ;;  %v8803_v0 = vld [vmem:[#allocation3_spill] sm:$0xff] }
 0x36d   : > { %v819_v48 = vadd.f32 %v8804_v39, %v8803_v0  ;;  %v7534_v21 = vpop.f32.mrf.mxu3 }
 0x36f   : > { %v3079_v18 = vpop.permute.xlu1 %3078  ;;  %v2637_v59 = vpop.f32.mrf.mxu0 }
 0x370   : > { %vm3105_vm3 = vcmp.eq.s32.totalorder %v3079_v18, %v5419_v30  ;;  %v2584_v18 = vpop.permute.xlu0 %2583 }
 0x371   : > { %vm4775_vm4 = vmpackc.low %vm3106_vm2, %vm3105_vm3 }
 0x372   : > { %4776 = vmatmul.msk.bf16.gmra.mxu3 %vm4775_vm4, %v8688_v55 }
 0x374   : > { %v3085_v43 = vpop.permute.xlu2 %3084 }
 0x375   : > { %vm3107_vm8 = vcmp.eq.s32.totalorder %v3085_v43, %v5419_v30 }
 0x376   : > { %vm4777_vm10 = vmpackc.low %vm3108_vm9, %vm3107_vm8 }
 0x378   : > { %v2741_v23 = vpop.permute.xlu1 %2740  ;;  %v2756_v7 = vpop.permute.xlu0 %2755 }
 0x379   : > { %vm2767_vm6 = vcmp.eq.s32.totalorder %v2741_v23, %v5419_v30  ;;  %v7504_v23 = vpop.f32.mrf.mxu2  ;;  %vm2772_vm8 = vcmp.eq.s32.totalorder %v2756_v7, %v5419_v30 }
 0x37a   : > { %vm4743_vm7 = vmpackc.low %vm2768_vm5, %vm2767_vm6  ;;  %8802 = vst [vmem:[#allocation85_spill] sm:$0xff] %v7504_v23 }
 0x37b   : > { %4744 = vmatmul.msk.bf16.gmra.mxu1 %vm4743_vm7, %v8688_v55 }
 0x37d   : > { %v2750_v20 = vpop.permute.xlu2 %2749 }
 0x37e   : > { %vm2770_vm1 = vcmp.eq.s32.totalorder %v2750_v20, %v5419_v30 }
 0x381   : > { %v2919_v8 = vpop.permute.xlu1 %2918  ;;  %v7518_v20 = vpop.f32.mrf.mxu2 }
 0x382   : > { %vm2939_vm12 = vcmp.eq.s32.totalorder %v2919_v8, %v5419_v30  ;;  %4778 = vmatmul.msk.bf16.gmra.mxu3 %vm4777_vm10, %v8688_v55  ;;  %v8805_v8 = vld [vmem:[#allocation16_spill] sm:$0xff]  ;;  %vm2602_vm10 = vcmp.eq.s32.totalorder %v2584_v18, %v5419_v30 }
 0x383   : > { %vm4761_vm13 = vmpackc.low %vm2939_vm12, %vm2938_vm11  ;;  %v988_v44 = vadd.f32 %v8805_v8, %v819_v48  ;;  %v835_v48 = vmax.f32 %v8803_v0, %v8804_v39  ;;  %v8808_v39 = vld [vmem:[#allocation12_spill] sm:$0xff] }
 0x384   : > { %4762 = vmatmul.msk.bf16.gmra.mxu2 %vm4761_vm13, %v8688_v55 }
 0x385   : > { %v1157_v51 = vadd.f32 %v8806_v6, %v988_v44 }
 0x386   : > { %v2925_v53 = vpop.permute.xlu2 %2924 }
 0x387   : > { %v1326_v34 = vadd.f32 %v6327_v54, %v1157_v51  ;;  %vm2941_vm4 = vcmp.eq.s32.totalorder %v2925_v53, %v5419_v30  ;;  %v7527_v51 = vpop.f32.mrf.mxu0  ;;  %v1004_v53 = vmax.f32 %v835_v48, %v8805_v8  ;;  %v2677_v8 = vadd.f32 %v2637_v59, %v7183_v35  ;;  %v8810_v35 = vld [vmem:[#allocation32_spill] sm:$0xff] }
 0x389   : > { %v1495_v23 = vadd.f32 %v6493_v63, %v1326_v34  ;;  %v1173_v34 = vmax.f32 %v1004_v53, %v8806_v6  ;;  %v8809_v6 = vld [vmem:[#allocation35_spill] sm:$0xff] }
 0x38a   : > { %v2581_v1 = vpop.permute.xlu1 %2580 }
 0x38b   : > { %vm2601_vm15 = vcmp.eq.s32.totalorder %v2581_v1, %v5419_v30  ;;  %v7514_v1 = vpop.f32.mrf.mxu1  ;;  %v1664_v44 = vadd.f32 %v6616_v3, %v1495_v23  ;;  %v8807_v23 = vld [vmem:[#allocation5_spill] sm:$0xff] }
 0x38c   : > { %vm4729_vm0 = vmpackc.low %vm2601_vm15, %vm2600_vm14  ;;  %v821_v45 = vadd.f32 %v8808_v39, %v8807_v23 }
 0x38d   : > { %4730 = vmatmul.msk.bf16.gmra.mxu0 %vm4729_vm0, %v8688_v55  ;;  %vm3248_vm0 = vcmask 523264  }
 0x38e   : > { %v990_v48 = vadd.f32 %v8809_v6, %v821_v45 }
 0x38f   : > { %v7502_v43 = vpop.permute.xlu2 %3090 }
 0x390   : > { %vm3109_vm13 = vcmp.eq.s32.totalorder %v7502_v43, %v5419_v30 }
 0x393   : > { %v2747_v19 = vpop.permute.xlu1 %2746  ;;  %v7536_v10 = vpop.f32.mrf.mxu1 }
 0x394   : > { %vm2769_vm2 = vcmp.eq.s32.totalorder %v2747_v19, %v5419_v30 }
 0x395   : > { %vm4745_vm3 = vmpackc.low %vm2770_vm1, %vm2769_vm2 }
 0x396   : > { %4746 = vmatmul.msk.bf16.gmra.mxu1 %vm4745_vm3, %v8688_v55 }
 0x398   : > { %v2753_v58 = vpop.permute.xlu2 %2752 }
 0x399   : > { %vm2771_vm7 = vcmp.eq.s32.totalorder %v2753_v58, %v5419_v30  ;;  %v1342_v58 = vmax.f32 %v1173_v34, %v6327_v54  ;;  %v2846_v54 = vadd.f32 %v7514_v1, %v2677_v8  ;;  %v1159_v34 = vadd.f32 %v8810_v35, %v990_v48  ;;  %v7567_v48 = vpop.f32.mrf.mxu3 }
 0x39a   : > { %vm4747_vm9 = vmpackc.low %vm2772_vm8, %vm2771_vm7  ;;  %v837_v8 = vmax.f32 %v8807_v23, %v8808_v39 }
 0x39b   : > { %v1511_v53 = vmax.f32 %v1342_v58, %v6493_v63  ;;  %v7559_v45 = vpop.f32.mrf.mxu1  ;;  %v3015_v58 = vadd.f32 %v7518_v20, %v2846_v54 }
 0x39c   : > { %v2922_v19 = vpop.permute.xlu1 %2921 }
 0x39d   : > { %vm2940_vm5 = vcmp.eq.s32.totalorder %v2922_v19, %v5419_v30  ;;  %v1833_v19 = vadd.f32 %v6812_v52, %v1664_v44  ;;  %v7548_v44 = vpop.f32.mrf.mxu2  ;;  %v1680_v18 = vmax.f32 %v1511_v53, %v6616_v3 }
 0x39e   : > { %vm4763_vm6 = vmpackc.low %vm2941_vm4, %vm2940_vm5 }
 0x39f   : > { %4764 = vmatmul.msk.bf16.gmra.mxu2 %vm4763_vm6, %v8688_v55  ;;  %v2002_v0 = vadd.f32 %v6968_v40, %v1833_v19  ;;  %v7552_v19 = vpop.f32.mrf.mxu0  ;;  %v1849_v4 = vmax.f32 %v1680_v18, %v6812_v52  ;;  %v1006_v18 = vmax.f32 %v837_v8, %v8809_v6 }
 0x3a1   : > { %v2171_v7 = vadd.f32 %v7104_v62, %v2002_v0  ;;  %v1328_v0 = vadd.f32 %v6383_v28, %v1159_v34  ;;  %v2018_v3 = vmax.f32 %v1849_v4, %v6968_v40 }
 0x3a3   : > { %v1497_v27 = vadd.f32 %v6552_v26, %v1328_v0  ;;  %v2187_v40 = vmax.f32 %v2018_v3, %v7068_v42  ;;  %v8812_v0 = vld [vmem:[#allocation4_spill] sm:$0xff]  ;;  %v2679_v3 = vadd.f32 %v7552_v19, %v7213_v36 }
 0x3a5   : > { %v2587_v50 = vpop.permute.xlu1 %2586  ;;  %v1666_v54 = vadd.f32 %v6689_v5, %v1497_v27  ;;  %v2356_v23 = vmax.f32 %v2187_v40, %v7104_v62  ;;  %v7599_v62 = vpop.f32.mrf.mxu1 }
 0x3a6   : > { %vm2603_vm11 = vcmp.eq.s32.totalorder %v2587_v50, %v5419_v30  ;;  %4748 = vmatmul.msk.bf16.gmra.mxu1 %vm4747_vm9, %v8688_v55  ;;  %v2340_v50 = vadd.f32 %v7068_v42, %v2171_v7  ;;  %v8811_v7 = vmax.f32 %v7075_v15, %v7177_v17  ;;  %v3184_v15 = vadd.f32 %v7512_v47, %v3015_v58 }
 0x3a7   : > { %vm4731_vm12 = vmpackc.low %vm2603_vm11, %vm2602_vm10  ;;  %v1835_v27 = vadd.f32 %v6873_v22, %v1666_v54  ;;  %v2525_v39 = vmax.f32 %v2356_v23, %v7193_v13 }
 0x3a8   : > { %4732 = vmatmul.msk.bf16.gmra.mxu0 %vm4731_vm12, %v8688_v55  ;;  %v2509_v63 = vadd.f32 %v7193_v13, %v2340_v50  ;;  %v2693_v53 = vmax.f32 %v8811_v7, %v2637_v59  ;;  %v7576_v50 = vpop.f32.mrf.mxu2  ;;  %v1175_v59 = vmax.f32 %v1006_v18, %v8810_v35  ;;  %v3216_v6 = vmul.f32 0.0625, %v3184_v15  ;;  %v8814_v13 = vld [vmem:[#allocation20_spill] sm:$0xff] }
 0x3a9   : > { %v2694_v8 = vmax.f32 %v2525_v39, %v7527_v51  ;;  %v2848_v18 = vadd.f32 %v7559_v45, %v2679_v3 }
 0x3aa   : > { %v2678_v34 = vadd.f32 %v7527_v51, %v2509_v63  ;;  %v2862_v4 = vmax.f32 %v2693_v53, %v7518_v20  ;;  %v1344_v42 = vmax.f32 %v1175_v59, %v6383_v28  ;;  %v2004_v20 = vadd.f32 %v7022_v33, %v1835_v27  ;;  %v8815_v51 = vld [vmem:[#allocation34_spill] sm:$0xff] }
 0x3ab   : > { %v3017_v23 = vadd.f32 %v7576_v50, %v2848_v18  ;;  %v8820_v18 = vld [vmem:[#allocation6_spill] sm:$0xff] }
 0x3ac   : > { %v2847_v17 = vadd.f32 %v7536_v10, %v2678_v34  ;;  %v3031_v43 = vmax.f32 %v2862_v4, %v7512_v47  ;;  %v1513_v58 = vmax.f32 %v1344_v42, %v6552_v26  ;;  %v2173_v47 = vadd.f32 %v7152_v37, %v2004_v20  ;;  %v3151_v34 = vpop.f32.mrf.mxu3 }
 0x3ad   : > { %v2863_v26 = vmax.f32 %v2694_v8, %v7548_v44 }
 0x3ae   : > { %v3094_v52 = vpop.permute.xlu1 %3093  ;;  %v3016_v35 = vadd.f32 %v7548_v44, %v2847_v17  ;;  %v3200_v28 = vmax.f32 %v3031_v43, %v7514_v1  ;;  %v1682_v53 = vmax.f32 %v1513_v58, %v6689_v5  ;;  %v2342_v40 = vadd.f32 %v7139_v14, %v2173_v47  ;;  %v8818_v47 = vld [vmem:[#allocation48_spill] sm:$0xff] }
 0x3af   : > { %vm3110_vm14 = vcmp.eq.s32.totalorder %v3094_v52, %v5419_v30  ;;  %v7590_v30 = vpop.f32.mrf.mxu0  ;;  %v3032_v4 = vmax.f32 %v2863_v26, %v7534_v21 }
 0x3b0   : > { %vm4779_vm15 = vmpackc.low %vm3110_vm14, %vm3109_vm13  ;;  %v3185_v52 = vadd.f32 %v7534_v21, %v3016_v35  ;;  %v1851_v54 = vmax.f32 %v1682_v53, %v6873_v22  ;;  %v2982_v36 = vpop.f32.mrf.mxu2  ;;  %v2511_v59 = vadd.f32 %v7224_v57, %v2342_v40  ;;  %v8816_v22 = vmax.f32 %v7126_v11, %v7207_v56  ;;  %v8817_v35 = vld [vmem:[#allocation40_spill] sm:$0xff]  ;;  %v7637_v56 = vpop.f32.mrf.mxu1 }
 0x3b1   : > { %4780 = vmatmul.msk.bf16.gmra.mxu3 %vm4779_vm15, %v8688_v55  ;;  %v8813_v55 = vld [vmem:[#allocation9_spill] sm:$0xff]  ;;  %v3201_v39 = vmax.f32 %v3032_v4, %v7536_v10  ;;  %v8823_v4 = vld [vmem:[#allocation63_spill] sm:$0xff] }
 0x3b2   : > { %v823_v63 = vadd.f32 %v8813_v55, %v8812_v0  ;;  %v839_v5 = vmax.f32 %v8812_v0, %v8813_v55  ;;  %v2020_v17 = vmax.f32 %v1851_v54, %v7022_v33  ;;  %v2695_v27 = vmax.f32 %v8816_v22, %v7567_v48  ;;  %v8822_v54 = vld [vmem:[#allocation60_spill] sm:$0xff] }
 0x3b3   : > { %v3217_v43 = vmul.f32 0.0625, %v3185_v52  ;;  %v2680_v33 = vadd.f32 %v7590_v30, %v2511_v59  ;;  %v8825_v22 = vld [vmem:[#allocation36_spill] sm:$0xff] }
 0x3b4   : > { %v992_v7 = vadd.f32 %v8814_v13, %v823_v63  ;;  %v1008_v21 = vmax.f32 %v839_v5, %v8814_v13  ;;  %v2189_v20 = vmax.f32 %v2020_v17, %v7139_v14  ;;  %v7639_v0 = vpop.f32.mrf.mxu3  ;;  %v2864_v63 = vmax.f32 %v2695_v27, %v7576_v50 }
 0x3b5   : > { %v3186_v14 = vadd.f32 %v7567_v48, %v3017_v23  ;;  %v2849_v10 = vadd.f32 %v7599_v62, %v2680_v33  ;;  %v8827_v33 = vld [vmem:[#allocation13_spill] sm:$0xff] }
 0x3b6   : > { %4797 = vmatmul.msk.f32.vlgmr.msra.gmra.mxu1 %vm3248_vm0, %v3216_v6  ;;  %v1161_v1 = vadd.f32 %v8815_v51, %v992_v7  ;;  %v1177_v6 = vmax.f32 %v1008_v21, %v8815_v51  ;;  %v2358_v55 = vmax.f32 %v2189_v20, %v7152_v37  ;;  %v8819_v7 = vld [vmem:[#allocation54_spill] sm:$0xff]  ;;  %v3033_v37 = vmax.f32 %v2864_v63, %v7552_v19  ;;  %v8821_v51 = vld [vmem:[#allocation11_spill] sm:$0xff] }
 0x3b7   : > { %v7617_v15 = vpop.f32.mrf.mxu0  ;;  %v3018_v26 = vadd.f32 %v2982_v36, %v2849_v10  ;;  %v3218_v52 = vmul.f32 0.0625, %v3186_v14  ;;  %v8824_v19 = vld [vmem:[#allocation23_spill] sm:$0xff]  ;;  %v8829_v63 = vld [vmem:[#allocation58_spill] sm:$0xff] }
 0x3b8   : > { %4781 = vmatmul.msk.f32.vlgmr.msra.gmra.mxu0 %vm3248_vm0, %v3200_v28  ;;  %v1330_v44 = vadd.f32 %v6437_v12, %v1161_v1  ;;  %v1346_v58 = vmax.f32 %v1177_v6, %v6437_v12  ;;  %v2985_v28 = vpop.f32.mrf.mxu2  ;;  %v2527_v3 = vmax.f32 %v2358_v55, %v7224_v57  ;;  %v825_v1 = vadd.f32 %v8821_v51, %v8820_v18  ;;  %v8830_v14 = vld [vmem:[#allocation62_spill] sm:$0xff] }
 0x3b9   : > { %v3202_v57 = vmax.f32 %v3033_v37, %v7559_v45  ;;  %v3187_v59 = vadd.f32 %v3151_v34, %v3018_v26  ;;  %v8826_v45 = vld [vmem:[#allocation59_spill] sm:$0xff]  ;;  %v8831_v10 = vmax.f32 %v8829_v63, %v8830_v14 }
 0x3ba   : > { %v1499_v42 = vadd.f32 %v6596_v24, %v1330_v44  ;;  %v1515_v13 = vmax.f32 %v1346_v58, %v6596_v24  ;;  %v2696_v50 = vmax.f32 %v2527_v3, %v3151_v34  ;;  %v2681_v24 = vadd.f32 %v7617_v15, %v8823_v4  ;;  %v8833_v26 = vld [vmem:[#allocation43_spill] sm:$0xff] }
 0x3bb   : > { %v994_v5 = vadd.f32 %v8824_v19, %v825_v1  ;;  %v2697_v58 = vmax.f32 %v8831_v10, %v2985_v28 }
 0x3bc   : > { %v1668_v11 = vadd.f32 %v8817_v35, %v1499_v42  ;;  %v1684_v12 = vmax.f32 %v1515_v13, %v8817_v35  ;;  %v2865_v17 = vmax.f32 %v2696_v50, %v2982_v36  ;;  %v7667_v21 = vpop.f32.mrf.mxu3  ;;  %v2850_v20 = vadd.f32 %v7637_v56, %v2681_v24  ;;  %v8828_v35 = vld [vmem:[#allocation64_spill] sm:$0xff]  ;;  %v8832_v13 = vld [vmem:[#allocation39_spill] sm:$0xff] }
 0x3bd   : > { %v1163_v27 = vadd.f32 %v8825_v22, %v994_v5  ;;  %v8835_v5 = vld [vmem:[#allocation66_spill] sm:$0xff] }
 0x3be   : > { %4798 = vmatmul.msk.f32.gmra.mxu1 %vm3248_vm0, %v3217_v43  ;;  %v1837_v8 = vadd.f32 %v8818_v47, %v1668_v11  ;;  %v1853_v44 = vmax.f32 %v1684_v12, %v8818_v47  ;;  %v2818_v43 = vpop.f32.mrf.mxu1  ;;  %v3034_v55 = vmax.f32 %v2865_v17, %v7590_v30  ;;  %v3019_v50 = vadd.f32 %v2985_v28, %v2850_v20 }
 0x3bf   : > { %v7652_v48 = vpop.f32.mrf.mxu0  ;;  %v1332_v6 = vadd.f32 %v8827_v33, %v1163_v27  ;;  %v8837_v27 = vld [vmem:[#allocation15_spill] sm:$0xff] }
 0x3c0   : > { %4782 = vmatmul.msk.f32.gmra.mxu0 %vm3248_vm0, %v3201_v39  ;;  %v2006_v53 = vadd.f32 %v8819_v7, %v1837_v8  ;;  %v2022_v23 = vmax.f32 %v1853_v44, %v8819_v7  ;;  %v841_v39 = vmax.f32 %v8820_v18, %v8821_v51  ;;  %v2987_v36 = vpop.f32.mrf.mxu2  ;;  %v3219_v8 = vmul.f32 0.0625, %v3187_v59 }
 0x3c1   : > { %v1501_v7 = vadd.f32 %v8832_v13, %v1332_v6  ;;  %v2866_v51 = vmax.f32 %v2697_v58, %v7637_v56  ;;  %v3188_v1 = vadd.f32 %v7639_v0, %v3019_v50  ;;  %v8839_v6 = vld [vmem:[#allocation69_spill] sm:$0xff] }
 0x3c2   : > { %v2175_v40 = vadd.f32 %v8822_v54, %v2006_v53  ;;  %v2191_v34 = vmax.f32 %v2022_v23, %v8826_v45  ;;  %v1010_v3 = vmax.f32 %v841_v39, %v8824_v19  ;;  %v3203_v53 = vmax.f32 %v3034_v55, %v7599_v62  ;;  %v8834_v62 = vld [vmem:[#allocation50_spill] sm:$0xff] }
 0x3c3   : > { %v3035_v56 = vmax.f32 %v2866_v51, %v7617_v15  ;;  %v3220_v59 = vmul.f32 0.0625, %v3188_v1  ;;  %v8840_v15 = vld [vmem:[#allocation28_spill] sm:$0xff] }
 0x3c4   : > { %v2344_v42 = vadd.f32 %v8826_v45, %v2175_v40  ;;  %v1179_v30 = vmax.f32 %v1010_v3, %v8825_v22  ;;  %v2360_v18 = vmax.f32 %v2191_v34, %v8822_v54  ;;  %v8836_v22 = vld [vmem:[#allocation8_spill] sm:$0xff] }
 0x3c5   : > { %v827_v23 = vadd.f32 %v8837_v27, %v8836_v22  ;;  %v3204_v39 = vmax.f32 %v3035_v56, %v7639_v0  ;;  %v8841_v0 = vld [vmem:[#allocation37_spill] sm:$0xff]  ;;  %v8846_v51 = vld [vmem:[#allocation68_spill] sm:$0xff] }
 0x3c6   : > { %4799 = vmatmul.msk.f32.gmra.mxu1 %vm3248_vm0, %v3218_v52  ;;  %v2513_v11 = vadd.f32 %v8828_v35, %v2344_v42  ;;  %v1670_v52 = vadd.f32 %v8833_v26, %v1501_v7  ;;  %v1348_v12 = vmax.f32 %v1179_v30, %v8827_v33  ;;  %v7695_v28 = vpop.f32.mrf.mxu1  ;;  %v2529_v4 = vmax.f32 %v2360_v18, %v8828_v35  ;;  %v8838_v42 = vld [vmem:[#allocation67_spill] sm:$0xff]  ;;  %v8845_v18 = vld [vmem:[#allocation61_spill] sm:$0xff] }
 0x3c7   : > { %v7680_v47 = vpop.f32.mrf.mxu0  ;;  %v8847_v1 = vmax.f32 %v8845_v18, %v8846_v51 }
 0x3c8   : > { %4783 = vmatmul.msk.f32.gmra.mxu0 %vm3248_vm0, %v3202_v57  ;;  %v2682_v37 = vadd.f32 %v7652_v48, %v2513_v11  ;;  %v1839_v40 = vadd.f32 %v8834_v62, %v1670_v52  ;;  %v3159_v57 = vpop.f32.mrf.mxu3  ;;  %v1517_v19 = vmax.f32 %v1348_v12, %v8832_v13  ;;  %v2990_v44 = vpop.f32.mrf.mxu2  ;;  %v2698_v17 = vmax.f32 %v2529_v4, %v2987_v36  ;;  %v8843_v13 = vld [vmem:[#allocation14_spill] sm:$0xff]  ;;  %v8848_v4 = vld [vmem:[#allocation21_spill] sm:$0xff] }
 0x3c9   : > { %v2683_v34 = vadd.f32 %v7680_v47, %v8839_v6  ;;  %v996_v11 = vadd.f32 %v8840_v15, %v827_v23  ;;  %v2699_v12 = vmax.f32 %v8847_v1, %v2990_v44 }
 0x3ca   : > { %v2851_v24 = vadd.f32 %v2818_v43, %v2682_v37  ;;  %v2008_v54 = vadd.f32 %v8835_v5, %v1839_v40  ;;  %v1686_v45 = vmax.f32 %v1517_v19, %v8833_v26  ;;  %v2867_v63 = vmax.f32 %v2698_v17, %v2818_v43  ;;  %v8844_v37 = vld [vmem:[#allocation70_spill] sm:$0xff]  ;;  %v8849_v17 = vld [vmem:[#allocation45_spill] sm:$0xff] }
 0x3cb   : > { %v2852_v10 = vadd.f32 %v7695_v28, %v2683_v34  ;;  %v843_v40 = vmax.f32 %v8836_v22, %v8837_v27  ;;  %v2868_v23 = vmax.f32 %v2699_v12, %v7680_v47  ;;  %v8855_v12 = vld [vmem:[#allocation19_spill] sm:$0xff] }
 0x3cc   : > { %v2177_v20 = vadd.f32 %v8838_v42, %v2008_v54  ;;  %v3020_v33 = vadd.f32 %v2987_v36, %v2851_v24  ;;  %v1855_v55 = vmax.f32 %v1686_v45, %v8834_v62  ;;  %v1165_v36 = vadd.f32 %v8841_v0, %v996_v11  ;;  %v8850_v45 = vld [vmem:[#allocation52_spill] sm:$0xff] }
 0x3cd   : > { %v3036_v26 = vmax.f32 %v2867_v63, %v7652_v48  ;;  %v3021_v62 = vadd.f32 %v2990_v44, %v2852_v10  ;;  %v1012_v48 = vmax.f32 %v843_v40, %v8840_v15  ;;  %v8851_v63 = vld [vmem:[#allocation10_spill] sm:$0xff] }
 0x3ce   : > { %4800 = vmatmul.msk.f32.gmra.mxu1 %vm3248_vm0, %v3219_v8  ;;  %v3189_v14 = vadd.f32 %v7667_v21, %v3020_v33  ;;  %v2024_v58 = vmax.f32 %v1855_v55, %v8835_v5  ;;  %v8842_v8 = vld [vmem:[#allocation65_spill] sm:$0xff]  ;;  %v1334_v7 = vadd.f32 %v8843_v13, %v1165_v36  ;;  %v7722_v43 = vpop.f32.mrf.mxu1  ;;  %v3037_v33 = vmax.f32 %v2868_v23, %v3159_v57 }
 0x3cf   : > { %v7708_v35 = vpop.f32.mrf.mxu0  ;;  %v2346_v3 = vadd.f32 %v8842_v8, %v2177_v20  ;;  %v3205_v5 = vmax.f32 %v3036_v26, %v7667_v21  ;;  %v3190_v22 = vadd.f32 %v3159_v57, %v3021_v62  ;;  %v1181_v21 = vmax.f32 %v1012_v48, %v8841_v0 }
 0x3d0   : > { %4784 = vmatmul.msk.f32.gmra.mxu0 %vm3248_vm0, %v3203_v53  ;;  %v2193_v53 = vmax.f32 %v2024_v58, %v8842_v8  ;;  %v3161_v30 = vpop.f32.mrf.mxu3  ;;  %v3221_v52 = vmul.f32 0.0625, %v3189_v14  ;;  %v1503_v24 = vadd.f32 %v8848_v4, %v1334_v7  ;;  %v2992_v19 = vpop.f32.mrf.mxu2  ;;  %v8852_v14 = vld [vmem:[#allocation22_spill] sm:$0xff]  ;;  %v3206_v58 = vmax.f32 %v3037_v33, %v7695_v28  ;;  %v8853_v8 = vld [vmem:[#allocation31_spill] sm:$0xff] }
 0x3d1   : > { %v2515_v50 = vadd.f32 %v8844_v37, %v2346_v3  ;;  %v1350_v6 = vmax.f32 %v1181_v21, %v8843_v13  ;;  %v3222_v55 = vmul.f32 0.0625, %v3190_v22  ;;  %v829_v10 = vadd.f32 %v8852_v14, %v8851_v63  ;;  %v8858_v22 = vld [vmem:[#allocation46_spill] sm:$0xff]  ;;  %v8859_v33 = vld [vmem:[#allocation55_spill] sm:$0xff] }
 0x3d2   : > { %v2362_v44 = vmax.f32 %v2193_v53, %v8838_v42  ;;  %v845_v1 = vmax.f32 %v8851_v63, %v8852_v14 }
 0x3d3   : > { %v2684_v54 = vadd.f32 %v7708_v35, %v2515_v50  ;;  %v1519_v0 = vmax.f32 %v1350_v6, %v8848_v4  ;;  %v998_v3 = vadd.f32 %v8853_v8, %v829_v10 }
 0x3d5   : > { %v2853_v27 = vadd.f32 %v7722_v43, %v2684_v54  ;;  %v1688_v7 = vmax.f32 %v1519_v0, %v8849_v17 }
 0x3d6   : > { %4801 = vmatmul.msk.f32.gmra.mxu1 %vm3248_vm0, %v3220_v59  ;;  %v1672_v59 = vadd.f32 %v8849_v17, %v1503_v24 }
 0x3d7   : > { %v7733_v56 = vpop.f32.mrf.mxu0  ;;  %v3022_v11 = vadd.f32 %v2992_v19, %v2853_v27  ;;  %v1857_v18 = vmax.f32 %v1688_v7, %v8850_v45  ;;  %v8860_v7 = vld [vmem:[#allocation27_spill] sm:$0xff] }
 0x3d8   : > { %4785 = vmatmul.msk.f32.gmra.mxu0 %vm3248_vm0, %v3204_v39  ;;  %v1841_v20 = vadd.f32 %v8850_v45, %v1672_v59  ;;  %v2531_v39 = vmax.f32 %v2362_v44, %v8844_v37  ;;  %v2685_v57 = vadd.f32 %v7733_v56, %v7303_v46  ;;  %v2995_v13 = vpop.f32.mrf.mxu2 }
 0x3d9   : > { %v3191_v37 = vadd.f32 %v3161_v30, %v3022_v11 }
 0x3da   : > { %v3164_v34 = vpop.f32.mrf.mxu3  ;;  %v2010_v42 = vadd.f32 %v7290_v41, %v1841_v20  ;;  %v2700_v47 = vmax.f32 %v2531_v39, %v2992_v19  ;;  %v1014_v19 = vmax.f32 %v845_v1, %v8853_v8 }
 0x3db   : > { %v3223_v24 = vmul.f32 0.0625, %v3191_v37 }
 0x3dc   : > { %v2179_v36 = vadd.f32 %v7292_v9, %v2010_v42  ;;  %v2869_v53 = vmax.f32 %v2700_v47, %v7708_v35  ;;  %v2026_v35 = vmax.f32 %v1857_v18, %v7287_v25 }
 0x3dd   : > { %v7746_v15 = vpop.f32.mrf.mxu1 }
 0x3de   : > { %4802 = vmatmul.msk.f32.gmra.mxu1 %vm3248_vm0, %v3221_v52  ;;  %v2854_v26 = vadd.f32 %v7746_v15, %v2685_v57  ;;  %v8854_v52 = vld [vmem:[#allocation24_spill] sm:$0xff]  ;;  %v2348_v46 = vadd.f32 %v7287_v25, %v2179_v36  ;;  %v3038_v51 = vmax.f32 %v2869_v53, %v3161_v30  ;;  %v8857_v30 = vmax.f32 %v7294_v61, %v7298_v49  ;;  %v8861_v53 = vld [vmem:[#allocation17_spill] sm:$0xff] }
 0x3df   : > { %v2659_v50 = vpop.f32.mrf.mxu0  ;;  %v1167_v28 = vadd.f32 %v8854_v52, %v998_v3  ;;  %v1183_v25 = vmax.f32 %v1014_v19, %v8854_v52  ;;  %v2195_v21 = vmax.f32 %v2026_v35, %v7290_v41  ;;  %v847_v37 = vmax.f32 %v8861_v53, %v8860_v7 }
 0x3e0   : > { %4786 = vmatmul.msk.f32.gmra.mxu0 %vm3248_vm0, %v3205_v5  ;;  %v2517_v40 = vadd.f32 %v7318_v60, %v2348_v46  ;;  %v3023_v4 = vadd.f32 %v2995_v13, %v2854_v26  ;;  %v8856_v5 = vld [vmem:[#allocation42_spill] sm:$0xff]  ;;  %v2701_v59 = vmax.f32 %v8857_v30, %v2995_v13  ;;  %v3207_v44 = vmax.f32 %v3038_v51, %v7722_v43  ;;  %v2997_v49 = vpop.f32.mrf.mxu2 }
 0x3e1   : > { %v1336_v62 = vadd.f32 %v8855_v12, %v1167_v28  ;;  %v1352_v43 = vmax.f32 %v1183_v25, %v8855_v12  ;;  %v2364_v6 = vmax.f32 %v2195_v21, %v7292_v9  ;;  %v8862_v28 = vld [vmem:[#allocation33_spill] sm:$0xff]  ;;  %v8868_v30 = vld [vmem:[#allocation38_spill] sm:$0xff] }
 0x3e2   : > { %v3166_v48 = vpop.f32.mrf.mxu3  ;;  %v2686_v23 = vadd.f32 %v2659_v50, %v2517_v40  ;;  %v2870_v45 = vmax.f32 %v2701_v59, %v7733_v56  ;;  %v3192_v20 = vadd.f32 %v3164_v34, %v3023_v4  ;;  %v1016_v18 = vmax.f32 %v847_v37, %v8862_v28  ;;  %v8865_v4 = vld [vmem:[#allocation71_spill] sm:$0xff]  ;;  %v8874_v37 = vld [vmem:[#allocation77_spill] sm:$0xff] }
 0x3e3   : > { %v1505_v54 = vadd.f32 %v8856_v5, %v1336_v62  ;;  %v2533_v41 = vmax.f32 %v2364_v6, %v7318_v60  ;;  %v8864_v62 = vld [vmem:[#allocation30_spill] sm:$0xff] }
 0x3e4   : > { %v3039_v42 = vmax.f32 %v2870_v45, %v3164_v34  ;;  %v3224_v56 = vmul.f32 0.0625, %v3192_v20  ;;  %v1185_v35 = vmax.f32 %v1016_v18, %v8864_v62 }
 0x3e5   : > { %v2828_v17 = vpop.f32.mrf.mxu1  ;;  %v1674_v27 = vadd.f32 %v8858_v22, %v1505_v54  ;;  %v2702_v0 = vmax.f32 %v2533_v41, %v2997_v49 }
 0x3e6   : > { %4803 = vmatmul.msk.f32.gmra.mxu1 %vm3248_vm0, %v3222_v55  ;;  %v2855_v39 = vadd.f32 %v2828_v17, %v2686_v23  ;;  %v1521_v55 = vmax.f32 %v1352_v43, %v8856_v5  ;;  %v3208_v36 = vmax.f32 %v3039_v42, %v7746_v15  ;;  %v1354_v59 = vmax.f32 %v1185_v35, %v8868_v30 }
 0x3e7   : > { %v1843_v61 = vadd.f32 %v8859_v33, %v1674_v27  ;;  %v2662_v47 = vpop.f32.mrf.mxu0  ;;  %v2871_v57 = vmax.f32 %v2702_v0, %v2659_v50  ;;  %v8863_v50 = vld [vmem:[#allocation73_spill] sm:$0xff]  ;;  %v8869_v27 = vld [vmem:[#allocation44_spill] sm:$0xff] }
 0x3e8   : > { %4787 = vmatmul.msk.f32.gmra.mxu0 %vm3248_vm0, %v3206_v58  ;;  %v3024_v63 = vadd.f32 %v2997_v49, %v2855_v39  ;;  %v1690_v10 = vmax.f32 %v1521_v55, %v8858_v22  ;;  %v2687_v34 = vadd.f32 %v2662_v47, %v7344_v38  ;;  %v1523_v21 = vmax.f32 %v1354_v59, %v8869_v27 }
 0x3e9   : > { %v2012_v11 = vadd.f32 %v7353_v16, %v1843_v61  ;;  %v3040_v26 = vmax.f32 %v2871_v57, %v3166_v48 }
 0x3ea   : > { %v1859_v58 = vmax.f32 %v1690_v10, %v8859_v33  ;;  %v3193_v8 = vadd.f32 %v3166_v48, %v3024_v63  ;;  %v8870_v33 = vld [vmem:[#allocation49_spill] sm:$0xff] }
 0x3eb   : > { %v2181_v9 = vadd.f32 %v7370_v2, %v2012_v11  ;;  %v3209_v54 = vmax.f32 %v3040_v26, %v2828_v17  ;;  %v1692_v61 = vmax.f32 %v1523_v21, %v8870_v33 }
 0x3ec   : > { %v3000_v60 = vpop.f32.mrf.mxu2  ;;  %v2028_v15 = vmax.f32 %v1859_v58, %v7339_v32  ;;  %v3225_v46 = vmul.f32 0.0625, %v3193_v8  ;;  %v8873_v8 = vld [vmem:[#allocation76_spill] sm:$0xff] }
 0x3ed   : > { %v2350_v52 = vadd.f32 %v7339_v32, %v2181_v9  ;;  %v831_v32 = vadd.f32 %v8860_v7, %v8861_v53 }
 0x3ee   : > { %4804 = vmatmul.msk.f32.gmra.mxu1 %vm3248_vm0, %v3223_v24  ;;  %v2197_v40 = vmax.f32 %v2028_v15, %v7370_v2  ;;  %v8866_v24 = vld [vmem:[#allocation72_spill] sm:$0xff] }
 0x3ef   : > { %v2664_v38 = vpop.f32.mrf.mxu0  ;;  %v2519_v1 = vadd.f32 %v8863_v50, %v2350_v52  ;;  %v8867_v19 = vmax.f32 %v8865_v4, %v8866_v24  ;;  %v1000_v2 = vadd.f32 %v8862_v28, %v831_v32  ;;  %v8875_v52 = vld [vmem:[#allocation78_spill] sm:$0xff] }
 0x3f0   : > { %4788 = vmatmul.msk.f32.gmra.mxu0 %vm3248_vm0, %v3207_v44  ;;  %v2366_v17 = vmax.f32 %v2197_v40, %v7353_v16 }
 0x3f1   : > { %v2703_v5 = vmax.f32 %v8867_v19, %v2662_v47  ;;  %v2688_v48 = vadd.f32 %v2664_v38, %v2519_v1  ;;  %v1169_v20 = vadd.f32 %v8864_v62, %v1000_v2  ;;  %v8871_v47 = vld [vmem:[#allocation56_spill] sm:$0xff] }
 0x3f2   : > { %v2535_v49 = vmax.f32 %v2366_v17, %v8863_v50  ;;  %v1861_v11 = vmax.f32 %v1692_v61, %v8871_v47 }
 0x3f3   : > { %v2872_v44 = vmax.f32 %v2703_v5, %v3000_v60  ;;  %v1338_v42 = vadd.f32 %v8868_v30, %v1169_v20  ;;  %v8878_v30 = vld [vmem:[#allocation18_spill] sm:$0xff] }
 0x3f4   : > { %v3002_v39 = vpop.f32.mrf.mxu2  ;;  %v2704_v55 = vmax.f32 %v2535_v49, %v2664_v38  ;;  %v2030_v63 = vmax.f32 %v1861_v11, %v7404_v31  ;;  %v8881_v49 = vld [vmem:[#allocation47_spill] sm:$0xff] }
 0x3f5   : > { %v3169_v14 = vpop.f32.mrf.mxu3  ;;  %v1507_v16 = vadd.f32 %v8869_v27, %v1338_v42 }
 0x3f6   : > { %4805 = vmatmul.msk.f32.gmra.mxu1 %vm3248_vm0, %v3224_v56  ;;  %v3041_v45 = vmax.f32 %v2872_v44, %v3169_v14 }
 0x3f7   : > { %v1676_v0 = vadd.f32 %v8870_v33, %v1507_v16 }
 0x3f8   : > { %v2831_v3 = vpop.f32.mrf.mxu1  ;;  %4789 = vmatmul.msk.f32.gmra.mxu0 %vm3248_vm0, %v3208_v36  ;;  %v8872_v36 = vld [vmem:[#allocation74_spill] sm:$0xff] }
 0x3f9   : > { %v2856_v13 = vadd.f32 %v2831_v3, %v2687_v34  ;;  %v3210_v41 = vmax.f32 %v3041_v45, %v2831_v3  ;;  %v2536_v9 = vmax.f32 %v8872_v36, %v7385_v29  ;;  %v1845_v57 = vadd.f32 %v8871_v47, %v1676_v0  ;;  %v8880_v45 = vld [vmem:[#allocation41_spill] sm:$0xff] }
 0x3fa   : > { %v2199_v3 = vmax.f32 %v2030_v63, %v8873_v8  ;;  %v8882_v47 = vld [vmem:[#allocation53_spill] sm:$0xff] }
 0x3fb   : > { %v3025_v51 = vadd.f32 %v3000_v60, %v2856_v13  ;;  %v2014_v53 = vadd.f32 %v8873_v8, %v1845_v57  ;;  %v8886_v8 = vld [vmem:[#allocation85_spill] sm:$0xff] }
 0x3fc   : > { %v2368_v15 = vmax.f32 %v2199_v3, %v8874_v37 }
 0x3fd   : > { %v3171_v12 = vpop.f32.mrf.mxu3  ;;  %v3194_v23 = vadd.f32 %v3169_v14, %v3025_v51  ;;  %v2873_v14 = vmax.f32 %v2704_v55, %v3002_v39  ;;  %v2183_v28 = vadd.f32 %v8875_v52, %v2014_v53  ;;  %v8889_v53 = vld [vmem:[#allocation84_spill] sm:$0xff] }
 0x3fe   : > { %4806 = vmatmul.msk.f32.gmra.mxu1 %vm3248_vm0, %v3225_v46  ;;  %v2537_v38 = vmax.f32 %v2368_v15, %v8875_v52  ;;  %v8876_v46 = vld [vmem:[#allocation75_spill] sm:$0xff]  ;;  %v8890_v52 = vld [vmem:[#allocation81_spill] sm:$0xff] }
 0x3ff   : > { %v3226_v43 = vmul.f32 0.0625, %v3194_v23  ;;  %v3042_v34 = vmax.f32 %v2873_v14, %v3171_v12  ;;  %v2352_v1 = vadd.f32 %v7404_v31, %v2183_v28 }
 0x400   : > { %v2833_v25 = vpop.f32.mrf.mxu1  ;;  %4790 = vmatmul.msk.f32.gmra.mxu0 %vm3248_vm0, %v3209_v54 }
 0x401   : > { %v2857_v22 = vadd.f32 %v2833_v25, %v2688_v48  ;;  %v3211_v26 = vmax.f32 %v3042_v34, %v2833_v25  ;;  %v2521_v54 = vadd.f32 %v8874_v37, %v2352_v1  ;;  %v8877_v48 = vld [vmem:[#allocation25_spill] sm:$0xff]  ;;  %v8879_v25 = vld [vmem:[#allocation26_spill] sm:$0xff] }
 0x402   : > { %v833_v59 = vadd.f32 %v8878_v30, %v8877_v48  ;;  %v849_v31 = vmax.f32 %v8877_v48, %v8878_v30 }
 0x403   : > { %v3026_v6 = vadd.f32 %v3002_v39, %v2857_v22 }
 0x404   : > { %v1002_v2 = vadd.f32 %v8879_v25, %v833_v59  ;;  %v1018_v17 = vmax.f32 %v849_v31, %v8879_v25 }
 0x405   : > { %v3174_v56 = vpop.f32.mrf.mxu3  ;;  %v3195_v10 = vadd.f32 %v3171_v12, %v3026_v6 }
 0x406   : > { %4807 = vmatmul.msk.f32.gmra.mxu1 %vm3248_vm0, %v3226_v43  ;;  %v2705_v13 = vmax.f32 %v2536_v9, %v3174_v56  ;;  %v1171_v20 = vadd.f32 %v8880_v45, %v1002_v2  ;;  %v1187_v61 = vmax.f32 %v1018_v17, %v8880_v45 }
 0x407   : > { %v3005_v58 = vpop.f32.mrf.mxu2  ;;  %v3227_v60 = vmul.f32 0.0625, %v3195_v10  ;;  %v8884_v10 = vld [vmem:[#allocation57_spill] sm:$0xff] }
 0x408   : > { %4791 = vmatmul.msk.f32.gmra.mxu0 %vm3248_vm0, %v3210_v41  ;;  %v2874_v18 = vmax.f32 %v2705_v13, %v3005_v58  ;;  %v1340_v43 = vadd.f32 %v8881_v49, %v1171_v20  ;;  %v1356_v42 = vmax.f32 %v1187_v61, %v8881_v49  ;;  %v8888_v13 = vld [vmem:[#allocation79_spill] sm:$0xff] }
 0x40a   : > { %v2667_v7 = vpop.f32.mrf.mxu0  ;;  %v1509_v11 = vadd.f32 %v8882_v47, %v1340_v43  ;;  %v1525_v41 = vmax.f32 %v1356_v42, %v8882_v47 }
 0x40b   : > { %v2689_v51 = vadd.f32 %v2667_v7, %v8876_v46  ;;  %v3043_v12 = vmax.f32 %v2874_v18, %v2667_v7 }
 0x40d   : > { %v3176_v29 = vpop.f32.mrf.mxu3 }
 0x40e   : > { %4808 = vmatmul.msk.f32.gmra.mxu1 %vm3248_vm0, %v3227_v60  ;;  %v2706_v62 = vmax.f32 %v2537_v38, %v3176_v29  ;;  %v8887_v60 = vld [vmem:[#allocation80_spill] sm:$0xff] }
 0x40f   : > { %v3007_v40 = vpop.f32.mrf.mxu2  ;;  %v2538_v7 = vmax.f32 %v8888_v13, %v8887_v60  ;;  %v5147_v60 = vmov 128.0  }
 0x410   : > { %4792 = vmatmul.msk.f32.gmra.mxu0 %vm3248_vm0, %v3211_v26  ;;  %v2875_v5 = vmax.f32 %v2706_v62, %v3007_v40  ;;  %5016 = vrcp.f32 %v5147_v60 }
 0x412   : > { %v2669_v19 = vpop.f32.mrf.mxu0 }
 0x413   : > { %v2836_v50 = vpop.f32.mrf.mxu1  ;;  %v2690_v44 = vadd.f32 %v2669_v19, %v2521_v54  ;;  %v3044_v27 = vmax.f32 %v2875_v5, %v2669_v19 }
 0x414   : > { %v2858_v35 = vadd.f32 %v2836_v50, %v2689_v51  ;;  %v3212_v4 = vmax.f32 %v3043_v12, %v2836_v50 }
 0x416   : > { %v3027_v24 = vadd.f32 %v3005_v58, %v2858_v35  ;;  %v8885_v58 = vld [vmem:[#allocation82_spill] sm:$0xff]  ;;  %v5017_v13 = vpop.eup %5016 }
 0x417   : > { %vm3534_vm1 = vweird.f32 %v5017_v13 }
 0x418   : > { %v3196_v32 = vadd.f32 %v3174_v56, %v3027_v24  ;;  %4793 = vmatmul.msk.f32.gmra.mxu0 %vm3248_vm0, %v3212_v4  ;;  %v8883_v56 = vld [vmem:[#allocation51_spill] sm:$0xff] }
 0x419   : > { %v1678_v16 = vadd.f32 %v8883_v56, %v1509_v11  ;;  %v1694_v14 = vmax.f32 %v1525_v41, %v8883_v56 }
 0x41a   : > { %v3228_v23 = vmul.f32 0.0625, %v3196_v32  ;;  %v7871_v32 = vld [vmem:[%s8553_s4] ss:$0 sm:$0xff] }
 0x41b   : > { %v2838_v22 = vpop.f32.mrf.mxu1  ;;  %v1847_v0 = vadd.f32 %v8884_v10, %v1678_v16  ;;  %v1863_v34 = vmax.f32 %v1694_v14, %v8884_v10 }
 0x41c   : > { %v2859_v21 = vadd.f32 %v2838_v22, %v2690_v44  ;;  %4809 = vmatmul.msk.f32.gmra.mxu1 %vm3248_vm0, %v3228_v23  ;;  %v3213_v39 = vmax.f32 %v3044_v27, %v2838_v22 }
 0x41d   : > { %v2016_v57 = vadd.f32 %v8885_v58, %v1847_v0  ;;  %v2032_v3 = vmax.f32 %v1863_v34, %v8886_v8 }
 0x41e   : > { %v3028_v33 = vadd.f32 %v3007_v40, %v2859_v21 }
 0x41f   : > { %v2185_v37 = vadd.f32 %v8889_v53, %v2016_v57  ;;  %v2201_v15 = vmax.f32 %v2032_v3, %v8885_v58 }
 0x420   : > { %v3197_v6 = vadd.f32 %v3176_v29, %v3028_v33  ;;  %4794 = vmatmul.msk.f32.gmra.mxu0 %vm3248_vm0, %v3213_v39  ;;  %v8891_v29 = vld [vmem:[#allocation83_spill] sm:$0xff] }
 0x421   : > { %v2370_v38 = vmax.f32 %v2201_v15, %v8891_v29  ;;  %v2354_v46 = vadd.f32 %v8886_v8, %v2185_v37 }
 0x422   : > { %v3229_v55 = vmul.f32 0.0625, %v3197_v6  ;;  %v3010_v9 = vpop.f32.mrf.mxu2 }
 0x423   : > { %v2841_v63 = vpop.f32.mrf.mxu1  ;;  %v2707_v26 = vmax.f32 %v2538_v7, %v3010_v9  ;;  %v2539_v62 = vmax.f32 %v2370_v38, %v8889_v53  ;;  %v2523_v35 = vadd.f32 %v8891_v29, %v2354_v46  ;;  %v3530_v7 = vmul.f32 128.0, %v5017_v13 }
 0x424   : > { %4810 = vmatmul.msk.f32.gmra.mxu1 %vm3248_vm0, %v3229_v55 }
 0x425   : > { %v2672_v36 = vpop.f32.mrf.mxu0  ;;  %v2876_v50 = vmax.f32 %v2707_v26, %v2841_v63  ;;  %v3531_v53 = vsub.f32 1.0, %v3530_v7  ;;  %v3891_v7 = vld [vmem:[%s8556_s7 + $0x68] sm:$0xff] }
 0x426   : > { %v2691_v28 = vadd.f32 %v2672_v36, %v8890_v52 }
 0x427   : > { %v3045_v40 = vmax.f32 %v2876_v50, %v2672_v36  ;;  %v3532_v37 = vmul.f32 %v5017_v13, %v3531_v53  ;;  %v3890_v53 = vld [vmem:[%s8556_s7 + $0x60] sm:$0xff] }
 0x428   : > { %v2860_v1 = vadd.f32 %v2841_v63, %v2691_v28 }
 0x429   : > { %v3533_v15 = vadd.f32 %v5017_v13, %v3532_v37  ;;  %v3889_v37 = vld [vmem:[%s8556_s7 + $0x58] sm:$0xff] }
 0x42a   : > { %v3012_v12 = vpop.f32.mrf.mxu2  ;;  %v3029_v5 = vadd.f32 %v3010_v9, %v2860_v1 }
 0x42b   : > { %v2843_v18 = vpop.f32.mrf.mxu1  ;;  %v2708_v4 = vmax.f32 %v2539_v62, %v3012_v12  ;;  %v7893_v28 = vsel %vm3534_vm1, %v5017_v13, %v3533_v15  ;;  %v3888_v15 = vld [vmem:[%s8556_s7 + $0x50] sm:$0xff] }
 0x42d   : > { %v2674_v51 = vpop.f32.mrf.mxu0  ;;  %v2877_v23 = vmax.f32 %v2708_v4, %v2843_v18 }
 0x42e   : > { %v2692_v24 = vadd.f32 %v2674_v51, %v2523_v35 }
 0x42f   : > { %v3046_v22 = vmax.f32 %v2877_v23, %v2674_v51 }
 0x430   : > { %v2861_v31 = vadd.f32 %v2843_v18, %v2692_v24 }
 0x432   : > { %v3030_v21 = vadd.f32 %v3012_v12, %v2861_v31 }
 0x433   : > { %v3427_v19 = vpop.f32.mrf.mxu1 }
 0x434   : > { %v3179_v54 = vpop.f32.mrf.mxu3 }
 0x435   : > { %v3214_v48 = vmax.f32 %v3045_v40, %v3179_v54  ;;  %v3198_v30 = vadd.f32 %v3179_v54, %v3029_v5  ;;  %v3314_v59 = vpop.f32.mrf.mxu0 }
 0x436   : > { %v3428_v44 = vadd.f32 %v3427_v19, %v3314_v59 }
 0x437   : > { %v3230_v25 = vmul.f32 0.0625, %v3198_v30  ;;  %4795 = vmatmul.msk.f32.gmra.mxu0 %vm3248_vm0, %v3214_v48 }
 0x438   : > { %v3479_v2 = vadd.f32 %v7871_v32, %v3428_v44 }
 0x439   : > { %4811 = vmatmul.msk.f32.gmra.mxu1 %vm3248_vm0, %v3230_v25 }
 0x43a   : > { %3497 = vadd.xlane.f32.xlu1 %v3479_v2 }
 0x43b   : > { %v3430_v27 = vpop.f32.mrf.mxu1 }
 0x43c   : > { %v3181_v17 = vpop.f32.mrf.mxu3 }
 0x43d   : > { %v3215_v45 = vmax.f32 %v3046_v22, %v3181_v17  ;;  %v3199_v20 = vadd.f32 %v3181_v17, %v3030_v21  ;;  %v3317_v39 = vpop.f32.mrf.mxu0 }
 0x43e   : > { %v3431_v33 = vadd.f32 %v3430_v27, %v3317_v39 }
 0x43f   : > { %v3231_v61 = vmul.f32 0.0625, %v3199_v20  ;;  %4796 = vmatmul.msk.f32.gmra.mxu0 %vm3248_vm0, %v3215_v45  ;;  %v3893_v45 = vld [vmem:[%s8556_s7 + $0x78] sm:$0xff] }
 0x440   : > { %v3480_v49 = vadd.f32 %v7871_v32, %v3431_v33  ;;  %3898 = vmatpush.msra.mxu2 %v3893_v45 }
 0x441   : > { %4812 = vmatmul.msk.f32.gmra.mxu1 %vm3248_vm0, %v3231_v61 }
 0x442   : > { %3499 = vadd.xlane.f32.xlu2 %v3480_v49 }
 0x443   : > { %v3433_v43 = vpop.f32.mrf.mxu1 }
 0x445   : > { %v3320_v6 = vpop.f32.mrf.mxu0 }
 0x446   : > { %v3434_v42 = vadd.f32 %v3433_v43, %v3320_v6 }
 0x448   : > { %v3481_v47 = vadd.f32 %v7871_v32, %v3434_v42 }
 0x44a   : > { %3501 = vadd.xlane.f32.xlu0 %v3481_v47 }
 0x44b   : > { %v3436_v11 = vpop.f32.mrf.mxu1 }
 0x44d   : > { %v3323_v55 = vpop.f32.mrf.mxu0 }
 0x44e   : > { %v3437_v41 = vadd.f32 %v3436_v11, %v3323_v55 }
 0x450   : > { %v3482_v56 = vadd.f32 %v7871_v32, %v3437_v41 }
 0x452   : > { %3503 = vadd.xlane.f32.xlu2 %v3482_v56 }
 0x453   : > { %v3439_v16 = vpop.f32.mrf.mxu1 }
 0x455   : > { %v3326_v63 = vpop.f32.mrf.mxu0 }
 0x456   : > { %v3440_v14 = vadd.f32 %v3439_v16, %v3326_v63 }
 0x458   : > { %v7882_v10 = vadd.f32 %v7871_v32, %v3440_v14 }
 0x45a   : > { %3505 = vadd.xlane.f32.xlu1 %v7882_v10 }
 0x45b   : > { %v3442_v0 = vpop.f32.mrf.mxu1 }
 0x45d   : > { %v3329_v36 = vpop.f32.mrf.mxu0 }
 0x45e   : > { %v3443_v9 = vadd.f32 %v3442_v0, %v3329_v36 }
 0x460   : > { %v7886_v34 = vadd.f32 %v7871_v32, %v3443_v9 }
 0x462   : > { %3507 = vadd.xlane.f32.xlu2 %v7886_v34 }
 0x463   : > { %v3445_v58 = vpop.f32.mrf.mxu1 }
 0x465   : > { %v3332_v57 = vpop.f32.mrf.mxu0 }
 0x466   : > { %v3446_v8 = vadd.f32 %v3445_v58, %v3332_v57 }
 0x468   : > { %v7890_v3 = vadd.f32 %v7871_v32, %v3446_v8 }
 0x46a   : > { %3509 = vadd.xlane.f32.xlu2 %v7890_v3 }
 0x46b   : > { %v3448_v26 = vpop.f32.mrf.mxu1 }
 0x46d   : > { %v3335_v52 = vpop.f32.mrf.mxu0 }
 0x46e   : > { %v3449_v12 = vadd.f32 %v3448_v26, %v3335_v52  ;;  %v3887_v26 = vld [vmem:[%s8556_s7 + $0x48] sm:$0xff]  ;;  %v3886_v52 = vld [vmem:[%s8556_s7 + $0x40] sm:$0xff] }
 0x470   : > { %v7904_v40 = vadd.f32 %v7871_v32, %v3449_v12  ;;  %v3879_v12 = vld [vmem:[%s8556_s7 + $0x8] sm:$0xff] }
 0x473   : > { %v3451_v46 = vpop.f32.mrf.mxu1 }
 0x475   : > { %v3338_v50 = vpop.f32.mrf.mxu0 }
 0x476   : > { %v3452_v54 = vadd.f32 %v3451_v46, %v3338_v50  ;;  %v3883_v46 = vld [vmem:[%s8556_s7 + $0x28] sm:$0xff]  ;;  %v3881_v50 = vld [vmem:[%s8556_s7 + $0x18] sm:$0xff] }
 0x478   : > { %v7913_v59 = vadd.f32 %v7871_v32, %v3452_v54 }
 0x47b   : > { %v3454_v24 = vpop.f32.mrf.mxu1 }
 0x47d   : > { %v3341_v19 = vpop.f32.mrf.mxu0 }
 0x47e   : > { %v3455_v31 = vadd.f32 %v3454_v24, %v3341_v19 }
 0x480   : > { %v7922_v21 = vadd.f32 %v7871_v32, %v3455_v31 }
 0x485   : > { %v3344_v22 = vpop.f32.mrf.mxu0 }
 0x48d   : > { %v3347_v43 = vpop.f32.mrf.mxu0 }
 0x495   : > { %v3350_v14 = vpop.f32.mrf.mxu0 }
 0x49d   : > { %v3353_v8 = vpop.f32.mrf.mxu0 }
 0x4ad   : > { %v3498_v18 = vpop.xlane.xlu1 %3497 }
 0x4ae   : > { %v3536_v29 = vmul.f32 %v7893_v28, %v3498_v18  ;;  %v3885_v18 = vld [vmem:[%s8556_s7 + $0x38] sm:$0xff] }
 0x4b0   : > { %v7896_v38 = vsub.f32 %v3479_v2, %v3536_v29  ;;  %v3457_v2 = vpop.f32.mrf.mxu1  ;;  %v3884_v29 = vld [vmem:[%s8556_s7 + $0x30] sm:$0xff] }
 0x4b1   : > { %v3458_v39 = vadd.f32 %v3457_v2, %v3344_v22 }
 0x4b2   : > { %v3568_v51 = vmul.f32 %v7896_v38, %v7896_v38 }
 0x4b3   : > { %v7935_v6 = vadd.f32 %v7871_v32, %v3458_v39 }
 0x4b4   : > { %3584 = vadd.xlane.f32.xlu1 %v3568_v51  ;;  %v3882_v51 = vld [vmem:[%s8556_s7 + $0x20] sm:$0xff] }
 0x4b5   : > { %v3500_v1 = vpop.xlane.xlu2 %3499 }
 0x4b6   : > { %v3537_v62 = vmul.f32 %v7893_v28, %v3500_v1  ;;  %v3880_v1 = vld [vmem:[%s8556_s7 + $0x10] sm:$0xff] }
 0x4b8   : > { %v7901_v35 = vsub.f32 %v3480_v49, %v3537_v62  ;;  %v3460_v49 = vpop.f32.mrf.mxu1  ;;  %v3878_v62 = vld [vmem:[%s8556_s7] sm:$0xff] }
 0x4b9   : > { %v3461_v11 = vadd.f32 %v3460_v49, %v3347_v43 }
 0x4ba   : > { %v3569_v4 = vmul.f32 %v7901_v35, %v7901_v35 }
 0x4bb   : > { %v7945_v16 = vadd.f32 %v7871_v32, %v3461_v11 }
 0x4bc   : > { %3586 = vadd.xlane.f32.xlu0 %v3569_v4  ;;  %3511 = vadd.xlane.f32.xlu1 %v7904_v40 }
 0x4bd   : > { %v3502_v5 = vpop.xlane.xlu0 %3501 }
 0x4be   : > { %v3538_v48 = vmul.f32 %v7893_v28, %v3502_v5 }
 0x4c0   : > { %v7910_v30 = vsub.f32 %v3481_v47, %v3538_v48 }
 0x4c2   : > { %v3570_v44 = vmul.f32 %v7910_v30, %v7910_v30 }
 0x4c4   : > { %3588 = vadd.xlane.f32.xlu2 %v3570_v44  ;;  %3513 = vadd.xlane.f32.xlu0 %v7913_v59 }
 0x4c5   : > { %v3504_v23 = vpop.xlane.xlu2 %3503 }
 0x4c6   : > { %v3539_v25 = vmul.f32 %v7893_v28, %v3504_v23 }
 0x4c8   : > { %v7919_v27 = vsub.f32 %v3482_v56, %v3539_v25  ;;  %v3463_v56 = vpop.f32.mrf.mxu1 }
 0x4c9   : > { %v3464_v0 = vadd.f32 %v3463_v56, %v3350_v14 }
 0x4ca   : > { %v3571_v17 = vmul.f32 %v7919_v27, %v7919_v27 }
 0x4cc   : > { %3515 = vadd.xlane.f32.xlu2 %v7922_v21  ;;  %3590 = vadd.xlane.f32.xlu1 %v3571_v17 }
 0x4cd   : > { %v3506_v20 = vpop.xlane.xlu1 %3505 }
 0x4ce   : > { %v3540_v33 = vmul.f32 %v7893_v28, %v3506_v20  ;;  %v3356_v20 = vpop.f32.mrf.mxu0 }
 0x4d0   : > { %v7932_v61 = vsub.f32 %v7882_v10, %v3540_v33  ;;  %v3466_v57 = vpop.f32.mrf.mxu1 }
 0x4d1   : > { %v3467_v60 = vadd.f32 %v3466_v57, %v3353_v8 }
 0x4d2   : > { %v3572_v42 = vmul.f32 %v7932_v61, %v7932_v61 }
 0x4d3   : > { %v7961_v13 = vadd.f32 %v7871_v32, %v3467_v60  ;;  %v8037_v60 = vld [vmem:[%s8555_s6] ss:$0 sm:$0xff] }
 0x4d4   : > { %3517 = vadd.xlane.f32.xlu1 %v7935_v6  ;;  %3592 = vadd.xlane.f32.xlu0 %v3572_v42 }
 0x4d5   : > { %v3508_v47 = vpop.xlane.xlu2 %3507 }
 0x4d6   : > { %v3541_v55 = vmul.f32 %v7893_v28, %v3508_v47 }
 0x4d8   : > { %v7942_v41 = vsub.f32 %v7886_v34, %v3541_v55  ;;  %v7955_v34 = vadd.f32 %v7871_v32, %v3464_v0  ;;  %v3469_v22 = vpop.f32.mrf.mxu1  ;;  %v8028_v0 = vld [vmem:[%s8554_s5] ss:$0 sm:$0xff] }
 0x4d9   : > { %v3470_v43 = vadd.f32 %v3469_v22, %v3356_v20 }
 0x4da   : > { %v3573_v63 = vmul.f32 %v7942_v41, %v7942_v41 }
 0x4dc   : > { %3594 = vadd.xlane.f32.xlu2 %v3573_v63  ;;  %3519 = vadd.xlane.f32.xlu0 %v7945_v16 }
 0x4dd   : > { %v3510_v10 = vpop.xlane.xlu2 %3509 }
 0x4de   : > { %v3542_v36 = vmul.f32 %v7893_v28, %v3510_v10  ;;  %v8023_v10 = vadd.f32 %v7871_v32, %v3470_v43 }
 0x4e0   : > { %v7952_v9 = vsub.f32 %v7890_v3, %v3542_v36  ;;  %v3892_v3 = vld [vmem:[%s8556_s7 + $0x70] sm:$0xff]  ;;  %v3472_v57 = vpop.f32.mrf.mxu1 }
 0x4e1   : > { %3899 = vmatpush.msra.mxu2 %v3892_v3 }
 0x4e2   : > { %v3574_v58 = vmul.f32 %v7952_v9, %v7952_v9 }
 0x4e3   : > { %3900 = vmatpush.msra.mxu2 %v3891_v7 }
 0x4e4   : > { %3521 = vadd.xlane.f32.xlu2 %v7955_v34  ;;  %3596 = vadd.xlane.f32.xlu1 %v3574_v58 }
 0x4e5   : > { %3901 = vmatpush.msra.mxu2 %v3890_v53 }
 0x4e7   : > { %3902 = vmatpush.msra.mxu2 %v3889_v37  ;;  %v3359_v37 = vpop.f32.mrf.mxu0 }
 0x4e9   : > { %3903 = vmatpush.msra.mxu2 %v3888_v15 }
 0x4eb   : > { %3904 = vmatpush.msra.mxu2 %v3887_v26 }
 0x4ec   : > { %3523 = vadd.xlane.f32.xlu1 %v7961_v13 }
 0x4ed   : > { %3905 = vmatpush.msra.mxu2 %v3886_v52 }
 0x4ef   : > { %3906 = vmatpush.msra.mxu2 %v3885_v18  ;;  %v3473_v18 = vadd.f32 %v3472_v57, %v3359_v37 }
 0x4f1   : > { %3907 = vmatpush.msra.mxu2 %v3884_v29 }
 0x4f3   : > { %3908 = vmatpush.msra.mxu2 %v3883_v46 }
 0x4f5   : > { %3909 = vmatpush.msra.mxu2 %v3882_v51 }
 0x4f7   : > { %3910 = vmatpush.msra.mxu2 %v3881_v50 }
 0x4f9   : > { %3911 = vmatpush.msra.mxu2 %v3880_v1 }
 0x4fb   : > { %3912 = vmatpush.msra.mxu2 %v3879_v12 }
 0x4fd   : > { %3913 = vmatpush.msra.mxu2 %v3878_v62 }
 0x527   : > { %v3585_v4 = vpop.xlane.xlu1 %3584 }
 0x528   : > { %v3616_v24 = vmul.f32 %v3585_v4, %v7893_v28 }
 0x52a   : > { %v3632_v19 = vadd.f32 1e-05, %v3616_v24  ;;  %v8049_v24 = vadd.f32 %v7871_v32, %v3473_v18 }
 0x52c   : > { %5018 = vrsqrt.f32 %v3632_v19  ;;  %vm3654_vm3 = vweird.f32 %v3632_v19 }
 0x52f   : > { %v3587_v5 = vpop.xlane.xlu0 %3586  ;;  %v3512_v54 = vpop.xlane.xlu1 %3511 }
 0x530   : > { %v3617_v48 = vmul.f32 %v3587_v5, %v7893_v28  ;;  %v3543_v44 = vmul.f32 %v7893_v28, %v3512_v54 }
 0x532   : > { %v5019_v23 = vpop.eup %5018  ;;  %v3633_v31 = vadd.f32 1e-05, %v3617_v48  ;;  %v8013_v25 = vsub.f32 %v7904_v40, %v3543_v44 }
 0x533   : > { %v3649_v2 = vmul.f32 %v5019_v23, %v3632_v19  ;;  %vm3655_vm2 = vweird.f32 %v5019_v23 }
 0x534   : > { %5020 = vrsqrt.f32 %v3633_v31  ;;  %v3575_v17 = vmul.f32 %v8013_v25, %v8013_v25  ;;  %vm3656_vm4 = vmor %vm3654_vm3, %vm3655_vm2  ;;  %vm3664_vm6 = vweird.f32 %v3633_v31 }
 0x535   : > { %v3650_v45 = vmul.f32 %v5019_v23, %v3649_v2 }
 0x536   : > { %3598 = vadd.xlane.f32.xlu0 %v3575_v17 }
 0x537   : > { %v3651_v39 = vmul.f32 0.5, %v3650_v45  ;;  %v3514_v33 = vpop.xlane.xlu0 %3513  ;;  %v3589_v49 = vpop.xlane.xlu2 %3588 }
 0x538   : > { %v3544_v42 = vmul.f32 %v7893_v28, %v3514_v33  ;;  %v3618_v47 = vmul.f32 %v3589_v49, %v7893_v28 }
 0x539   : > { %v3652_v11 = vsub.f32 1.5, %v3651_v39 }
 0x53a   : > { %v5021_v40 = vpop.eup %5020  ;;  %v8020_v55 = vsub.f32 %v7913_v59, %v3544_v42  ;;  %v3634_v56 = vadd.f32 1e-05, %v3618_v47 }
 0x53b   : > { %v3653_v63 = vmul.f32 %v5019_v23, %v3652_v11  ;;  %v3659_v14 = vmul.f32 %v5021_v40, %v3633_v31  ;;  %vm3665_vm5 = vweird.f32 %v5021_v40 }
 0x53c   : > { %5022 = vrsqrt.f32 %v3634_v56  ;;  %v3576_v36 = vmul.f32 %v8020_v55, %v8020_v55  ;;  %vm3666_vm7 = vmor %vm3664_vm6, %vm3665_vm5  ;;  %vm3674_vm9 = vweird.f32 %v3634_v56 }
 0x53d   : > { %v3657_v58 = vsel %vm3656_vm4, %v5019_v23, %v3653_v63  ;;  %v3660_v59 = vmul.f32 %v5021_v40, %v3659_v14 }
 0x53e   : > { %v3808_v8 = vmul.f32 %v3657_v58, %v7896_v38  ;;  %3600 = vadd.xlane.f32.xlu2 %v3576_v36  ;;  %3525 = vadd.xlane.f32.xlu0 %v8023_v10 }
 0x53f   : > { %v3661_v3 = vmul.f32 0.5, %v3660_v59  ;;  %v3516_v7 = vpop.xlane.xlu2 %3515  ;;  %v3591_v53 = vpop.xlane.xlu1 %3590 }
 0x540   : > { %v3827_v15 = vmul.f32 %v8028_v0, %v3808_v8  ;;  %v3545_v26 = vmul.f32 %v7893_v28, %v3516_v7  ;;  %v3619_v52 = vmul.f32 %v3591_v53, %v7893_v28 }
 0x541   : > { %v3662_v38 = vsub.f32 1.5, %v3661_v3 }
 0x542   : > { %v5023_v29 = vpop.eup %5022  ;;  %v8043_v46 = vsub.f32 %v7922_v21, %v3545_v26  ;;  %v3635_v51 = vadd.f32 1e-05, %v3619_v52  ;;  %v3846_v50 = vadd.f32 %v8037_v60, %v3827_v15 }
 0x543   : > { %v3663_v1 = vmul.f32 %v5021_v40, %v3662_v38  ;;  %v3669_v12 = vmul.f32 %v5023_v29, %v3634_v56  ;;  %vm3675_vm8 = vweird.f32 %v5023_v29 }
 0x544   : > { %5024 = vrsqrt.f32 %v3635_v51  ;;  %v3577_v62 = vmul.f32 %v8043_v46, %v8043_v46  ;;  %v3862_v4 = vmax.f32 %v3846_v50, 0.0  ;;  %vm3676_vm10 = vmor %vm3674_vm9, %vm3675_vm8  ;;  %vm3684_vm12 = vweird.f32 %v3635_v51 }
 0x545   : > { %v3667_v19 = vsel %vm3666_vm7, %v5021_v40, %v3663_v1  ;;  %v3670_v5 = vmul.f32 %v5023_v29, %v3669_v12 }
 0x546   : > { %3602 = vadd.xlane.f32.xlu1 %v3577_v62  ;;  %3914 = vmatmul.f32.vlgmr.msra.gmra.mxu2 %v3862_v4  ;;  %v3809_v21 = vmul.f32 %v3667_v19, %v7901_v35 }
 0x547   : > { %v3671_v54 = vmul.f32 0.5, %v3670_v5  ;;  %3527 = vadd.xlane.f32.xlu2 %v8049_v24  ;;  %v3593_v48 = vpop.xlane.xlu0 %3592  ;;  %v3518_v44 = vpop.xlane.xlu1 %3517 }
 0x548   : > { %v3620_v23 = vmul.f32 %v3593_v48, %v7893_v28  ;;  %v3546_v31 = vmul.f32 %v7893_v28, %v3518_v44  ;;  %v3828_v2 = vmul.f32 %v8028_v0, %v3809_v21 }
 0x549   : > { %v3672_v22 = vsub.f32 1.5, %v3671_v54 }
 0x54a   : > { %v5025_v32 = vpop.eup %5024  ;;  %v3636_v17 = vadd.f32 1e-05, %v3620_v23  ;;  %v8057_v45 = vsub.f32 %v7935_v6, %v3546_v31  ;;  %v3847_v35 = vadd.f32 %v8037_v60, %v3828_v2 }
 0x54b   : > { %v3673_v20 = vmul.f32 %v5023_v29, %v3672_v22  ;;  %v3679_v39 = vmul.f32 %v5025_v32, %v3635_v51  ;;  %vm3685_vm11 = vweird.f32 %v5025_v32 }
 0x54c   : > { %5026 = vrsqrt.f32 %v3636_v17  ;;  %v3863_v33 = vmax.f32 %v3847_v35, 0.0  ;;  %v3578_v49 = vmul.f32 %v8057_v45, %v8057_v45  ;;  %vm3686_vm13 = vmor %vm3684_vm12, %vm3685_vm11  ;;  %vm3694_vm15 = vweird.f32 %v3636_v17 }
 0x54d   : > { %v3677_v43 = vsel %vm3676_vm10, %v5023_v29, %v3673_v20  ;;  %v3680_v42 = vmul.f32 %v5025_v32, %v3679_v39 }
 0x54e   : > { %3917 = vmatmul.f32.gmra.mxu2 %v3863_v33  ;;  %3604 = vadd.xlane.f32.xlu0 %v3578_v49  ;;  %v3810_v47 = vmul.f32 %v3677_v43, %v7910_v30 }
 0x54f   : > { %v3681_v11 = vmul.f32 0.5, %v3680_v42  ;;  %v3595_v6 = vpop.xlane.xlu2 %3594  ;;  %v3520_v40 = vpop.xlane.xlu0 %3519 }
 0x550   : > { %v3621_v63 = vmul.f32 %v3595_v6, %v7893_v28  ;;  %v3547_v56 = vmul.f32 %v7893_v28, %v3520_v40  ;;  %v3829_v14 = vmul.f32 %v8028_v0, %v3810_v47 }
 0x551   : > { %v3682_v36 = vsub.f32 1.5, %v3681_v11 }
 0x552   : > { %v5027_v58 = vpop.eup %5026  ;;  %v3637_v59 = vadd.f32 1e-05, %v3621_v63  ;;  %v8067_v57 = vsub.f32 %v7945_v16, %v3547_v56  ;;  %v3848_v8 = vadd.f32 %v8037_v60, %v3829_v14 }
 0x553   : > { %v3683_v3 = vmul.f32 %v5025_v32, %v3682_v36  ;;  %v3689_v30 = vmul.f32 %v5027_v58, %v3636_v17  ;;  %vm3695_vm14 = vweird.f32 %v5027_v58 }
 0x554   : > { %5028 = vrsqrt.f32 %v3637_v59  ;;  %v3579_v7 = vmul.f32 %v8067_v57, %v8067_v57  ;;  %v3864_v53 = vmax.f32 %v3848_v8, 0.0  ;;  %vm3696_vm0 = vmor %vm3694_vm15, %vm3695_vm14  ;;  %vm3704_vm2 = vweird.f32 %v3637_v59 }
 0x555   : > { %v3687_v37 = vsel %vm3686_vm13, %v5025_v32, %v3683_v3  ;;  %v3690_v15 = vmul.f32 %v5027_v58, %v3689_v30 }
 0x556   : > { %3606 = vadd.xlane.f32.xlu1 %v3579_v7  ;;  %3920 = vmatmul.f32.gmra.mxu2 %v3864_v53  ;;  %v3811_v26 = vmul.f32 %v3687_v37, %v7919_v27 }
 0x557   : > { %v3691_v52 = vmul.f32 0.5, %v3690_v15  ;;  %v3522_v16 = vpop.xlane.xlu2 %3521  ;;  %v3597_v18 = vpop.xlane.xlu1 %3596 }
 0x558   : > { %v3548_v38 = vmul.f32 %v7893_v28, %v3522_v16  ;;  %v3622_v29 = vmul.f32 %v3597_v18, %v7893_v28  ;;  %v3830_v51 = vmul.f32 %v8028_v0, %v3811_v26 }
 0x559   : > { %v3692_v50 = vsub.f32 1.5, %v3691_v52 }
 0x55a   : > { %v5029_v1 = vpop.eup %5028  ;;  %v8077_v12 = vsub.f32 %v7955_v34, %v3548_v38  ;;  %v3638_v62 = vadd.f32 1e-05, %v3622_v29  ;;  %v3849_v4 = vadd.f32 %v8037_v60, %v3830_v51 }
 0x55b   : > { %v3693_v19 = vmul.f32 %v5027_v58, %v3692_v50  ;;  %v3699_v27 = vmul.f32 %v5029_v1, %v3637_v59  ;;  %vm3705_vm1 = vweird.f32 %v5029_v1 }
 0x55c   : > { %5030 = vrsqrt.f32 %v3638_v62  ;;  %v3865_v5 = vmax.f32 %v3849_v4, 0.0  ;;  %v3580_v21 = vmul.f32 %v8077_v12, %v8077_v12  ;;  %vm3706_vm3 = vmor %vm3704_vm2, %vm3705_vm1  ;;  %vm3714_vm5 = vweird.f32 %v3638_v62 }
 0x55d   : > { %v3697_v54 = vsel %vm3696_vm0, %v5027_v58, %v3693_v19  ;;  %v3700_v48 = vmul.f32 %v5029_v1, %v3699_v27 }
 0x55e   : > { %3923 = vmatmul.f32.gmra.mxu2 %v3865_v5  ;;  %3608 = vadd.xlane.f32.xlu2 %v3580_v21  ;;  %v3812_v44 = vmul.f32 %v3697_v54, %v7932_v61 }
 0x55f   : > { %v3701_v34 = vmul.f32 0.5, %v3700_v48  ;;  %v3524_v23 = vpop.xlane.xlu1 %3523 }
 0x560   : > { %v3549_v31 = vmul.f32 %v7893_v28, %v3524_v23  ;;  %v3831_v2 = vmul.f32 %v8028_v0, %v3812_v44 }
 0x561   : > { %v3702_v22 = vsub.f32 1.5, %v3701_v34 }
 0x562   : > { %v5031_v32 = vpop.eup %5030  ;;  %v8086_v17 = vsub.f32 %v7961_v13, %v3549_v31  ;;  %v3850_v35 = vadd.f32 %v8037_v60, %v3831_v2 }
 0x563   : > { %v3703_v20 = vmul.f32 %v5029_v1, %v3702_v22  ;;  %v3709_v39 = vmul.f32 %v5031_v32, %v3638_v62  ;;  %vm3715_vm4 = vweird.f32 %v5031_v32 }
 0x564   : > { %v3866_v33 = vmax.f32 %v3850_v35, 0.0  ;;  %v3581_v61 = vmul.f32 %v8086_v17, %v8086_v17  ;;  %vm3716_vm6 = vmor %vm3714_vm5, %vm3715_vm4 }
 0x565   : > { %v3707_v49 = vsel %vm3706_vm3, %v5029_v1, %v3703_v20  ;;  %v3710_v43 = vmul.f32 %v5031_v32, %v3709_v39 }
 0x566   : > { %3926 = vmatmul.f32.gmra.mxu2 %v3866_v33  ;;  %3610 = vadd.xlane.f32.xlu0 %v3581_v61  ;;  %v3813_v42 = vmul.f32 %v3707_v49, %v7942_v41 }
 0x567   : > { %v3711_v47 = vmul.f32 0.5, %v3710_v43 }
 0x568   : > { %v3832_v13 = vmul.f32 %v8028_v0, %v3813_v42 }
 0x569   : > { %v3712_v11 = vsub.f32 1.5, %v3711_v47 }
 0x56a   : > { %v3851_v6 = vadd.f32 %v8037_v60, %v3832_v13 }
 0x56b   : > { %v3713_v40 = vmul.f32 %v5031_v32, %v3712_v11 }
 0x56c   : > { %v3867_v63 = vmax.f32 %v3851_v6, 0.0 }
 0x56d   : > { %v3717_v56 = vsel %vm3716_vm6, %v5031_v32, %v3713_v40 }
 0x56e   : > { %3929 = vmatmul.f32.gmra.mxu2 %v3867_v63  ;;  %v3814_v14 = vmul.f32 %v3717_v56, %v7952_v9 }
 0x570   : > { %v3833_v36 = vmul.f32 %v8028_v0, %v3814_v14 }
 0x572   : > { %v3852_v58 = vadd.f32 %v8037_v60, %v3833_v36 }
 0x574   : > { %v3868_v41 = vmax.f32 %v3852_v58, 0.0 }
 0x576   : > { %3932 = vmatmul.f32.gmra.mxu2 %v3868_v41 }
 0x5a9   : > { %v3599_v59 = vpop.xlane.xlu0 %3598 }
 0x5aa   : > { %v3623_v8 = vmul.f32 %v3599_v59, %v7893_v28 }
 0x5ac   : > { %v3639_v3 = vadd.f32 1e-05, %v3623_v8 }
 0x5ae   : > { %5032 = vrsqrt.f32 %v3639_v3  ;;  %vm3724_vm8 = vweird.f32 %v3639_v3 }
 0x5b1   : > { %v3601_v30 = vpop.xlane.xlu2 %3600  ;;  %v3526_v7 = vpop.xlane.xlu0 %3525 }
 0x5b2   : > { %v3624_v53 = vmul.f32 %v3601_v30, %v7893_v28  ;;  %v3550_v37 = vmul.f32 %v7893_v28, %v3526_v7 }
 0x5b4   : > { %v5033_v15 = vpop.eup %5032  ;;  %v3640_v26 = vadd.f32 1e-05, %v3624_v53  ;;  %v8101_v9 = vsub.f32 %v8023_v10, %v3550_v37 }
 0x5b5   : > { %v3719_v52 = vmul.f32 %v5033_v15, %v3639_v3  ;;  %vm3725_vm7 = vweird.f32 %v5033_v15 }
 0x5b6   : > { %5034 = vrsqrt.f32 %v3640_v26  ;;  %v3582_v16 = vmul.f32 %v8101_v9, %v8101_v9  ;;  %vm3726_vm9 = vmor %vm3724_vm8, %vm3725_vm7  ;;  %vm3734_vm11 = vweird.f32 %v3640_v26 }
 0x5b7   : > { %v3720_v18 = vmul.f32 %v5033_v15, %v3719_v52 }
 0x5b8   : > { %3612 = vadd.xlane.f32.xlu1 %v3582_v16 }
 0x5b9   : > { %v3721_v38 = vmul.f32 0.5, %v3720_v18  ;;  %v3603_v29 = vpop.xlane.xlu1 %3602 }
 0x5ba   : > { %v3625_v51 = vmul.f32 %v3603_v29, %v7893_v28  ;;  %v3528_v50 = vpop.xlane.xlu2 %3527 }
 0x5bb   : > { %v3722_v1 = vsub.f32 1.5, %v3721_v38  ;;  %v3551_v62 = vmul.f32 %v7893_v28, %v3528_v50 }
 0x5bc   : > { %v5035_v4 = vpop.eup %5034  ;;  %v3641_v19 = vadd.f32 1e-05, %v3625_v51 }
 0x5bd   : > { %v3723_v10 = vmul.f32 %v5033_v15, %v3722_v1  ;;  %v3729_v27 = vmul.f32 %v5035_v4, %v3640_v26  ;;  %v8108_v5 = vsub.f32 %v8049_v24, %v3551_v62  ;;  %vm3735_vm10 = vweird.f32 %v5035_v4 }
 0x5be   : > { %5036 = vrsqrt.f32 %v3641_v19  ;;  %vm3736_vm12 = vmor %vm3734_vm11, %vm3735_vm10  ;;  %vm3744_vm14 = vweird.f32 %v3641_v19 }
 0x5bf   : > { %v3727_v21 = vsel %vm3726_vm9, %v5033_v15, %v3723_v10  ;;  %v3730_v54 = vmul.f32 %v5035_v4, %v3729_v27  ;;  %v3583_v48 = vmul.f32 %v8108_v5, %v8108_v5 }
 0x5c0   : > { %v3815_v44 = vmul.f32 %v3727_v21, %v8013_v25  ;;  %v8119_v25 = vld [vmem:[%s8557_s8] ss:$0 sm:$0xff] }
 0x5c1   : > { %v3731_v34 = vmul.f32 0.5, %v3730_v54  ;;  %3614 = vadd.xlane.f32.xlu2 %v3583_v48  ;;  %v3605_v23 = vpop.xlane.xlu0 %3604 }
 0x5c2   : > { %v3626_v31 = vmul.f32 %v3605_v23, %v7893_v28  ;;  %v3834_v2 = vmul.f32 %v8028_v0, %v3815_v44 }
 0x5c3   : > { %v3732_v22 = vsub.f32 1.5, %v3731_v34 }
 0x5c4   : > { %v5037_v24 = vpop.eup %5036  ;;  %v3642_v32 = vadd.f32 1e-05, %v3626_v31  ;;  %v3853_v35 = vadd.f32 %v8037_v60, %v3834_v2 }
 0x5c5   : > { %v3733_v20 = vmul.f32 %v5035_v4, %v3732_v22  ;;  %v3739_v39 = vmul.f32 %v5037_v24, %v3641_v19  ;;  %vm3745_vm13 = vweird.f32 %v5037_v24 }
 0x5c6   : > { %5038 = vrsqrt.f32 %v3642_v32  ;;  %v3869_v33 = vmax.f32 %v3853_v35, 0.0  ;;  %vm3746_vm15 = vmor %vm3744_vm14, %vm3745_vm13  ;;  %vm3754_vm1 = vweird.f32 %v3642_v32 }
 0x5c7   : > { %v3737_v61 = vsel %vm3736_vm12, %v5035_v4, %v3733_v20  ;;  %v3740_v49 = vmul.f32 %v5037_v24, %v3739_v39 }
 0x5c8   : > { %3935 = vmatmul.f32.gmra.mxu2 %v3869_v33  ;;  %v3816_v43 = vmul.f32 %v3737_v61, %v8020_v55 }
 0x5c9   : > { %v3741_v42 = vmul.f32 0.5, %v3740_v49  ;;  %v3915_v47 = vpop.f32.mrf.mxu2  ;;  %v3607_v13 = vpop.xlane.xlu1 %3606 }
 0x5ca   : > { %v8123_v11 = vadd.f32 %v8119_v25, %v3915_v47  ;;  %v3627_v6 = vmul.f32 %v3607_v13, %v7893_v28  ;;  %v3835_v40 = vmul.f32 %v8028_v0, %v3816_v43 }
 0x5cb   : > { %v3742_v63 = vsub.f32 1.5, %v3741_v42 }
 0x5cc   : > { %v5039_v56 = vpop.eup %5038  ;;  %v3643_v14 = vadd.f32 1e-05, %v3627_v6  ;;  %3965 = vadd.xlane.f32.xlu0 %v8123_v11  ;;  %v3854_v36 = vadd.f32 %v8037_v60, %v3835_v40 }
 0x5cd   : > { %v3743_v58 = vmul.f32 %v5037_v24, %v3742_v63  ;;  %v3749_v55 = vmul.f32 %v5039_v56, %v3642_v32  ;;  %vm3755_vm0 = vweird.f32 %v5039_v56 }
 0x5ce   : > { %5040 = vrsqrt.f32 %v3643_v14  ;;  %v3870_v41 = vmax.f32 %v3854_v36, 0.0  ;;  %vm3756_vm2 = vmor %vm3754_vm1, %vm3755_vm0  ;;  %vm3764_vm4 = vweird.f32 %v3643_v14 }
 0x5cf   : > { %v3747_v59 = vsel %vm3746_vm15, %v5037_v24, %v3743_v58  ;;  %v3750_v8 = vmul.f32 %v5039_v56, %v3749_v55 }
 0x5d0   : > { %3938 = vmatmul.f32.gmra.mxu2 %v3870_v41  ;;  %v3817_v3 = vmul.f32 %v3747_v59, %v8043_v46 }
 0x5d1   : > { %v3751_v30 = vmul.f32 0.5, %v3750_v8  ;;  %v3918_v7 = vpop.f32.mrf.mxu2  ;;  %v3609_v53 = vpop.xlane.xlu2 %3608 }
 0x5d2   : > { %v8131_v37 = vadd.f32 %v8119_v25, %v3918_v7  ;;  %v3628_v15 = vmul.f32 %v3609_v53, %v7893_v28  ;;  %v3836_v26 = vmul.f32 %v8028_v0, %v3817_v3 }
 0x5d3   : > { %v3752_v52 = vsub.f32 1.5, %v3751_v30 }
 0x5d4   : > { %v5041_v16 = vpop.eup %5040  ;;  %v3644_v18 = vadd.f32 1e-05, %v3628_v15  ;;  %3967 = vadd.xlane.f32.xlu1 %v8131_v37  ;;  %v3855_v38 = vadd.f32 %v8037_v60, %v3836_v26 }
 0x5d5   : > { %v3753_v29 = vmul.f32 %v5039_v56, %v3752_v52  ;;  %v3759_v46 = vmul.f32 %v5041_v16, %v3643_v14  ;;  %vm3765_vm3 = vweird.f32 %v5041_v16 }
 0x5d6   : > { %5042 = vrsqrt.f32 %v3644_v18  ;;  %v3871_v51 = vmax.f32 %v3855_v38, 0.0  ;;  %vm3766_vm5 = vmor %vm3764_vm4, %vm3765_vm3  ;;  %vm3774_vm7 = vweird.f32 %v3644_v18 }
 0x5d7   : > { %v3757_v50 = vsel %vm3756_vm2, %v5039_v56, %v3753_v29  ;;  %v3760_v1 = vmul.f32 %v5041_v16, %v3759_v46 }
 0x5d8   : > { %3941 = vmatmul.f32.gmra.mxu2 %v3871_v51  ;;  %v3818_v62 = vmul.f32 %v3757_v50, %v8057_v45 }
 0x5d9   : > { %v3761_v4 = vmul.f32 0.5, %v3760_v1  ;;  %v3921_v19 = vpop.f32.mrf.mxu2  ;;  %v3611_v10 = vpop.xlane.xlu0 %3610 }
 0x5da   : > { %v8139_v27 = vadd.f32 %v8119_v25, %v3921_v19  ;;  %v3629_v21 = vmul.f32 %v3611_v10, %v7893_v28  ;;  %v3837_v54 = vmul.f32 %v8028_v0, %v3818_v62 }
 0x5db   : > { %v3762_v48 = vsub.f32 1.5, %v3761_v4 }
 0x5dc   : > { %v5043_v44 = vpop.eup %5042  ;;  %v3645_v34 = vadd.f32 1e-05, %v3629_v21  ;;  %3969 = vadd.xlane.f32.xlu2 %v8139_v27  ;;  %v3856_v23 = vadd.f32 %v8037_v60, %v3837_v54 }
 0x5dd   : > { %v3763_v31 = vmul.f32 %v5041_v16, %v3762_v48  ;;  %v3769_v45 = vmul.f32 %v5043_v44, %v3644_v18  ;;  %vm3775_vm6 = vweird.f32 %v5043_v44 }
 0x5de   : > { %5044 = vrsqrt.f32 %v3645_v34  ;;  %v3872_v2 = vmax.f32 %v3856_v23, 0.0  ;;  %vm3776_vm8 = vmor %vm3774_vm7, %vm3775_vm6  ;;  %vm3784_vm10 = vweird.f32 %v3645_v34 }
 0x5df   : > { %v3767_v22 = vsel %vm3766_vm5, %v5041_v16, %v3763_v31  ;;  %v3770_v24 = vmul.f32 %v5043_v44, %v3769_v45 }
 0x5e0   : > { %3944 = vmatmul.f32.gmra.mxu2 %v3872_v2  ;;  %v3819_v32 = vmul.f32 %v3767_v22, %v8067_v57 }
 0x5e1   : > { %v3771_v35 = vmul.f32 0.5, %v3770_v24  ;;  %v3924_v20 = vpop.f32.mrf.mxu2 }
 0x5e2   : > { %v8147_v39 = vadd.f32 %v8119_v25, %v3924_v20  ;;  %v3838_v33 = vmul.f32 %v8028_v0, %v3819_v32 }
 0x5e3   : > { %v3772_v61 = vsub.f32 1.5, %v3771_v35 }
 0x5e4   : > { %v5045_v49 = vpop.eup %5044  ;;  %3971 = vadd.xlane.f32.xlu0 %v8147_v39  ;;  %v3857_v43 = vadd.f32 %v8037_v60, %v3838_v33 }
 0x5e5   : > { %v3773_v42 = vmul.f32 %v5043_v44, %v3772_v61  ;;  %v3779_v47 = vmul.f32 %v5045_v49, %v3645_v34  ;;  %vm3785_vm9 = vweird.f32 %v5045_v49 }
 0x5e6   : > { %v3873_v13 = vmax.f32 %v3857_v43, 0.0  ;;  %vm3786_vm11 = vmor %vm3784_vm10, %vm3785_vm9 }
 0x5e7   : > { %v3777_v57 = vsel %vm3776_vm8, %v5043_v44, %v3773_v42  ;;  %v3780_v6 = vmul.f32 %v5045_v49, %v3779_v47 }
 0x5e8   : > { %3947 = vmatmul.f32.gmra.mxu2 %v3873_v13  ;;  %v3820_v40 = vmul.f32 %v3777_v57, %v8077_v12 }
 0x5e9   : > { %v3781_v63 = vmul.f32 0.5, %v3780_v6  ;;  %v3927_v56 = vpop.f32.mrf.mxu2 }
 0x5ea   : > { %v8154_v14 = vadd.f32 %v8119_v25, %v3927_v56  ;;  %v3839_v36 = vmul.f32 %v8028_v0, %v3820_v40 }
 0x5eb   : > { %v3782_v58 = vsub.f32 1.5, %v3781_v63 }
 0x5ec   : > { %3973 = vadd.xlane.f32.xlu1 %v8154_v14  ;;  %v3858_v55 = vadd.f32 %v8037_v60, %v3839_v36 }
 0x5ed   : > { %v3783_v41 = vmul.f32 %v5045_v49, %v3782_v58 }
 0x5ee   : > { %v3874_v59 = vmax.f32 %v3858_v55, 0.0 }
 0x5ef   : > { %v3787_v8 = vsel %vm3786_vm11, %v5045_v49, %v3783_v41 }
 0x5f0   : > { %3950 = vmatmul.f32.gmra.mxu2 %v3874_v59  ;;  %v3821_v12 = vmul.f32 %v3787_v8, %v8086_v17 }
 0x5f1   : > { %v3930_v3 = vpop.f32.mrf.mxu2 }
 0x5f2   : > { %v8161_v30 = vadd.f32 %v8119_v25, %v3930_v3  ;;  %v3840_v7 = vmul.f32 %v8028_v0, %v3821_v12 }
 0x5f4   : > { %3975 = vadd.xlane.f32.xlu2 %v8161_v30  ;;  %v3859_v53 = vadd.f32 %v8037_v60, %v3840_v7 }
 0x5f6   : > { %v3875_v15 = vmax.f32 %v3859_v53, 0.0 }
 0x5f8   : > { %3953 = vmatmul.f32.gmra.mxu2 %v3875_v15 }
 0x5f9   : > { %v3933_v26 = vpop.f32.mrf.mxu2 }
 0x5fa   : > { %v8167_v52 = vadd.f32 %v8119_v25, %v3933_v26 }
 0x5fc   : > { %3977 = vadd.xlane.f32.xlu0 %v8167_v52 }
 0x62b   : > { %v3613_v16 = vpop.xlane.xlu1 %3612 }
 0x62c   : > { %v3630_v17 = vmul.f32 %v3613_v16, %v7893_v28 }
 0x62e   : > { %v3646_v18 = vadd.f32 1e-05, %v3630_v17 }
 0x630   : > { %5046 = vrsqrt.f32 %v3646_v18  ;;  %vm3794_vm13 = vweird.f32 %v3646_v18 }
 0x634   : > { %v3615_v38 = vpop.xlane.xlu2 %3614 }
 0x635   : > { %v3631_v29 = vmul.f32 %v3615_v38, %v7893_v28 }
 0x636   : > { %v5047_v46 = vpop.eup %5046 }
 0x637   : > { %v3789_v51 = vmul.f32 %v5047_v46, %v3646_v18  ;;  %v3647_v50 = vadd.f32 1e-05, %v3631_v29  ;;  %vm3795_vm12 = vweird.f32 %v5047_v46 }
 0x638   : > { %vm3796_vm14 = vmor %vm3794_vm13, %vm3795_vm12 }
 0x639   : > { %v3790_v1 = vmul.f32 %v5047_v46, %v3789_v51  ;;  %5048 = vrsqrt.f32 %v3647_v50  ;;  %vm3804_vm0 = vweird.f32 %v3647_v50 }
 0x63b   : > { %v3791_v62 = vmul.f32 0.5, %v3790_v1 }
 0x63d   : > { %v3792_v4 = vsub.f32 1.5, %v3791_v62 }
 0x63f   : > { %v5049_v19 = vpop.eup %5048  ;;  %v3793_v10 = vmul.f32 %v5047_v46, %v3792_v4  ;;  %v3966_v40 = vpop.xlane.xlu0 %3965 }
 0x640   : > { %v3799_v21 = vmul.f32 %v5049_v19, %v3647_v50  ;;  %vm3805_vm15 = vweird.f32 %v5049_v19  ;;  %v3997_v56 = vmul.f32 %v3966_v40, %v7893_v28 }
 0x641   : > { %v3797_v54 = vsel %vm3796_vm14, %v5047_v46, %v3793_v10  ;;  %vm3806_vm1 = vmor %vm3804_vm0, %vm3805_vm15 }
 0x642   : > { %v3800_v48 = vmul.f32 %v5049_v19, %v3799_v21  ;;  %v3822_v44 = vmul.f32 %v3797_v54, %v8101_v9  ;;  %v8205_v58 = vsub.f32 %v8123_v11, %v3997_v56 }
 0x644   : > { %v3801_v34 = vmul.f32 0.5, %v3800_v48  ;;  %v3841_v23 = vmul.f32 %v8028_v0, %v3822_v44  ;;  %v4029_v59 = vmul.f32 %v8205_v58, %v8205_v58 }
 0x646   : > { %v3802_v31 = vsub.f32 1.5, %v3801_v34  ;;  %v3860_v45 = vadd.f32 %v8037_v60, %v3841_v23 }
 0x647   : > { %v3968_v15 = vpop.xlane.xlu1 %3967 }
 0x648   : > { %v3803_v2 = vmul.f32 %v5049_v19, %v3802_v31  ;;  %v3876_v22 = vmax.f32 %v3860_v45, 0.0  ;;  %v3998_v16 = vmul.f32 %v3968_v15, %v7893_v28 }
 0x64a   : > { %v3807_v24 = vsel %vm3806_vm1, %v5049_v19, %v3803_v2  ;;  %3956 = vmatmul.f32.gmra.mxu2 %v3876_v22  ;;  %v8227_v18 = vsub.f32 %v8131_v37, %v3998_v16 }
 0x64b   : > { %v3936_v32 = vpop.f32.mrf.mxu2  ;;  %v3823_v35 = vmul.f32 %v3807_v24, %v8108_v5 }
 0x64c   : > { %v8177_v20 = vadd.f32 %v8119_v25, %v3936_v32  ;;  %v4030_v1 = vmul.f32 %v8227_v18, %v8227_v18 }
 0x64d   : > { %v3842_v9 = vmul.f32 %v8028_v0, %v3823_v35 }
 0x64e   : > { %3979 = vadd.xlane.f32.xlu1 %v8177_v20 }
 0x64f   : > { %v3861_v33 = vadd.f32 %v8037_v60, %v3842_v9  ;;  %v3970_v29 = vpop.xlane.xlu2 %3969 }
 0x650   : > { %v3999_v4 = vmul.f32 %v3970_v29, %v7893_v28 }
 0x651   : > { %v3877_v61 = vmax.f32 %v3861_v33, 0.0 }
 0x652   : > { %v8246_v10 = vsub.f32 %v8139_v27, %v3999_v4 }
 0x653   : > { %3959 = vmatmul.f32.gmra.mxu2 %v3877_v61  ;;  %v3939_v49 = vpop.f32.mrf.mxu2 }
 0x654   : > { %v8183_v43 = vadd.f32 %v8119_v25, %v3939_v49  ;;  %v4031_v34 = vmul.f32 %v8246_v10, %v8246_v10 }
 0x656   : > { %3981 = vadd.xlane.f32.xlu2 %v8183_v43 }
 0x657   : > { %v3972_v55 = vpop.xlane.xlu0 %3971 }
 0x658   : > { %v4000_v41 = vmul.f32 %v3972_v55, %v7893_v28 }
 0x65a   : > { %v8211_v8 = vsub.f32 %v8147_v39, %v4000_v41 }
 0x65b   : > { %v3942_v42 = vpop.f32.mrf.mxu2 }
 0x65c   : > { %v3943_v5 = vadd.f32 %v8119_v25, %v3942_v42  ;;  %v4032_v7 = vmul.f32 %v8211_v8, %v8211_v8 }
 0x65e   : > { %3983 = vadd.xlane.f32.xlu0 %v3943_v5 }
 0x65f   : > { %v3974_v38 = vpop.xlane.xlu1 %3973 }
 0x660   : > { %v4001_v51 = vmul.f32 %v3974_v38, %v7893_v28  ;;  %v8300_v38 = vld [vmem:[%s8558_s9] ss:$0 sm:$0xff] }
 0x662   : > { %v8243_v19 = vsub.f32 %v8154_v14, %v4001_v51 }
 0x663   : > { %v3945_v47 = vpop.f32.mrf.mxu2 }
 0x664   : > { %v8188_v13 = vadd.f32 %v8119_v25, %v3945_v47  ;;  %v4033_v44 = vmul.f32 %v8243_v19, %v8243_v19 }
 0x666   : > { %3985 = vadd.xlane.f32.xlu1 %v8188_v13 }
 0x667   : > { %v3976_v54 = vpop.xlane.xlu2 %3975 }
 0x66b   : > { %v3948_v0 = vpop.f32.mrf.mxu2 }
 0x66c   : > { %v8192_v60 = vadd.f32 %v8119_v25, %v3948_v0 }
 0x66e   : > { %3987 = vadd.xlane.f32.xlu2 %v8192_v60 }
 0x66f   : > { %v3978_v12 = vpop.xlane.xlu0 %3977 }
 0x670   : > { %v4003_v3 = vmul.f32 %v3978_v12, %v7893_v28 }
 0x672   : > { %v8217_v11 = vsub.f32 %v8167_v52, %v4003_v3 }
 0x673   : > { %v3951_v57 = vpop.f32.mrf.mxu2 }
 0x674   : > { %v8196_v6 = vadd.f32 %v8119_v25, %v3951_v57  ;;  %v4035_v53 = vmul.f32 %v8217_v11, %v8217_v11 }
 0x676   : > { %3989 = vadd.xlane.f32.xlu0 %v8196_v6 }
 0x67b   : > { %v3954_v63 = vpop.f32.mrf.mxu2 }
 0x67c   : > { %v8201_v36 = vadd.f32 %v8119_v25, %v3954_v63 }
 0x67e   : > { %3991 = vadd.xlane.f32.xlu1 %v8201_v36 }
 0x686   : > { %4045 = vadd.xlane.f32.xlu1 %v4029_v59 }
 0x68e   : > { %4051 = vadd.xlane.f32.xlu1 %v4032_v7 }
 0x696   : > { %4057 = vadd.xlane.f32.xlu1 %v4035_v53 }
 0x6c1   : > { %v3980_v21 = vpop.xlane.xlu1 %3979 }
 0x6c2   : > { %v4004_v48 = vmul.f32 %v3980_v21, %v7893_v28 }
 0x6c4   : > { %v8255_v14 = vsub.f32 %v8177_v20, %v4004_v48 }
 0x6c6   : > { %v4036_v2 = vmul.f32 %v8255_v14, %v8255_v14 }
 0x6c9   : > { %v3982_v31 = vpop.xlane.xlu2 %3981 }
 0x6ca   : > { %v4005_v22 = vmul.f32 %v3982_v31, %v7893_v28 }
 0x6cc   : > { %v8271_v20 = vsub.f32 %v8183_v43, %v4005_v22 }
 0x6cd   : > { %v3957_v26 = vpop.f32.mrf.mxu2 }
 0x6ce   : > { %v8223_v39 = vadd.f32 %v8119_v25, %v3957_v26 }
 0x6d0   : > { %3993 = vadd.xlane.f32.xlu2 %v8223_v39 }
 0x6d1   : > { %v3984_v17 = vpop.xlane.xlu0 %3983 }
 0x6d2   : > { %v4006_v52 = vmul.f32 %v3984_v17, %v7893_v28 }
 0x6d4   : > { %v8230_v46 = vsub.f32 %v3943_v5, %v4006_v52  ;;  %v4037_v5 = vmul.f32 %v8271_v20, %v8271_v20 }
 0x6d6   : > { %v3960_v50 = vpop.f32.mrf.mxu2  ;;  %v4038_v62 = vmul.f32 %v8230_v46, %v8230_v46 }
 0x6d7   : > { %v8239_v37 = vadd.f32 %v8119_v25, %v3960_v50  ;;  %v4002_v25 = vmul.f32 %v3976_v54, %v7893_v28 }
 0x6d8   : > { %4047 = vadd.xlane.f32.xlu2 %v4030_v1  ;;  %4063 = vadd.xlane.f32.xlu1 %v4038_v62  ;;  %v8306_v1 = vld [vmem:[%s8559_s10] ss:$0 sm:$0xff] }
 0x6d9   : > { %3995 = vadd.xlane.f32.xlu0 %v8239_v37  ;;  %v8258_v27 = vsub.f32 %v8161_v30, %v4002_v25  ;;  %v3986_v23 = vpop.xlane.xlu1 %3985 }
 0x6da   : > { %v4007_v45 = vmul.f32 %v3986_v23, %v7893_v28 }
 0x6db   : > { %v4034_v24 = vmul.f32 %v8258_v27, %v8258_v27 }
 0x6dc   : > { %v8267_v35 = vsub.f32 %v8188_v13, %v4007_v45 }
 0x6de   : > { %v4039_v61 = vmul.f32 %v8267_v35, %v8267_v35 }
 0x6e0   : > { %4053 = vadd.xlane.f32.xlu2 %v4033_v44  ;;  %v8313_v44 = vld [vmem:[%s8560_s11] ss:$0 sm:$0xff] }
 0x6e1   : > { %4049 = vadd.xlane.f32.xlu0 %v4031_v34  ;;  %v3988_v9 = vpop.xlane.xlu2 %3987 }
 0x6e2   : > { %v4008_v42 = vmul.f32 %v3988_v9, %v7893_v28 }
 0x6e4   : > { %v8285_v13 = vsub.f32 %v8192_v60, %v4008_v42 }
 0x6e8   : > { %4059 = vadd.xlane.f32.xlu2 %v4036_v2 }
 0x6e9   : > { %4055 = vadd.xlane.f32.xlu0 %v4034_v24  ;;  %v3990_v32 = vpop.xlane.xlu0 %3989 }
 0x6ea   : > { %v4009_v30 = vmul.f32 %v3990_v32, %v7893_v28 }
 0x6ec   : > { %v8274_v33 = vsub.f32 %v8196_v6, %v4009_v30  ;;  %v4040_v6 = vmul.f32 %v8285_v13, %v8285_v13 }
 0x6ee   : > { %v4041_v49 = vmul.f32 %v8274_v33, %v8274_v33 }
 0x6f0   : > { %4065 = vadd.xlane.f32.xlu2 %v4039_v61  ;;  %4069 = vadd.xlane.f32.xlu1 %v4041_v49 }
 0x6f1   : > { %4061 = vadd.xlane.f32.xlu0 %v4037_v5  ;;  %v3992_v43 = vpop.xlane.xlu1 %3991 }
 0x6f2   : > { %v4010_v47 = vmul.f32 %v3992_v43, %v7893_v28 }
 0x6f4   : > { %v8288_v0 = vsub.f32 %v8201_v36, %v4010_v47 }
 0x6f6   : > { %v4042_v57 = vmul.f32 %v8288_v0, %v8288_v0 }
 0x6f8   : > { %4071 = vadd.xlane.f32.xlu2 %v4042_v57 }
 0x6f9   : > { %4067 = vadd.xlane.f32.xlu0 %v4040_v6  ;;  %v4046_v40 = vpop.xlane.xlu1 %4045 }
 0x6fa   : > { %v4077_v63 = vmul.f32 %v4046_v40, %v7893_v28 }
 0x6fc   : > { %v4093_v56 = vadd.f32 1e-05, %v4077_v63 }
 0x6fe   : > { %5050 = vrsqrt.f32 %v4093_v56  ;;  %vm4115_vm3 = vweird.f32 %v4093_v56 }
 0x701   : > { %v4052_v55 = vpop.xlane.xlu1 %4051 }
 0x702   : > { %v4080_v60 = vmul.f32 %v4052_v55, %v7893_v28 }
 0x704   : > { %v5051_v41 = vpop.eup %5050  ;;  %v4096_v59 = vadd.f32 1e-05, %v4080_v60 }
 0x705   : > { %v4110_v36 = vmul.f32 %v5051_v41, %v4093_v56  ;;  %vm4116_vm2 = vweird.f32 %v5051_v41 }
 0x706   : > { %5052 = vrsqrt.f32 %v4096_v59  ;;  %vm4117_vm4 = vmor %vm4115_vm3, %vm4116_vm2  ;;  %vm4145_vm6 = vweird.f32 %v4096_v59 }
 0x707   : > { %v4111_v12 = vmul.f32 %v5051_v41, %v4110_v36 }
 0x709   : > { %v4112_v3 = vmul.f32 0.5, %v4111_v12  ;;  %v4058_v7 = vpop.xlane.xlu1 %4057 }
 0x70a   : > { %v4083_v53 = vmul.f32 %v4058_v7, %v7893_v28 }
 0x70b   : > { %v4113_v15 = vsub.f32 1.5, %v4112_v3 }
 0x70c   : > { %v5053_v26 = vpop.eup %5052  ;;  %v4099_v16 = vadd.f32 1e-05, %v4083_v53 }
 0x70d   : > { %v4114_v17 = vmul.f32 %v5051_v41, %v4113_v15  ;;  %v4140_v52 = vmul.f32 %v5053_v26, %v4096_v59  ;;  %vm4146_vm5 = vweird.f32 %v5053_v26 }
 0x70e   : > { %5054 = vrsqrt.f32 %v4099_v16  ;;  %vm4147_vm7 = vmor %vm4145_vm6, %vm4146_vm5  ;;  %vm4175_vm9 = vweird.f32 %v4099_v16 }
 0x70f   : > { %v4118_v29 = vsel %vm4117_vm4, %v5051_v41, %v4114_v17  ;;  %v4141_v51 = vmul.f32 %v5053_v26, %v4140_v52 }
 0x710   : > { %v4269_v50 = vmul.f32 %v4118_v29, %v8205_v58 }
 0x711   : > { %v4142_v62 = vmul.f32 0.5, %v4141_v51 }
 0x712   : > { %v4288_v4 = vmul.f32 %v8300_v38, %v4269_v50 }
 0x713   : > { %v4143_v21 = vsub.f32 1.5, %v4142_v62 }
 0x714   : > { %v5055_v54 = vpop.eup %5054  ;;  %v4307_v48 = vadd.f32 %v8306_v1, %v4288_v4 }
 0x715   : > { %v4144_v25 = vmul.f32 %v5053_v26, %v4143_v21  ;;  %v4170_v58 = vmul.f32 %v5055_v54, %v4099_v16  ;;  %vm4176_vm8 = vweird.f32 %v5055_v54 }
 0x716   : > { %v4323_v34 = vmax.f32 %v4307_v48, 0.0  ;;  %vm4177_vm10 = vmor %vm4175_vm9, %vm4176_vm8 }
 0x717   : > { %v4148_v23 = vsel %vm4147_vm7, %v5053_v26, %v4144_v25  ;;  %v4171_v31 = vmul.f32 %v5055_v54, %v4170_v58 }
 0x718   : > { %v4272_v45 = vmul.f32 %v4148_v23, %v8211_v8  ;;  %v4343_v2 = vmul.f32 %v8313_v44, %v4323_v34 }
 0x719   : > { %v4172_v22 = vmul.f32 0.5, %v4171_v31 }
 0x71a   : > { %4359 = vadd.xlane.f32.xlu2 %v4343_v2  ;;  %v4291_v24 = vmul.f32 %v8300_v38, %v4272_v45 }
 0x71b   : > { %v4173_v32 = vsub.f32 1.5, %v4172_v22 }
 0x71c   : > { %v4310_v30 = vadd.f32 %v8306_v1, %v4291_v24 }
 0x71d   : > { %v4174_v9 = vmul.f32 %v5055_v54, %v4173_v32 }
 0x71e   : > { %v4326_v61 = vmax.f32 %v4310_v30, 0.0 }
 0x71f   : > { %v4178_v49 = vsel %vm4177_vm10, %v5055_v54, %v4174_v9 }
 0x720   : > { %v4275_v42 = vmul.f32 %v4178_v49, %v8217_v11  ;;  %v4346_v5 = vmul.f32 %v8313_v44, %v4326_v61 }
 0x722   : > { %4365 = vadd.xlane.f32.xlu2 %v4346_v5  ;;  %v4294_v8 = vmul.f32 %v8300_v38, %v4275_v42 }
 0x724   : > { %v4313_v43 = vadd.f32 %v8306_v1, %v4294_v8 }
 0x726   : > { %v4329_v47 = vmax.f32 %v4313_v43, 0.0 }
 0x728   : > { %v4349_v57 = vmul.f32 %v8313_v44, %v4329_v47 }
 0x72a   : > { %4371 = vadd.xlane.f32.xlu2 %v4349_v57 }
 0x743   : > { %v3994_v6 = vpop.xlane.xlu2 %3993 }
 0x744   : > { %v4011_v40 = vmul.f32 %v3994_v6, %v7893_v28 }
 0x746   : > { %v8326_v63 = vsub.f32 %v8223_v39, %v4011_v40 }
 0x748   : > { %v4043_v11 = vmul.f32 %v8326_v63, %v8326_v63 }
 0x74a   : > { %4073 = vadd.xlane.f32.xlu0 %v4043_v11 }
 0x74b   : > { %v4064_v56 = vpop.xlane.xlu1 %4063  ;;  %v4048_v55 = vpop.xlane.xlu2 %4047 }
 0x74c   : > { %v4086_v60 = vmul.f32 %v4064_v56, %v7893_v28  ;;  %v3996_v41 = vpop.xlane.xlu0 %3995  ;;  %v4078_v59 = vmul.f32 %v4048_v55, %v7893_v28 }
 0x74d   : > { %v4012_v36 = vmul.f32 %v3996_v41, %v7893_v28 }
 0x74e   : > { %v4102_v12 = vadd.f32 1e-05, %v4086_v60  ;;  %v4094_v3 = vadd.f32 1e-05, %v4078_v59 }
 0x74f   : > { %v8334_v7 = vsub.f32 %v8239_v37, %v4012_v36 }
 0x750   : > { %5056 = vrsqrt.f32 %v4102_v12  ;;  %vm4205_vm13 = vweird.f32 %v4102_v12  ;;  %vm4125_vm15 = vweird.f32 %v4094_v3 }
 0x751   : > { %5058 = vrsqrt.f32 %v4094_v3  ;;  %v4044_v39 = vmul.f32 %v8334_v7, %v8334_v7 }
 0x753   : > { %4075 = vadd.xlane.f32.xlu1 %v4044_v39  ;;  %v4054_v53 = vpop.xlane.xlu2 %4053 }
 0x754   : > { %v4050_v15 = vpop.xlane.xlu0 %4049  ;;  %v4081_v26 = vmul.f32 %v4054_v53, %v7893_v28 }
 0x755   : > { %v4079_v16 = vmul.f32 %v4050_v15, %v7893_v28 }
 0x756   : > { %v5057_v17 = vpop.eup %5056  ;;  %v8340_v52 = vadd.f32 1e-05, %v4081_v26 }
 0x757   : > { %v5059_v29 = vpop.eup %5058  ;;  %v4200_v51 = vmul.f32 %v5057_v17, %v4102_v12  ;;  %v8342_v50 = vadd.f32 1e-05, %v4079_v16  ;;  %vm4206_vm11 = vweird.f32 %v5057_v17 }
 0x758   : > { %v4120_v37 = vmul.f32 %v5059_v29, %v4094_v3  ;;  %5060 = vrsqrt.f32 %v8340_v52  ;;  %vm4126_vm12 = vweird.f32 %v5059_v29  ;;  %vm4207_vm14 = vmor %vm4205_vm13, %vm4206_vm11  ;;  %vm4155_vm1 = vweird.f32 %v8340_v52 }
 0x759   : > { %v4201_v62 = vmul.f32 %v5057_v17, %v4200_v51  ;;  %5062 = vrsqrt.f32 %v8342_v50  ;;  %vm4127_vm0 = vmor %vm4125_vm15, %vm4126_vm12  ;;  %vm4135_vm2 = vweird.f32 %v8342_v50 }
 0x75a   : > { %v4121_v4 = vmul.f32 %v5059_v29, %v4120_v37 }
 0x75b   : > { %v4202_v21 = vmul.f32 0.5, %v4201_v62  ;;  %v4060_v54 = vpop.xlane.xlu2 %4059 }
 0x75c   : > { %v4122_v48 = vmul.f32 0.5, %v4121_v4  ;;  %v4056_v25 = vpop.xlane.xlu0 %4055  ;;  %v4084_v58 = vmul.f32 %v4060_v54, %v7893_v28 }
 0x75d   : > { %v4203_v34 = vsub.f32 1.5, %v4202_v21  ;;  %v4082_v23 = vmul.f32 %v4056_v25, %v7893_v28 }
 0x75e   : > { %v8348_v31 = vpop.eup %5060  ;;  %v4123_v45 = vsub.f32 1.5, %v4122_v48  ;;  %v8350_v2 = vadd.f32 1e-05, %v4084_v58 }
 0x75f   : > { %v5063_v22 = vpop.eup %5062  ;;  %v4204_v24 = vmul.f32 %v5057_v17, %v4203_v34  ;;  %v4150_v32 = vmul.f32 %v8348_v31, %v8340_v52  ;;  %v8354_v30 = vadd.f32 1e-05, %v4082_v23  ;;  %vm4156_vm3 = vweird.f32 %v8348_v31 }
 0x760   : > { %v4124_v9 = vmul.f32 %v5059_v29, %v4123_v45  ;;  %v4130_v61 = vmul.f32 %v5063_v22, %v8342_v50  ;;  %5064 = vrsqrt.f32 %v8350_v2  ;;  %vm4136_vm4 = vweird.f32 %v5063_v22  ;;  %vm8383_vm5 = vmor %vm4155_vm1, %vm4156_vm3 }
 0x761   : > { %v4208_v49 = vsel %vm4207_vm14, %v5057_v17, %v4204_v24  ;;  %v4151_v42 = vmul.f32 %v8348_v31, %v4150_v32  ;;  %5066 = vrsqrt.f32 %v8354_v30  ;;  %vm4137_vm6 = vmor %vm4135_vm2, %vm4136_vm4  ;;  %vm4165_vm7 = vweird.f32 %v8354_v30 }
 0x762   : > { %v4278_v5 = vmul.f32 %v4208_v49, %v8230_v46  ;;  %v4128_v8 = vsel %vm4127_vm0, %v5059_v29, %v4124_v9  ;;  %v4131_v43 = vmul.f32 %v5063_v22, %v4130_v61  ;;  %vm4185_vm8 = vweird.f32 %v8350_v2 }
 0x763   : > { %v4270_v47 = vmul.f32 %v4128_v8, %v8227_v18  ;;  %v4152_v57 = vmul.f32 0.5, %v4151_v42  ;;  %v4070_v6 = vpop.xlane.xlu1 %4069  ;;  %v4066_v40 = vpop.xlane.xlu2 %4065 }
 0x764   : > { %v4132_v11 = vmul.f32 0.5, %v4131_v43  ;;  %v4089_v56 = vmul.f32 %v4070_v6, %v7893_v28  ;;  %v4062_v55 = vpop.xlane.xlu0 %4061  ;;  %v4087_v60 = vmul.f32 %v4066_v40, %v7893_v28  ;;  %v4297_v41 = vmul.f32 %v8300_v38, %v4278_v5 }
 0x765   : > { %v4153_v46 = vsub.f32 1.5, %v4152_v57  ;;  %v4085_v18 = vmul.f32 %v4062_v55, %v7893_v28  ;;  %v4289_v3 = vmul.f32 %v8300_v38, %v4270_v47 }
 0x766   : > { %v8369_v59 = vpop.eup %5064  ;;  %v4133_v36 = vsub.f32 1.5, %v4132_v11  ;;  %v8371_v12 = vadd.f32 1e-05, %v4089_v56  ;;  %v8379_v16 = vadd.f32 1e-05, %v4087_v60  ;;  %v4316_v37 = vadd.f32 %v8306_v1, %v4297_v41 }
 0x767   : > { %v5067_v39 = vpop.eup %5066  ;;  %v4154_v53 = vmul.f32 %v8348_v31, %v4153_v46  ;;  %v4180_v15 = vmul.f32 %v8369_v59, %v8350_v2  ;;  %v8377_v26 = vadd.f32 1e-05, %v4085_v18  ;;  %v4308_v45 = vadd.f32 %v8306_v1, %v4289_v3 }
 0x768   : > { %v4134_v17 = vmul.f32 %v5063_v22, %v4133_v36  ;;  %v4160_v51 = vmul.f32 %v5067_v39, %v8354_v30  ;;  %5068 = vrsqrt.f32 %v8371_v12  ;;  %v4332_v23 = vmax.f32 %v4316_v37, 0.0 }
 0x769   : > { %v4181_v62 = vmul.f32 %v8369_v59, %v4180_v15  ;;  %5070 = vrsqrt.f32 %v8377_v26  ;;  %v4158_v52 = vsel %vm8383_vm5, %v8348_v31, %v4154_v53  ;;  %vm4186_vm9 = vweird.f32 %v8369_v59 }
 0x76a   : > { %v4138_v4 = vsel %vm4137_vm6, %v5063_v22, %v4134_v17  ;;  %v4161_v21 = vmul.f32 %v5067_v39, %v4160_v51  ;;  %5072 = vrsqrt.f32 %v8379_v16  ;;  %v4273_v31 = vmul.f32 %v4158_v52, %v8243_v19  ;;  %vm8417_vm12 = vmor %vm4185_vm8, %vm4186_vm9 }
 0x76b   : > { %v4271_v54 = vmul.f32 %v4138_v4, %v8246_v10  ;;  %v4182_v48 = vmul.f32 0.5, %v4181_v62  ;;  %v4072_v50 = vpop.xlane.xlu2 %4071  ;;  %vm4166_vm10 = vweird.f32 %v5067_v39  ;;  %v4352_v61 = vmul.f32 %v8313_v44, %v4332_v23 }
 0x76c   : > { %v4162_v25 = vmul.f32 0.5, %v4161_v21  ;;  %v4068_v58 = vpop.xlane.xlu0 %4067  ;;  %v4090_v34 = vmul.f32 %v4072_v50, %v7893_v28  ;;  %vm4235_vm11 = vweird.f32 %v8371_v12  ;;  %v4324_v6 = vmax.f32 %v4308_v45, 0.0  ;;  %vm4167_vm13 = vmor %vm4165_vm7, %vm4166_vm10 }
 0x76d   : > { %v4183_v22 = vsub.f32 1.5, %v4182_v48  ;;  %v4088_v10 = vmul.f32 %v4068_v58, %v7893_v28  ;;  %v4290_v8 = vmul.f32 %v8300_v38, %v4271_v54  ;;  %4377 = vadd.xlane.f32.xlu2 %v4352_v61  ;;  %v4292_v56 = vmul.f32 %v8300_v38, %v4273_v31 }
 0x76e   : > { %v5069_v24 = vpop.eup %5068  ;;  %v4163_v32 = vsub.f32 1.5, %v4162_v25  ;;  %v8406_v9 = vadd.f32 1e-05, %v4090_v34  ;;  %vm4195_vm14 = vweird.f32 %v8377_v26  ;;  %vm4215_vm15 = vweird.f32 %v8379_v16 }
 0x76f   : > { %v5071_v49 = vpop.eup %5070  ;;  %v4184_v42 = vmul.f32 %v8369_v59, %v4183_v22  ;;  %v4230_v5 = vmul.f32 %v5069_v24, %v8371_v12  ;;  %v8412_v19 = vadd.f32 1e-05, %v4088_v10  ;;  %v4344_v3 = vmul.f32 %v8313_v44, %v4324_v6 }
 0x770   : > { %v4164_v43 = vmul.f32 %v5067_v39, %v4163_v32  ;;  %v4190_v57 = vmul.f32 %v5071_v49, %v8377_v26  ;;  %5074 = vrsqrt.f32 %v8406_v9  ;;  %v5073_v40 = vpop.eup %5072  ;;  %v4309_v53 = vadd.f32 %v8306_v1, %v4290_v8 }
 0x771   : > { %v4188_v11 = vsel %vm8417_vm12, %v8369_v59, %v4184_v42  ;;  %v4231_v2 = vmul.f32 %v5069_v24, %v4230_v5  ;;  %5076 = vrsqrt.f32 %v8412_v19  ;;  %v4210_v41 = vmul.f32 %v5073_v40, %v8379_v16  ;;  %4361 = vadd.xlane.f32.xlu0 %v4344_v3 }
 0x772   : > { %v4168_v55 = vsel %vm4167_vm13, %v5067_v39, %v4164_v43  ;;  %v4191_v60 = vmul.f32 %v5071_v49, %v4190_v57  ;;  %v4276_v30 = vmul.f32 %v4188_v11, %v8255_v14  ;;  %vm4236_vm0 = vweird.f32 %v5069_v24 }
 0x773   : > { %v4274_v46 = vmul.f32 %v4168_v55, %v8258_v27  ;;  %v4232_v18 = vmul.f32 0.5, %v4231_v2  ;;  %v4211_v59 = vmul.f32 %v5073_v40, %v4210_v41  ;;  %vm4196_vm1 = vweird.f32 %v5071_v49  ;;  %vm4237_vm2 = vmor %vm4235_vm11, %vm4236_vm0 }
 0x774   : > { %v4192_v36 = vmul.f32 0.5, %v4191_v60  ;;  %v4311_v39 = vadd.f32 %v8306_v1, %v4292_v56  ;;  %v4325_v27 = vmax.f32 %v4309_v53, 0.0  ;;  %v4295_v21 = vmul.f32 %v8300_v38, %v4276_v30  ;;  %vm4197_vm4 = vmor %vm4195_vm14, %vm4196_vm1 }
 0x775   : > { %v4233_v15 = vsub.f32 1.5, %v4232_v18  ;;  %v4212_v51 = vmul.f32 0.5, %v4211_v59  ;;  %v4293_v14 = vmul.f32 %v8300_v38, %v4274_v46  ;;  %vm4216_vm3 = vweird.f32 %v5073_v40 }
 0x776   : > { %v5075_v17 = vpop.eup %5074  ;;  %v4193_v29 = vsub.f32 1.5, %v4192_v36  ;;  %v4327_v52 = vmax.f32 %v4311_v39, 0.0  ;;  %v4345_v34 = vmul.f32 %v8313_v44, %v4325_v27  ;;  %vm4217_vm5 = vmor %vm4215_vm15, %vm4216_vm3  ;;  %v4314_v32 = vadd.f32 %v8306_v1, %v4295_v21  ;;  %v8477_v39 = vld [vmem:[#allocation2] ss:$0 sm:$0xff] }
 0x777   : > { %v5077_v37 = vpop.eup %5076  ;;  %v4234_v62 = vmul.f32 %v5069_v24, %v4233_v15  ;;  %v4240_v4 = vmul.f32 %v5075_v17, %v8406_v9  ;;  %v4213_v48 = vsub.f32 1.5, %v4212_v51  ;;  %v4312_v26 = vadd.f32 %v8306_v1, %v4293_v14 }
 0x778   : > { %v4194_v54 = vmul.f32 %v5071_v49, %v4193_v29  ;;  %v4220_v50 = vmul.f32 %v5077_v37, %v8412_v19  ;;  %v4347_v23 = vmul.f32 %v8313_v44, %v4327_v52  ;;  %4363 = vadd.xlane.f32.xlu1 %v4345_v34  ;;  %vm4246_vm6 = vweird.f32 %v5075_v17 }
 0x779   : > { %v4238_v25 = vsel %vm4237_vm2, %v5069_v24, %v4234_v62  ;;  %v4241_v58 = vmul.f32 %v5075_v17, %v4240_v4  ;;  %v4214_v12 = vmul.f32 %v5073_v40, %v4213_v48  ;;  %v4328_v8 = vmax.f32 %v4312_v26, 0.0 }
 0x77a   : > { %v4281_v45 = vmul.f32 %v4238_v25, %v8274_v33  ;;  %v4198_v31 = vsel %vm4197_vm4, %v5071_v49, %v4194_v54  ;;  %v4221_v22 = vmul.f32 %v5077_v37, %v4220_v50  ;;  %v4330_v43 = vmax.f32 %v4314_v32, 0.0  ;;  %4367 = vadd.xlane.f32.xlu0 %v4347_v23 }
 0x77b   : > { %v4277_v10 = vmul.f32 %v4198_v31, %v8271_v20  ;;  %v4242_v24 = vmul.f32 0.5, %v4241_v58  ;;  %v4218_v61 = vsel %vm4217_vm5, %v5073_v40, %v4214_v12  ;;  %vm4226_vm7 = vweird.f32 %v5077_v37 }
 0x77c   : > { %v4222_v42 = vmul.f32 0.5, %v4221_v22  ;;  %v4300_v5 = vmul.f32 %v8300_v38, %v4281_v45  ;;  %v4279_v33 = vmul.f32 %v4218_v61, %v8267_v35  ;;  %vm4245_vm8 = vweird.f32 %v8406_v9 }
 0x77d   : > { %v4243_v49 = vsub.f32 1.5, %v4242_v24  ;;  %v4296_v47 = vmul.f32 %v8300_v38, %v4277_v10  ;;  %v4348_v6 = vmul.f32 %v8313_v44, %v4328_v8  ;;  %vm4225_vm9 = vweird.f32 %v8412_v19  ;;  %vm4247_vm10 = vmor %vm4245_vm8, %vm4246_vm6 }
 0x77e   : > { %v4223_v20 = vsub.f32 1.5, %v4222_v42  ;;  %v4319_v16 = vadd.f32 %v8306_v1, %v4300_v5  ;;  %v4298_v40 = vmul.f32 %v8300_v38, %v4279_v33  ;;  %vm4227_vm11 = vmor %vm4225_vm9, %vm4226_vm7  ;;  %v4350_v55 = vmul.f32 %v8313_v44, %v4330_v43 }
 0x77f   : > { %v4244_v57 = vmul.f32 %v5075_v17, %v4243_v49  ;;  %v4315_v2 = vadd.f32 %v8306_v1, %v4296_v47  ;;  %vm4411_vm12 = vcmask 7168  }
 0x780   : > { %v4224_v11 = vmul.f32 %v5077_v37, %v4223_v20  ;;  %v4335_v35 = vmax.f32 %v4319_v16, 0.0  ;;  %v4317_v46 = vadd.f32 %v8306_v1, %v4298_v40  ;;  %4369 = vadd.xlane.f32.xlu1 %v4348_v6 }
 0x781   : > { %v4248_v56 = vsel %vm4247_vm10, %v5075_v17, %v4244_v57  ;;  %v4331_v19 = vmax.f32 %v4315_v2, 0.0 }
 0x782   : > { %v4228_v60 = vsel %vm4227_vm11, %v5077_v37, %v4224_v11  ;;  %v4282_v41 = vmul.f32 %v4248_v56, %v8288_v0  ;;  %v4355_v9 = vmul.f32 %v8313_v44, %v4335_v35  ;;  %4373 = vadd.xlane.f32.xlu0 %v4350_v55  ;;  %v4333_v36 = vmax.f32 %v4317_v46, 0.0 }
 0x783   : > { %v4280_v30 = vmul.f32 %v4228_v60, %v8285_v13  ;;  %v4351_v3 = vmul.f32 %v8313_v44, %v4331_v19 }
 0x784   : > { %4383 = vadd.xlane.f32.xlu2 %v4355_v9  ;;  %v4301_v59 = vmul.f32 %v8300_v38, %v4282_v41  ;;  %v4353_v53 = vmul.f32 %v8313_v44, %v4333_v36 }
 0x785   : > { %v4299_v18 = vmul.f32 %v8300_v38, %v4280_v30 }
 0x786   : > { %v4320_v15 = vadd.f32 %v8306_v1, %v4301_v59 }
 0x787   : > { %v4318_v0 = vadd.f32 %v8306_v1, %v4299_v18 }
 0x788   : > { %4375 = vadd.xlane.f32.xlu1 %v4351_v3  ;;  %v4336_v29 = vmax.f32 %v4320_v15, 0.0 }
 0x789   : > { %v4334_v13 = vmax.f32 %v4318_v0, 0.0 }
 0x78a   : > { %4379 = vadd.xlane.f32.xlu0 %v4353_v53  ;;  %v4356_v14 = vmul.f32 %v8313_v44, %v4336_v29 }
 0x78b   : > { %v4354_v27 = vmul.f32 %v8313_v44, %v4334_v13 }
 0x78d   : > { %v4360_v17 = vpop.xlane.xlu2 %4359 }
 0x78e   : > { %v4395_v51 = vadd.f32 %v8477_v39, %v4360_v17 }
 0x790   : > { %4412 = vst.msk [vmem:[%s8484_s24] sm:$0xff] %vm4411_vm12, %v4395_v51  ;;  %4381 = vadd.xlane.f32.xlu1 %v4354_v27 }
 0x792   : > { %4385 = vadd.xlane.f32.xlu0 %v4356_v14 }
 0x795   : > { %v4366_v37 = vpop.xlane.xlu2 %4365 }
 0x796   : > { %v4398_v62 = vadd.f32 %v8477_v39, %v4366_v37 }
 0x798   : > { %4415 = vst.msk [vmem:[%s8484_s24 + $0x18] sm:$0xff] %vm4411_vm12, %v4398_v62 }
 0x79d   : > { %v4372_v4 = vpop.xlane.xlu2 %4371 }
 0x79e   : > { %v4401_v52 = vadd.f32 %v8477_v39, %v4372_v4 }
 0x7a0   : > { %4418 = vst.msk [vmem:[%s8484_s24 + $0x30] sm:$0xff] %vm4411_vm12, %v4401_v52 }
 0x7bd   : > { %v4074_v21 = vpop.xlane.xlu0 %4073 }
 0x7be   : > { %v4091_v54 = vmul.f32 %v4074_v21, %v7893_v28 }
 0x7c0   : > { %v4107_v48 = vadd.f32 1e-05, %v4091_v54 }
 0x7c2   : > { %5078 = vrsqrt.f32 %v4107_v48  ;;  %vm4255_vm14 = vweird.f32 %v4107_v48 }
 0x7c6   : > { %v4076_v50 = vpop.xlane.xlu1 %4075 }
 0x7c7   : > { %v4092_v25 = vmul.f32 %v4076_v50, %v7893_v28 }
 0x7c8   : > { %v5079_v58 = vpop.eup %5078 }
 0x7c9   : > { %v4250_v34 = vmul.f32 %v5079_v58, %v4107_v48  ;;  %v4108_v23 = vadd.f32 1e-05, %v4092_v25  ;;  %vm4256_vm13 = vweird.f32 %v5079_v58 }
 0x7ca   : > { %vm4257_vm15 = vmor %vm4255_vm14, %vm4256_vm13 }
 0x7cb   : > { %v4251_v45 = vmul.f32 %v5079_v58, %v4250_v34  ;;  %5080 = vrsqrt.f32 %v4108_v23  ;;  %vm4265_vm1 = vweird.f32 %v4108_v23 }
 0x7cd   : > { %v4252_v31 = vmul.f32 0.5, %v4251_v45 }
 0x7cf   : > { %v4253_v12 = vsub.f32 1.5, %v4252_v31 }
 0x7d1   : > { %v5081_v22 = vpop.eup %5080  ;;  %v4254_v10 = vmul.f32 %v5079_v58, %v4253_v12 }
 0x7d2   : > { %v4260_v24 = vmul.f32 %v5081_v22, %v4108_v23  ;;  %vm4266_vm0 = vweird.f32 %v5081_v22 }
 0x7d3   : > { %v4258_v26 = vsel %vm4257_vm15, %v5079_v58, %v4254_v10  ;;  %vm4267_vm2 = vmor %vm4265_vm1, %vm4266_vm0 }
 0x7d4   : > { %v4283_v32 = vmul.f32 %v4258_v26, %v8326_v63  ;;  %v4261_v61 = vmul.f32 %v5081_v22, %v4260_v24 }
 0x7d6   : > { %v4262_v42 = vmul.f32 0.5, %v4261_v61  ;;  %v4302_v28 = vmul.f32 %v8300_v38, %v4283_v32 }
 0x7d8   : > { %v4263_v5 = vsub.f32 1.5, %v4262_v42  ;;  %v4321_v33 = vadd.f32 %v8306_v1, %v4302_v28 }
 0x7da   : > { %v4264_v49 = vmul.f32 %v5081_v22, %v4263_v5  ;;  %v4337_v8 = vmax.f32 %v4321_v33, 0.0 }
 0x7dc   : > { %v4268_v43 = vsel %vm4267_vm2, %v5081_v22, %v4264_v49  ;;  %v4357_v20 = vmul.f32 %v8313_v44, %v4337_v8 }
 0x7dd   : > { %v4284_v63 = vmul.f32 %v4268_v43, %v8334_v7 }
 0x7de   : > { %4387 = vadd.xlane.f32.xlu1 %v4357_v20 }
 0x7df   : > { %v4303_v16 = vmul.f32 %v8300_v38, %v4284_v63 }
 0x7e0   : > { %v4378_v57 = vpop.xlane.xlu2 %4377 }
 0x7e1   : > { %v4322_v47 = vadd.f32 %v8306_v1, %v4303_v16  ;;  %v4404_v40 = vadd.f32 %v8477_v39, %v4378_v57 }
 0x7e3   : > { %v4338_v6 = vmax.f32 %v4322_v47, 0.0  ;;  %4421 = vst.msk [vmem:[%s8484_s24 + $0x48] sm:$0xff] %vm4411_vm12, %v4404_v40 }
 0x7e4   : > { %v4362_v35 = vpop.xlane.xlu0 %4361 }
 0x7e5   : > { %v4358_v11 = vmul.f32 %v8313_v44, %v4338_v6  ;;  %v4396_v7 = vadd.f32 %v8477_v39, %v4362_v35 }
 0x7e7   : > { %4389 = vadd.xlane.f32.xlu2 %v4358_v11  ;;  %4413 = vst.msk [vmem:[%s8484_s24 + $0x8] sm:$0xff] %vm4411_vm12, %v4396_v7 }
 0x7eb   : > { %v4364_v38 = vpop.xlane.xlu1 %4363 }
 0x7ec   : > { %v4397_v1 = vadd.f32 %v8477_v39, %v4364_v38 }
 0x7ed   : > { %v4368_v2 = vpop.xlane.xlu0 %4367 }
 0x7ee   : > { %4414 = vst.msk [vmem:[%s8484_s24 + $0x10] sm:$0xff] %vm4411_vm12, %v4397_v1  ;;  %v4399_v44 = vadd.f32 %v8477_v39, %v4368_v2 }
 0x7f0   : > { %4416 = vst.msk [vmem:[%s8484_s24 + $0x20] sm:$0xff] %vm4411_vm12, %v4399_v44 }
 0x7f3   : > { %v4370_v56 = vpop.xlane.xlu1 %4369 }
 0x7f4   : > { %v4400_v55 = vadd.f32 %v8477_v39, %v4370_v56 }
 0x7f5   : > { %v4374_v9 = vpop.xlane.xlu0 %4373 }
 0x7f6   : > { %4417 = vst.msk [vmem:[%s8484_s24 + $0x28] sm:$0xff] %vm4411_vm12, %v4400_v55  ;;  %v4402_v46 = vadd.f32 %v8477_v39, %v4374_v9 }
 0x7f7   : > { %v4384_v60 = vpop.xlane.xlu2 %4383 }
 0x7f8   : > { %v4407_v41 = vadd.f32 %v8477_v39, %v4384_v60  ;;  %4419 = vst.msk [vmem:[%s8484_s24 + $0x38] sm:$0xff] %vm4411_vm12, %v4402_v46 }
 0x7fa   : > { %4424 = vst.msk [vmem:[%s8484_s24 + $0x60] sm:$0xff] %vm4411_vm12, %v4407_v41 }
 0x7fb   : > { %v4376_v30 = vpop.xlane.xlu1 %4375 }
 0x7fc   : > { %v4403_v19 = vadd.f32 %v8477_v39, %v4376_v30 }
 0x7fd   : > { %v4380_v18 = vpop.xlane.xlu0 %4379 }
 0x7fe   : > { %4420 = vst.msk [vmem:[%s8484_s24 + $0x40] sm:$0xff] %vm4411_vm12, %v4403_v19  ;;  %v4405_v36 = vadd.f32 %v8477_v39, %v4380_v18 }
 0x800   : > { %4422 = vst.msk [vmem:[%s8484_s24 + $0x50] sm:$0xff] %vm4411_vm12, %v4405_v36 }
 0x803   : > { %v4382_v59 = vpop.xlane.xlu1 %4381 }
 0x804   : > { %v4406_v3 = vadd.f32 %v8477_v39, %v4382_v59 }
 0x805   : > { %v4386_v0 = vpop.xlane.xlu0 %4385 }
 0x806   : > { %4423 = vst.msk [vmem:[%s8484_s24 + $0x58] sm:$0xff] %vm4411_vm12, %v4406_v3  ;;  %v4408_v53 = vadd.f32 %v8477_v39, %v4386_v0 }
 0x808   : > { %4425 = vst.msk [vmem:[%s8484_s24 + $0x68] sm:$0xff] %vm4411_vm12, %v4408_v53 }
 0x851   : > { %v4388_v15 = vpop.xlane.xlu1 %4387 }
 0x852   : > { %v4409_v13 = vadd.f32 %v8477_v39, %v4388_v15 }
 0x854   : > { %4426 = vst.msk [vmem:[%s8484_s24 + $0x70] sm:$0xff] %vm4411_vm12, %v4409_v13 }
 0x85a   : > { %v4390_v17 = vpop.xlane.xlu2 %4389 }
 0x85b   : > { %v4410_v29 = vadd.f32 %v8477_v39, %v4390_v17 }
 0x85d   : > { %4427 = vst.msk [vmem:[%s8484_s24 + $0x78] sm:$0xff] %vm4411_vm12, %v4410_v29 }
 0x85e PF: > { %s25_s27 = sadd.s32 1, %s5128_s27  }
 0x85f   : > { %p22_p4 = scmp.ge.s32.totalorder %s25_s27, 4  }
 0x861   :  { %24 = sbr.rel (!%p22_p4) target bundleno = 3 (0x3), region = 102 }

</bundles_post_ra>
